<compile_context>
chip_gen: v7x
topology: tpu7x:2x2x1
jax: 0.10.0
libtpu: 0.0.40
codegen_flags: <defaults>
</compile_context>

<pallas_src>
import jax
import jax.numpy as jnp
import numpy as np
from jax.experimental import pallas as pl
from jax.experimental.pallas import tpu as pltpu


def _lstm_cell(gates, c_prev, H):
    """PyTorch gate order [i, f, g, o]. gates: (B, 4H) f32. Returns (h_new, c_new)."""
    i = jax.nn.sigmoid(gates[:, 0 * H:1 * H])
    f = jax.nn.sigmoid(gates[:, 1 * H:2 * H])
    g = jnp.tanh(gates[:, 2 * H:3 * H])
    o = jax.nn.sigmoid(gates[:, 3 * H:4 * H])
    c_new = f * c_prev + i * g
    h_new = o * jnp.tanh(c_new)
    return h_new, c_new


def bilstm_kernel(len_ref, emb_ref, w_in_ref, w_rf_ref, w_rb_ref, b_ref,
                  out_ref, h_out_ref, c_out_ref,
                  gx_f_ref, gx_b_ref, m_ref, out_f_ref, out_b_ref):
    """Fused bidirectional LSTM (single grid invocation, everything VMEM-resident).

    len_ref:   (B, 1)      int32   valid lengths
    emb_ref:   (T*B, E)    bf16    time-major embeddings (row t*B + b)
    w_in_ref:  (E, 8H)     bf16    [W_ih_fwd | W_ih_bwd], each gate-major [i f g o]
    w_rf_ref:  (H, 4H)     bf16    forward recurrent weights
    w_rb_ref:  (H, 4H)     bf16    backward recurrent weights
    b_ref:     (1, 8H)     f32     bias_ih + bias_hh, [fwd 4H | bwd 4H]
    out_ref:   (T, B, 2H)  f32     time-major output, lanes [fwd H | bwd H]
    h_out_ref: (B, 2H)     f32     final hidden, [h_f | h_b]
    c_out_ref: (B, 2H)     f32     final cell,   [c_f | c_b]
    gx_f_ref:  (T, B, 4H)  f32     scratch: fwd input-gate contributions
    gx_b_ref:  (T, B, 4H)  f32     scratch: bwd input-gate contributions
    m_ref:     (T, B, H)   f32     scratch: validity mask, m[t] = (t < len)
    out_f_ref: (T, B, H)   f32     scratch: fwd outputs (time-major)
    out_b_ref: (T, B, H)   f32     scratch: bwd outputs (time-major)
    """
    T, B, H2 = out_ref.shape
    H = H2 // 2

    # ---- hoisted input projection: all timesteps, both directions, bias folded ----
    gx = jnp.dot(emb_ref[...], w_in_ref[...],
                 preferred_element_type=jnp.float32) + b_ref[...]      # (T*B, 8H)
    gx_f_ref[...] = gx[:, :4 * H].reshape(T, B, 4 * H)
    gx_b_ref[...] = gx[:, 4 * H:].reshape(T, B, 4 * H)

    # ---- validity mask precomputed once: m[t, b, :] = 1.0 iff t < len[b] ----
    t_iota = jax.lax.broadcasted_iota(jnp.int32, (T, B, H), 0)
    lens_3d = len_ref[...].reshape(1, B, 1)
    m_ref[...] = (t_iota < lens_3d).astype(jnp.float32)

    # Recurrent weights loaded once and held across the time loop.
    w_rf = w_rf_ref[...]
    w_rb = w_rb_ref[...]

    def step(s, carry):
        h_f, c_f, h_b, c_b = carry                      # (B, H) f32 each
        tb = T - 1 - s                                  # backward time index

        # Per-direction recurrent matmuls (no zero-padded block-diagonal weights).
        gates_f = gx_f_ref[s] + jnp.dot(h_f.astype(jnp.bfloat16), w_rf,
                                        preferred_element_type=jnp.float32)
        gates_b = gx_b_ref[tb] + jnp.dot(h_b.astype(jnp.bfloat16), w_rb,
                                         preferred_element_type=jnp.float32)
        hf_new, cf_new = _lstm_cell(gates_f, c_f, H)
        hb_new, cb_new = _lstm_cell(gates_b, c_b, H)

        mf = m_ref[s]                                   # (B, H) {0., 1.}
        mb = m_ref[tb]

        # Full-width row stores into the per-direction time-major scratches.
        out_f_ref[s] = mf * hf_new
        out_b_ref[tb] = mb * hb_new

        # State freezes outside the valid range (pack/pad semantics).
        h_f = h_f + mf * (hf_new - h_f)
        c_f = c_f + mf * (cf_new - c_f)
        h_b = h_b + mb * (hb_new - h_b)
        c_b = c_b + mb * (cb_new - c_b)
        return h_f, c_f, h_b, c_b

    zeros = jnp.zeros((B, H), jnp.float32)
    h_f, c_f, h_b, c_b = jax.lax.fori_loop(
        0, T, step, (zeros, zeros, zeros, zeros), unroll=min(T, 8))

    # ---- single lane-dense bulk stores ----
    out_ref[...] = jnp.concatenate([out_f_ref[...], out_b_ref[...]], axis=-1)
    h_out_ref[...] = jnp.concatenate([h_f, h_b], axis=-1)
    c_out_ref[...] = jnp.concatenate([c_f, c_b], axis=-1)


def _fuse_lstm_weights(params):
    """Fold biases and fuse the two directions' input weights (direction-major columns)."""
    w_in = jnp.concatenate([params["wih_f"], params["wih_b"]], axis=1)   # (E, 8H)
    b = jnp.concatenate([params["b_f"], params["b_b"]], axis=1)          # (1, 8H)
    return (w_in.astype(jnp.bfloat16),
            params["whh_f"].astype(jnp.bfloat16),
            params["whh_b"].astype(jnp.bfloat16),
            b.astype(jnp.float32))


def sent_encoder_forward(params, input_var, input_len, return_emb=False):
    """Mirrors SentEncoder.forward (input2_var=None, eval-mode dropout)."""
    B, T = input_var.shape
    H = params["whh_f"].shape[0]

    # Embedding gather, time-major directly (no separate (B,T,E) transpose pass).
    emb_tm = params["embed"][input_var.T]                 # (T, B, E) float32
    E = emb_tm.shape[-1]
    # self.dropout(embed): identity at inference.

    lens2d = input_len.astype(jnp.int32).reshape(B, 1)
    w_in, w_rf, w_rb, b_cat = _fuse_lstm_weights(params)
    emb_flat = emb_tm.reshape(T * B, E).astype(jnp.bfloat16)

    vmem = pl.BlockSpec(memory_space=pltpu.MemorySpace.VMEM)
    out_tm, h_cat, c_cat = pl.pallas_call(
        bilstm_kernel,
        out_shape=(
            jax.ShapeDtypeStruct((T, B, 2 * H), jnp.float32),   # time-major output
            jax.ShapeDtypeStruct((B, 2 * H), jnp.float32),      # final h [h_f | h_b]
            jax.ShapeDtypeStruct((B, 2 * H), jnp.float32),      # final c [c_f | c_b]
        ),
        in_specs=[vmem] * 6,
        out_specs=(vmem, vmem, vmem),
        scratch_shapes=[
            pltpu.VMEM((T, B, 4 * H), jnp.float32),   # gx_f
            pltpu.VMEM((T, B, 4 * H), jnp.float32),   # gx_b
            pltpu.VMEM((T, B, H), jnp.float32),       # validity mask
            pltpu.VMEM((T, B, H), jnp.float32),       # fwd outputs (time-major)
            pltpu.VMEM((T, B, H), jnp.float32),       # bwd outputs (time-major)
        ],
    )(lens2d, emb_flat, w_in, w_rf, w_rb, b_cat)

    output = out_tm.transpose(1, 0, 2)                    # (B, T, 2H)
    # RNN.forward state reshape: (num_dirs, B, H) -> (num_layers=1, B, 2H).
    h = h_cat[None]
    c = c_cat[None]
    # output dropout: identity at inference.
    if return_emb:
        return output, (h, c), emb_tm.transpose(1, 0, 2)
    return output, (h, c)


def sent_encoder_reference(params, input_var, input_len):
    """Pure-JAX f32 reference (PyTorch bi-LSTM with pack/pad length masking)."""
    embed = params["embed"][input_var]                    # (B, T, E)
    B, T, _ = embed.shape
    H = params["whh_f"].shape[0]
    lens = input_len.astype(jnp.int32)

    def run(wih, whh, b, reverse):
        h = jnp.zeros((B, H), jnp.float32)
        c = jnp.zeros((B, H), jnp.float32)
        outs = [None] * T
        order = range(T - 1, -1, -1) if reverse else range(T)
        for t in order:
            gates = embed[:, t, :] @ wih + h @ whh + b
            i = jax.nn.sigmoid(gates[:, :H])
            f = jax.nn.sigmoid(gates[:, H:2 * H])
            g = jnp.tanh(gates[:, 2 * H:3 * H])
            o = jax.nn.sigmoid(gates[:, 3 * H:])
            c_new = f * c + i * g
            h_new = o * jnp.tanh(c_new)
            m = (lens > t).astype(jnp.float32)[:, None]
            outs[t] = m * h_new
            h = h + m * (h_new - h)
            c = c + m * (c_new - c)
        return jnp.stack(outs, axis=1), h, c

    of, hf, cf = run(params["wih_f"], params["whh_f"], params["b_f"], False)
    ob, hb, cb = run(params["wih_b"], params["whh_b"], params["b_b"], True)
    output = jnp.concatenate([of, ob], axis=-1)
    h = jnp.concatenate([hf, hb], axis=-1)[None]
    c = jnp.concatenate([cf, cb], axis=-1)[None]
    return output, (h, c)


def init_params(key, vocab_size, embed_size, hidden_size):
    """Deterministic synthetic parameters (shapes as in the PyTorch module)."""
    ks = jax.random.split(key, 9)
    k = 1.0 / jnp.sqrt(hidden_size)
    E, H = embed_size, hidden_size

    def u(key, shape):
        return jax.random.uniform(key, shape, jnp.float32, -k, k)

    params = {
        "embed": jax.random.normal(ks[0], (vocab_size, E), jnp.float32),
        # weights stored transposed relative to PyTorch: (in, 4H), gate order [i, f, g, o]
        "wih_f": u(ks[1], (E, 4 * H)),
        "whh_f": u(ks[2], (H, 4 * H)),
        "b_f":   u(ks[3], (1, 4 * H)) + u(ks[4], (1, 4 * H)),   # bias_ih + bias_hh
        "wih_b": u(ks[5], (E, 4 * H)),
        "whh_b": u(ks[6], (H, 4 * H)),
        "b_b":   u(ks[7], (1, 4 * H)) + u(ks[8], (1, 4 * H)),
    }
    return params


if __name__ == "__main__":
    B, T = 2, 8
    VOCAB, E, H = 50, 32, 32

    key = jax.random.PRNGKey(0)
    k_tok, k_param = jax.random.split(key)

    input_var = jax.random.randint(k_tok, (B, T), 0, VOCAB, dtype=jnp.int32)
    # max length == T so pad_packed_sequence would pad back to T
    input_len = jnp.array([T, 5], dtype=jnp.int32)

    params = init_params(k_param, VOCAB, E, H)

    output, (h, c) = sent_encoder_forward(params, input_var, input_len)
    jax.block_until_ready((output, h, c))

    assert output.shape == (B, T, 2 * H)
    assert h.shape == (1, B, 2 * H) and c.shape == (1, B, 2 * H)
    # padded positions of the shorter sequence must be zero (pack/pad semantics)
    assert float(jnp.abs(output[1, 5:, :]).max()) == 0.0

    # internal consistency: final fwd state == output at t = len-1 (fwd lanes),
    # final bwd state == output at t = 0 (bwd lanes)
    lens = [T, 5]
    out_np, h_np = np.asarray(output), np.asarray(h)
    for b in range(B):
        np.testing.assert_allclose(h_np[0, b, :H], out_np[b, lens[b] - 1, :H],
                                   rtol=1e-6, atol=1e-6)
        np.testing.assert_allclose(h_np[0, b, H:], out_np[b, 0, H:],
                                   rtol=1e-6, atol=1e-6)

    # f32 reference check (kernel uses bf16 MXU operands -> small tolerance)
    ref_out, (ref_h, ref_c) = sent_encoder_reference(params, input_var, input_len)
    np.testing.assert_allclose(out_np, np.asarray(ref_out), atol=5e-2, rtol=5e-2)
    np.testing.assert_allclose(h_np, np.asarray(ref_h), atol=5e-2, rtol=5e-2)
    np.testing.assert_allclose(np.asarray(c), np.asarray(ref_c), atol=5e-2, rtol=5e-2)

    print("KERNEL_OK")
</pallas_src>

<mosaic_0001>
module attributes {stable_mosaic.version = 11 : i64} {
  func.func @bilstm_kernel(%arg0: memref<2x1xi32, #tpu.memory_space<vmem>>, %arg1: memref<16x32xbf16, #tpu.memory_space<vmem>>, %arg2: memref<32x256xbf16, #tpu.memory_space<vmem>>, %arg3: memref<32x128xbf16, #tpu.memory_space<vmem>>, %arg4: memref<32x128xbf16, #tpu.memory_space<vmem>>, %arg5: memref<1x256xf32, #tpu.memory_space<vmem>>, %arg6: memref<8x2x64xf32, #tpu.memory_space<vmem>>, %arg7: memref<2x64xf32, #tpu.memory_space<vmem>>, %arg8: memref<2x64xf32, #tpu.memory_space<vmem>>, %arg9: memref<8x2x128xf32, #tpu.memory_space<vmem>>, %arg10: memref<8x2x128xf32, #tpu.memory_space<vmem>>, %arg11: memref<8x2x32xf32, #tpu.memory_space<vmem>>, %arg12: memref<8x2x32xf32, #tpu.memory_space<vmem>>, %arg13: memref<8x2x32xf32, #tpu.memory_space<vmem>>) attributes {dimension_semantics = [], scalar_prefetch = 0 : i64, scratch_operands = 5 : i64, tpu.core_type = #tpu.core_type<tc>} {
    %c0 = arith.constant 0 : index
    %c0_0 = arith.constant 0 : index
    %0 = vector.load %arg1[%c0, %c0_0] : memref<16x32xbf16, #tpu.memory_space<vmem>>, vector<16x32xbf16>
    %c0_1 = arith.constant 0 : index
    %c0_2 = arith.constant 0 : index
    %1 = vector.load %arg2[%c0_1, %c0_2] : memref<32x256xbf16, #tpu.memory_space<vmem>>, vector<32x256xbf16>
    %cst = arith.constant dense<0.000000e+00> : vector<16x256xf32>
    %2 = tpu.matmul %0, %1, %cst {dimension_numbers = #tpu.dot_dimension_numbers<[1], [0], [0], [1], [0, 0, 1, 1], [], []>} : vector<16x32xbf16>, vector<32x256xbf16>, vector<16x256xf32> -> vector<16x256xf32>
    %c0_3 = arith.constant 0 : index
    %c0_4 = arith.constant 0 : index
    %3 = vector.load %arg5[%c0_3, %c0_4] : memref<1x256xf32, #tpu.memory_space<vmem>>, vector<1x256xf32>
    %4 = vector.broadcast %3 : vector<1x256xf32> to vector<16x256xf32>
    %5 = arith.addf %2, %4 : vector<16x256xf32>
    %6 = vector.extract_strided_slice %5 {offsets = [0, 0], sizes = [16, 128], strides = [1, 1]} : vector<16x256xf32> to vector<16x128xf32>
    %7 = vector.shape_cast %6 : vector<16x128xf32> to vector<8x2x128xf32>
    %c0_5 = arith.constant 0 : index
    %c0_6 = arith.constant 0 : index
    %c0_7 = arith.constant 0 : index
    %8 = vector.load %arg9[%c0_5, %c0_6, %c0_7] : memref<8x2x128xf32, #tpu.memory_space<vmem>>, vector<8x2x128xf32>
    tpu.vector_store %arg9[%c0_5, %c0_6, %c0_7], %7 {strides = array<i32>} : memref<8x2x128xf32, #tpu.memory_space<vmem>>, vector<8x2x128xf32>,
    %9 = vector.extract_strided_slice %5 {offsets = [0, 128], sizes = [16, 128], strides = [1, 1]} : vector<16x256xf32> to vector<16x128xf32>
    %10 = vector.shape_cast %9 : vector<16x128xf32> to vector<8x2x128xf32>
    %c0_8 = arith.constant 0 : index
    %c0_9 = arith.constant 0 : index
    %c0_10 = arith.constant 0 : index
    %11 = vector.load %arg10[%c0_8, %c0_9, %c0_10] : memref<8x2x128xf32, #tpu.memory_space<vmem>>, vector<8x2x128xf32>
    tpu.vector_store %arg10[%c0_8, %c0_9, %c0_10], %10 {strides = array<i32>} : memref<8x2x128xf32, #tpu.memory_space<vmem>>, vector<8x2x128xf32>,
    %12 = tpu.iota {dimensions = array<i32: 0>} : vector<8x2x32xi32>
    %c0_11 = arith.constant 0 : index
    %c0_12 = arith.constant 0 : index
    %13 = vector.load %arg0[%c0_11, %c0_12] : memref<2x1xi32, #tpu.memory_space<vmem>>, vector<2x1xi32>
    %14 = vector.shape_cast %13 : vector<2x1xi32> to vector<1x2x1xi32>
    %15 = vector.broadcast %14 : vector<1x2x1xi32> to vector<8x2x32xi32>
    %16 = arith.cmpi slt, %12, %15 : vector<8x2x32xi32>
    %17 = arith.extui %16 : vector<8x2x32xi1> to vector<8x2x32xi32>
    %18 = arith.sitofp %17 : vector<8x2x32xi32> to vector<8x2x32xf32>
    %c0_13 = arith.constant 0 : index
    %c0_14 = arith.constant 0 : index
    %c0_15 = arith.constant 0 : index
    %19 = vector.load %arg11[%c0_13, %c0_14, %c0_15] : memref<8x2x32xf32, #tpu.memory_space<vmem>>, vector<8x2x32xf32>
    tpu.vector_store %arg11[%c0_13, %c0_14, %c0_15], %18 {strides = array<i32>} : memref<8x2x32xf32, #tpu.memory_space<vmem>>, vector<8x2x32xf32>,
    %c0_16 = arith.constant 0 : index
    %c0_17 = arith.constant 0 : index
    %20 = vector.load %arg3[%c0_16, %c0_17] : memref<32x128xbf16, #tpu.memory_space<vmem>>, vector<32x128xbf16>
    %c0_18 = arith.constant 0 : index
    %c0_19 = arith.constant 0 : index
    %21 = vector.load %arg4[%c0_18, %c0_19] : memref<32x128xbf16, #tpu.memory_space<vmem>>, vector<32x128xbf16>
    %cst_20 = arith.constant 0.000000e+00 : f32
    %22 = vector.broadcast %cst_20 : f32 to vector<2x32xf32>
    %c0_i32 = arith.constant 0 : i32
    %c7_i32 = arith.constant 7 : i32
    %23 = arith.subi %c7_i32, %c0_i32 : i32
    %24 = arith.index_cast %c0_i32 : i32 to index
    %c0_21 = arith.constant 0 : index
    %c0_22 = arith.constant 0 : index
    %25 = vector.load %arg9[%24, %c0_21, %c0_22] : memref<8x2x128xf32, #tpu.memory_space<vmem>>, vector<1x2x128xf32>
    %26 = vector.shape_cast %25 : vector<1x2x128xf32> to vector<2x128xf32>
    %27 = arith.truncf %22 : vector<2x32xf32> to vector<2x32xbf16>
    %cst_23 = arith.constant dense<0.000000e+00> : vector<2x128xf32>
    %28 = tpu.matmul %27, %20, %cst_23 {dimension_numbers = #tpu.dot_dimension_numbers<[1], [0], [0], [1], [0, 0, 1, 1], [], []>} : vector<2x32xbf16>, vector<32x128xbf16>, vector<2x128xf32> -> vector<2x128xf32>
    %29 = arith.addf %26, %28 : vector<2x128xf32>
    %30 = arith.index_cast %23 : i32 to index
    %c0_24 = arith.constant 0 : index
    %c0_25 = arith.constant 0 : index
    %31 = vector.load %arg10[%30, %c0_24, %c0_25] : memref<8x2x128xf32, #tpu.memory_space<vmem>>, vector<1x2x128xf32>
    %32 = vector.shape_cast %31 : vector<1x2x128xf32> to vector<2x128xf32>
    %33 = arith.truncf %22 : vector<2x32xf32> to vector<2x32xbf16>
    %cst_26 = arith.constant dense<0.000000e+00> : vector<2x128xf32>
    %34 = tpu.matmul %33, %21, %cst_26 {dimension_numbers = #tpu.dot_dimension_numbers<[1], [0], [0], [1], [0, 0, 1, 1], [], []>} : vector<2x32xbf16>, vector<32x128xbf16>, vector<2x128xf32> -> vector<2x128xf32>
    %35 = arith.addf %32, %34 : vector<2x128xf32>
    %36 = vector.extract_strided_slice %29 {offsets = [0, 0], sizes = [2, 32], strides = [1, 1]} : vector<2x128xf32> to vector<2x32xf32>
    %37 = arith.negf %36 : vector<2x32xf32>
    %38 = math.exp %37 : vector<2x32xf32>
    %cst_27 = arith.constant 1.000000e+00 : f32
    %39 = vector.broadcast %cst_27 : f32 to vector<2x32xf32>
    %40 = arith.addf %39, %38 : vector<2x32xf32>
    %41 = arith.divf %39, %40 : vector<2x32xf32>
    %42 = vector.extract_strided_slice %29 {offsets = [0, 32], sizes = [2, 32], strides = [1, 1]} : vector<2x128xf32> to vector<2x32xf32>
    %43 = arith.negf %42 : vector<2x32xf32>
    %44 = math.exp %43 : vector<2x32xf32>
    %cst_28 = arith.constant 1.000000e+00 : f32
    %45 = vector.broadcast %cst_28 : f32 to vector<2x32xf32>
    %46 = arith.addf %45, %44 : vector<2x32xf32>
    %47 = arith.divf %45, %46 : vector<2x32xf32>
    %48 = vector.extract_strided_slice %29 {offsets = [0, 64], sizes = [2, 32], strides = [1, 1]} : vector<2x128xf32> to vector<2x32xf32>
    %49 = math.tanh %48 : vector<2x32xf32>
    %50 = vector.extract_strided_slice %29 {offsets = [0, 96], sizes = [2, 32], strides = [1, 1]} : vector<2x128xf32> to vector<2x32xf32>
    %51 = arith.negf %50 : vector<2x32xf32>
    %52 = math.exp %51 : vector<2x32xf32>
    %cst_29 = arith.constant 1.000000e+00 : f32
    %53 = vector.broadcast %cst_29 : f32 to vector<2x32xf32>
    %54 = arith.addf %53, %52 : vector<2x32xf32>
    %55 = arith.divf %53, %54 : vector<2x32xf32>
    %56 = arith.mulf %47, %22 : vector<2x32xf32>
    %57 = arith.mulf %41, %49 : vector<2x32xf32>
    %58 = arith.addf %56, %57 : vector<2x32xf32>
    %59 = math.tanh %58 : vector<2x32xf32>
    %60 = arith.mulf %55, %59 : vector<2x32xf32>
    %61 = vector.extract_strided_slice %35 {offsets = [0, 0], sizes = [2, 32], strides = [1, 1]} : vector<2x128xf32> to vector<2x32xf32>
    %62 = arith.negf %61 : vector<2x32xf32>
    %63 = math.exp %62 : vector<2x32xf32>
    %cst_30 = arith.constant 1.000000e+00 : f32
    %64 = vector.broadcast %cst_30 : f32 to vector<2x32xf32>
    %65 = arith.addf %64, %63 : vector<2x32xf32>
    %66 = arith.divf %64, %65 : vector<2x32xf32>
    %67 = vector.extract_strided_slice %35 {offsets = [0, 32], sizes = [2, 32], strides = [1, 1]} : vector<2x128xf32> to vector<2x32xf32>
    %68 = arith.negf %67 : vector<2x32xf32>
    %69 = math.exp %68 : vector<2x32xf32>
    %cst_31 = arith.constant 1.000000e+00 : f32
    %70 = vector.broadcast %cst_31 : f32 to vector<2x32xf32>
    %71 = arith.addf %70, %69 : vector<2x32xf32>
    %72 = arith.divf %70, %71 : vector<2x32xf32>
    %73 = vector.extract_strided_slice %35 {offsets = [0, 64], sizes = [2, 32], strides = [1, 1]} : vector<2x128xf32> to vector<2x32xf32>
    %74 = math.tanh %73 : vector<2x32xf32>
    %75 = vector.extract_strided_slice %35 {offsets = [0, 96], sizes = [2, 32], strides = [1, 1]} : vector<2x128xf32> to vector<2x32xf32>
    %76 = arith.negf %75 : vector<2x32xf32>
    %77 = math.exp %76 : vector<2x32xf32>
    %cst_32 = arith.constant 1.000000e+00 : f32
    %78 = vector.broadcast %cst_32 : f32 to vector<2x32xf32>
    %79 = arith.addf %78, %77 : vector<2x32xf32>
    %80 = arith.divf %78, %79 : vector<2x32xf32>
    %81 = arith.mulf %72, %22 : vector<2x32xf32>
    %82 = arith.mulf %66, %74 : vector<2x32xf32>
    %83 = arith.addf %81, %82 : vector<2x32xf32>
    %84 = math.tanh %83 : vector<2x32xf32>
    %85 = arith.mulf %80, %84 : vector<2x32xf32>
    %86 = arith.index_cast %c0_i32 : i32 to index
    %c0_33 = arith.constant 0 : index
    %c0_34 = arith.constant 0 : index
    %87 = vector.load %arg11[%86, %c0_33, %c0_34] : memref<8x2x32xf32, #tpu.memory_space<vmem>>, vector<1x2x32xf32>
    %88 = vector.shape_cast %87 : vector<1x2x32xf32> to vector<2x32xf32>
    %89 = arith.index_cast %23 : i32 to index
    %c0_35 = arith.constant 0 : index
    %c0_36 = arith.constant 0 : index
    %90 = vector.load %arg11[%89, %c0_35, %c0_36] : memref<8x2x32xf32, #tpu.memory_space<vmem>>, vector<1x2x32xf32>
    %91 = vector.shape_cast %90 : vector<1x2x32xf32> to vector<2x32xf32>
    %92 = arith.mulf %88, %60 : vector<2x32xf32>
    %93 = arith.index_cast %c0_i32 : i32 to index
    %c0_37 = arith.constant 0 : index
    %c0_38 = arith.constant 0 : index
    %94 = vector.load %arg12[%93, %c0_37, %c0_38] : memref<8x2x32xf32, #tpu.memory_space<vmem>>, vector<1x2x32xf32>
    %95 = vector.shape_cast %94 : vector<1x2x32xf32> to vector<2x32xf32>
    %96 = vector.shape_cast %92 : vector<2x32xf32> to vector<1x2x32xf32>
    tpu.vector_store %arg12[%93, %c0_37, %c0_38], %96 {strides = array<i32>} : memref<8x2x32xf32, #tpu.memory_space<vmem>>, vector<1x2x32xf32>,
    %97 = arith.mulf %91, %85 : vector<2x32xf32>
    %98 = arith.index_cast %23 : i32 to index
    %c0_39 = arith.constant 0 : index
    %c0_40 = arith.constant 0 : index
    %99 = vector.load %arg13[%98, %c0_39, %c0_40] : memref<8x2x32xf32, #tpu.memory_space<vmem>>, vector<1x2x32xf32>
    %100 = vector.shape_cast %99 : vector<1x2x32xf32> to vector<2x32xf32>
    %101 = vector.shape_cast %97 : vector<2x32xf32> to vector<1x2x32xf32>
    tpu.vector_store %arg13[%98, %c0_39, %c0_40], %101 {strides = array<i32>} : memref<8x2x32xf32, #tpu.memory_space<vmem>>, vector<1x2x32xf32>,
    %102 = arith.subf %60, %22 : vector<2x32xf32>
    %103 = arith.mulf %88, %102 : vector<2x32xf32>
    %104 = arith.addf %22, %103 : vector<2x32xf32>
    %105 = arith.subf %58, %22 : vector<2x32xf32>
    %106 = arith.mulf %88, %105 : vector<2x32xf32>
    %107 = arith.addf %22, %106 : vector<2x32xf32>
    %108 = arith.subf %85, %22 : vector<2x32xf32>
    %109 = arith.mulf %91, %108 : vector<2x32xf32>
    %110 = arith.addf %22, %109 : vector<2x32xf32>
    %111 = arith.subf %83, %22 : vector<2x32xf32>
    %112 = arith.mulf %91, %111 : vector<2x32xf32>
    %113 = arith.addf %22, %112 : vector<2x32xf32>
    %c1_i32 = arith.constant 1 : i32
    %c7_i32_41 = arith.constant 7 : i32
    %114 = arith.subi %c7_i32_41, %c1_i32 : i32
    %115 = arith.index_cast %c1_i32 : i32 to index
    %c0_42 = arith.constant 0 : index
    %c0_43 = arith.constant 0 : index
    %116 = vector.load %arg9[%115, %c0_42, %c0_43] : memref<8x2x128xf32, #tpu.memory_space<vmem>>, vector<1x2x128xf32>
    %117 = vector.shape_cast %116 : vector<1x2x128xf32> to vector<2x128xf32>
    %118 = arith.truncf %104 : vector<2x32xf32> to vector<2x32xbf16>
    %cst_44 = arith.constant dense<0.000000e+00> : vector<2x128xf32>
    %119 = tpu.matmul %118, %20, %cst_44 {dimension_numbers = #tpu.dot_dimension_numbers<[1], [0], [0], [1], [0, 0, 1, 1], [], []>} : vector<2x32xbf16>, vector<32x128xbf16>, vector<2x128xf32> -> vector<2x128xf32>
    %120 = arith.addf %117, %119 : vector<2x128xf32>
    %121 = arith.index_cast %114 : i32 to index
    %c0_45 = arith.constant 0 : index
    %c0_46 = arith.constant 0 : index
    %122 = vector.load %arg10[%121, %c0_45, %c0_46] : memref<8x2x128xf32, #tpu.memory_space<vmem>>, vector<1x2x128xf32>
    %123 = vector.shape_cast %122 : vector<1x2x128xf32> to vector<2x128xf32>
    %124 = arith.truncf %110 : vector<2x32xf32> to vector<2x32xbf16>
    %cst_47 = arith.constant dense<0.000000e+00> : vector<2x128xf32>
    %125 = tpu.matmul %124, %21, %cst_47 {dimension_numbers = #tpu.dot_dimension_numbers<[1], [0], [0], [1], [0, 0, 1, 1], [], []>} : vector<2x32xbf16>, vector<32x128xbf16>, vector<2x128xf32> -> vector<2x128xf32>
    %126 = arith.addf %123, %125 : vector<2x128xf32>
    %127 = vector.extract_strided_slice %120 {offsets = [0, 0], sizes = [2, 32], strides = [1, 1]} : vector<2x128xf32> to vector<2x32xf32>
    %128 = arith.negf %127 : vector<2x32xf32>
    %129 = math.exp %128 : vector<2x32xf32>
    %cst_48 = arith.constant 1.000000e+00 : f32
    %130 = vector.broadcast %cst_48 : f32 to vector<2x32xf32>
    %131 = arith.addf %130, %129 : vector<2x32xf32>
    %132 = arith.divf %130, %131 : vector<2x32xf32>
    %133 = vector.extract_strided_slice %120 {offsets = [0, 32], sizes = [2, 32], strides = [1, 1]} : vector<2x128xf32> to vector<2x32xf32>
    %134 = arith.negf %133 : vector<2x32xf32>
    %135 = math.exp %134 : vector<2x32xf32>
    %cst_49 = arith.constant 1.000000e+00 : f32
    %136 = vector.broadcast %cst_49 : f32 to vector<2x32xf32>
    %137 = arith.addf %136, %135 : vector<2x32xf32>
    %138 = arith.divf %136, %137 : vector<2x32xf32>
    %139 = vector.extract_strided_slice %120 {offsets = [0, 64], sizes = [2, 32], strides = [1, 1]} : vector<2x128xf32> to vector<2x32xf32>
    %140 = math.tanh %139 : vector<2x32xf32>
    %141 = vector.extract_strided_slice %120 {offsets = [0, 96], sizes = [2, 32], strides = [1, 1]} : vector<2x128xf32> to vector<2x32xf32>
    %142 = arith.negf %141 : vector<2x32xf32>
    %143 = math.exp %142 : vector<2x32xf32>
    %cst_50 = arith.constant 1.000000e+00 : f32
    %144 = vector.broadcast %cst_50 : f32 to vector<2x32xf32>
    %145 = arith.addf %144, %143 : vector<2x32xf32>
    %146 = arith.divf %144, %145 : vector<2x32xf32>
    %147 = arith.mulf %138, %107 : vector<2x32xf32>
    %148 = arith.mulf %132, %140 : vector<2x32xf32>
    %149 = arith.addf %147, %148 : vector<2x32xf32>
    %150 = math.tanh %149 : vector<2x32xf32>
    %151 = arith.mulf %146, %150 : vector<2x32xf32>
    %152 = vector.extract_strided_slice %126 {offsets = [0, 0], sizes = [2, 32], strides = [1, 1]} : vector<2x128xf32> to vector<2x32xf32>
    %153 = arith.negf %152 : vector<2x32xf32>
    %154 = math.exp %153 : vector<2x32xf32>
    %cst_51 = arith.constant 1.000000e+00 : f32
    %155 = vector.broadcast %cst_51 : f32 to vector<2x32xf32>
    %156 = arith.addf %155, %154 : vector<2x32xf32>
    %157 = arith.divf %155, %156 : vector<2x32xf32>
    %158 = vector.extract_strided_slice %126 {offsets = [0, 32], sizes = [2, 32], strides = [1, 1]} : vector<2x128xf32> to vector<2x32xf32>
    %159 = arith.negf %158 : vector<2x32xf32>
    %160 = math.exp %159 : vector<2x32xf32>
    %cst_52 = arith.constant 1.000000e+00 : f32
    %161 = vector.broadcast %cst_52 : f32 to vector<2x32xf32>
    %162 = arith.addf %161, %160 : vector<2x32xf32>
    %163 = arith.divf %161, %162 : vector<2x32xf32>
    %164 = vector.extract_strided_slice %126 {offsets = [0, 64], sizes = [2, 32], strides = [1, 1]} : vector<2x128xf32> to vector<2x32xf32>
    %165 = math.tanh %164 : vector<2x32xf32>
    %166 = vector.extract_strided_slice %126 {offsets = [0, 96], sizes = [2, 32], strides = [1, 1]} : vector<2x128xf32> to vector<2x32xf32>
    %167 = arith.negf %166 : vector<2x32xf32>
    %168 = math.exp %167 : vector<2x32xf32>
    %cst_53 = arith.constant 1.000000e+00 : f32
    %169 = vector.broadcast %cst_53 : f32 to vector<2x32xf32>
    %170 = arith.addf %169, %168 : vector<2x32xf32>
    %171 = arith.divf %169, %170 : vector<2x32xf32>
    %172 = arith.mulf %163, %113 : vector<2x32xf32>
    %173 = arith.mulf %157, %165 : vector<2x32xf32>
    %174 = arith.addf %172, %173 : vector<2x32xf32>
    %175 = math.tanh %174 : vector<2x32xf32>
    %176 = arith.mulf %171, %175 : vector<2x32xf32>
    %177 = arith.index_cast %c1_i32 : i32 to index
    %c0_54 = arith.constant 0 : index
    %c0_55 = arith.constant 0 : index
    %178 = vector.load %arg11[%177, %c0_54, %c0_55] : memref<8x2x32xf32, #tpu.memory_space<vmem>>, vector<1x2x32xf32>
    %179 = vector.shape_cast %178 : vector<1x2x32xf32> to vector<2x32xf32>
    %180 = arith.index_cast %114 : i32 to index
    %c0_56 = arith.constant 0 : index
    %c0_57 = arith.constant 0 : index
    %181 = vector.load %arg11[%180, %c0_56, %c0_57] : memref<8x2x32xf32, #tpu.memory_space<vmem>>, vector<1x2x32xf32>
    %182 = vector.shape_cast %181 : vector<1x2x32xf32> to vector<2x32xf32>
    %183 = arith.mulf %179, %151 : vector<2x32xf32>
    %184 = arith.index_cast %c1_i32 : i32 to index
    %c0_58 = arith.constant 0 : index
    %c0_59 = arith.constant 0 : index
    %185 = vector.load %arg12[%184, %c0_58, %c0_59] : memref<8x2x32xf32, #tpu.memory_space<vmem>>, vector<1x2x32xf32>
    %186 = vector.shape_cast %185 : vector<1x2x32xf32> to vector<2x32xf32>
    %187 = vector.shape_cast %183 : vector<2x32xf32> to vector<1x2x32xf32>
    tpu.vector_store %arg12[%184, %c0_58, %c0_59], %187 {strides = array<i32>} : memref<8x2x32xf32, #tpu.memory_space<vmem>>, vector<1x2x32xf32>,
    %188 = arith.mulf %182, %176 : vector<2x32xf32>
    %189 = arith.index_cast %114 : i32 to index
    %c0_60 = arith.constant 0 : index
    %c0_61 = arith.constant 0 : index
    %190 = vector.load %arg13[%189, %c0_60, %c0_61] : memref<8x2x32xf32, #tpu.memory_space<vmem>>, vector<1x2x32xf32>
    %191 = vector.shape_cast %190 : vector<1x2x32xf32> to vector<2x32xf32>
    %192 = vector.shape_cast %188 : vector<2x32xf32> to vector<1x2x32xf32>
    tpu.vector_store %arg13[%189, %c0_60, %c0_61], %192 {strides = array<i32>} : memref<8x2x32xf32, #tpu.memory_space<vmem>>, vector<1x2x32xf32>,
    %193 = arith.subf %151, %104 : vector<2x32xf32>
    %194 = arith.mulf %179, %193 : vector<2x32xf32>
    %195 = arith.addf %104, %194 : vector<2x32xf32>
    %196 = arith.subf %149, %107 : vector<2x32xf32>
    %197 = arith.mulf %179, %196 : vector<2x32xf32>
    %198 = arith.addf %107, %197 : vector<2x32xf32>
    %199 = arith.subf %176, %110 : vector<2x32xf32>
    %200 = arith.mulf %182, %199 : vector<2x32xf32>
    %201 = arith.addf %110, %200 : vector<2x32xf32>
    %202 = arith.subf %174, %113 : vector<2x32xf32>
    %203 = arith.mulf %182, %202 : vector<2x32xf32>
    %204 = arith.addf %113, %203 : vector<2x32xf32>
    %c2_i32 = arith.constant 2 : i32
    %c7_i32_62 = arith.constant 7 : i32
    %205 = arith.subi %c7_i32_62, %c2_i32 : i32
    %206 = arith.index_cast %c2_i32 : i32 to index
    %c0_63 = arith.constant 0 : index
    %c0_64 = arith.constant 0 : index
    %207 = vector.load %arg9[%206, %c0_63, %c0_64] : memref<8x2x128xf32, #tpu.memory_space<vmem>>, vector<1x2x128xf32>
    %208 = vector.shape_cast %207 : vector<1x2x128xf32> to vector<2x128xf32>
    %209 = arith.truncf %195 : vector<2x32xf32> to vector<2x32xbf16>
    %cst_65 = arith.constant dense<0.000000e+00> : vector<2x128xf32>
    %210 = tpu.matmul %209, %20, %cst_65 {dimension_numbers = #tpu.dot_dimension_numbers<[1], [0], [0], [1], [0, 0, 1, 1], [], []>} : vector<2x32xbf16>, vector<32x128xbf16>, vector<2x128xf32> -> vector<2x128xf32>
    %211 = arith.addf %208, %210 : vector<2x128xf32>
    %212 = arith.index_cast %205 : i32 to index
    %c0_66 = arith.constant 0 : index
    %c0_67 = arith.constant 0 : index
    %213 = vector.load %arg10[%212, %c0_66, %c0_67] : memref<8x2x128xf32, #tpu.memory_space<vmem>>, vector<1x2x128xf32>
    %214 = vector.shape_cast %213 : vector<1x2x128xf32> to vector<2x128xf32>
    %215 = arith.truncf %201 : vector<2x32xf32> to vector<2x32xbf16>
    %cst_68 = arith.constant dense<0.000000e+00> : vector<2x128xf32>
    %216 = tpu.matmul %215, %21, %cst_68 {dimension_numbers = #tpu.dot_dimension_numbers<[1], [0], [0], [1], [0, 0, 1, 1], [], []>} : vector<2x32xbf16>, vector<32x128xbf16>, vector<2x128xf32> -> vector<2x128xf32>
    %217 = arith.addf %214, %216 : vector<2x128xf32>
    %218 = vector.extract_strided_slice %211 {offsets = [0, 0], sizes = [2, 32], strides = [1, 1]} : vector<2x128xf32> to vector<2x32xf32>
    %219 = arith.negf %218 : vector<2x32xf32>
    %220 = math.exp %219 : vector<2x32xf32>
    %cst_69 = arith.constant 1.000000e+00 : f32
    %221 = vector.broadcast %cst_69 : f32 to vector<2x32xf32>
    %222 = arith.addf %221, %220 : vector<2x32xf32>
    %223 = arith.divf %221, %222 : vector<2x32xf32>
    %224 = vector.extract_strided_slice %211 {offsets = [0, 32], sizes = [2, 32], strides = [1, 1]} : vector<2x128xf32> to vector<2x32xf32>
    %225 = arith.negf %224 : vector<2x32xf32>
    %226 = math.exp %225 : vector<2x32xf32>
    %cst_70 = arith.constant 1.000000e+00 : f32
    %227 = vector.broadcast %cst_70 : f32 to vector<2x32xf32>
    %228 = arith.addf %227, %226 : vector<2x32xf32>
    %229 = arith.divf %227, %228 : vector<2x32xf32>
    %230 = vector.extract_strided_slice %211 {offsets = [0, 64], sizes = [2, 32], strides = [1, 1]} : vector<2x128xf32> to vector<2x32xf32>
    %231 = math.tanh %230 : vector<2x32xf32>
    %232 = vector.extract_strided_slice %211 {offsets = [0, 96], sizes = [2, 32], strides = [1, 1]} : vector<2x128xf32> to vector<2x32xf32>
    %233 = arith.negf %232 : vector<2x32xf32>
    %234 = math.exp %233 : vector<2x32xf32>
    %cst_71 = arith.constant 1.000000e+00 : f32
    %235 = vector.broadcast %cst_71 : f32 to vector<2x32xf32>
    %236 = arith.addf %235, %234 : vector<2x32xf32>
    %237 = arith.divf %235, %236 : vector<2x32xf32>
    %238 = arith.mulf %229, %198 : vector<2x32xf32>
    %239 = arith.mulf %223, %231 : vector<2x32xf32>
    %240 = arith.addf %238, %239 : vector<2x32xf32>
    %241 = math.tanh %240 : vector<2x32xf32>
    %242 = arith.mulf %237, %241 : vector<2x32xf32>
    %243 = vector.extract_strided_slice %217 {offsets = [0, 0], sizes = [2, 32], strides = [1, 1]} : vector<2x128xf32> to vector<2x32xf32>
    %244 = arith.negf %243 : vector<2x32xf32>
    %245 = math.exp %244 : vector<2x32xf32>
    %cst_72 = arith.constant 1.000000e+00 : f32
    %246 = vector.broadcast %cst_72 : f32 to vector<2x32xf32>
    %247 = arith.addf %246, %245 : vector<2x32xf32>
    %248 = arith.divf %246, %247 : vector<2x32xf32>
    %249 = vector.extract_strided_slice %217 {offsets = [0, 32], sizes = [2, 32], strides = [1, 1]} : vector<2x128xf32> to vector<2x32xf32>
    %250 = arith.negf %249 : vector<2x32xf32>
    %251 = math.exp %250 : vector<2x32xf32>
    %cst_73 = arith.constant 1.000000e+00 : f32
    %252 = vector.broadcast %cst_73 : f32 to vector<2x32xf32>
    %253 = arith.addf %252, %251 : vector<2x32xf32>
    %254 = arith.divf %252, %253 : vector<2x32xf32>
    %255 = vector.extract_strided_slice %217 {offsets = [0, 64], sizes = [2, 32], strides = [1, 1]} : vector<2x128xf32> to vector<2x32xf32>
    %256 = math.tanh %255 : vector<2x32xf32>
    %257 = vector.extract_strided_slice %217 {offsets = [0, 96], sizes = [2, 32], strides = [1, 1]} : vector<2x128xf32> to vector<2x32xf32>
    %258 = arith.negf %257 : vector<2x32xf32>
    %259 = math.exp %258 : vector<2x32xf32>
    %cst_74 = arith.constant 1.000000e+00 : f32
    %260 = vector.broadcast %cst_74 : f32 to vector<2x32xf32>
    %261 = arith.addf %260, %259 : vector<2x32xf32>
    %262 = arith.divf %260, %261 : vector<2x32xf32>
    %263 = arith.mulf %254, %204 : vector<2x32xf32>
    %264 = arith.mulf %248, %256 : vector<2x32xf32>
    %265 = arith.addf %263, %264 : vector<2x32xf32>
    %266 = math.tanh %265 : vector<2x32xf32>
    %267 = arith.mulf %262, %266 : vector<2x32xf32>
    %268 = arith.index_cast %c2_i32 : i32 to index
    %c0_75 = arith.constant 0 : index
    %c0_76 = arith.constant 0 : index
    %269 = vector.load %arg11[%268, %c0_75, %c0_76] : memref<8x2x32xf32, #tpu.memory_space<vmem>>, vector<1x2x32xf32>
    %270 = vector.shape_cast %269 : vector<1x2x32xf32> to vector<2x32xf32>
    %271 = arith.index_cast %205 : i32 to index
    %c0_77 = arith.constant 0 : index
    %c0_78 = arith.constant 0 : index
    %272 = vector.load %arg11[%271, %c0_77, %c0_78] : memref<8x2x32xf32, #tpu.memory_space<vmem>>, vector<1x2x32xf32>
    %273 = vector.shape_cast %272 : vector<1x2x32xf32> to vector<2x32xf32>
    %274 = arith.mulf %270, %242 : vector<2x32xf32>
    %275 = arith.index_cast %c2_i32 : i32 to index
    %c0_79 = arith.constant 0 : index
    %c0_80 = arith.constant 0 : index
    %276 = vector.load %arg12[%275, %c0_79, %c0_80] : memref<8x2x32xf32, #tpu.memory_space<vmem>>, vector<1x2x32xf32>
    %277 = vector.shape_cast %276 : vector<1x2x32xf32> to vector<2x32xf32>
    %278 = vector.shape_cast %274 : vector<2x32xf32> to vector<1x2x32xf32>
    tpu.vector_store %arg12[%275, %c0_79, %c0_80], %278 {strides = array<i32>} : memref<8x2x32xf32, #tpu.memory_space<vmem>>, vector<1x2x32xf32>,
    %279 = arith.mulf %273, %267 : vector<2x32xf32>
    %280 = arith.index_cast %205 : i32 to index
    %c0_81 = arith.constant 0 : index
    %c0_82 = arith.constant 0 : index
    %281 = vector.load %arg13[%280, %c0_81, %c0_82] : memref<8x2x32xf32, #tpu.memory_space<vmem>>, vector<1x2x32xf32>
    %282 = vector.shape_cast %281 : vector<1x2x32xf32> to vector<2x32xf32>
    %283 = vector.shape_cast %279 : vector<2x32xf32> to vector<1x2x32xf32>
    tpu.vector_store %arg13[%280, %c0_81, %c0_82], %283 {strides = array<i32>} : memref<8x2x32xf32, #tpu.memory_space<vmem>>, vector<1x2x32xf32>,
    %284 = arith.subf %242, %195 : vector<2x32xf32>
    %285 = arith.mulf %270, %284 : vector<2x32xf32>
    %286 = arith.addf %195, %285 : vector<2x32xf32>
    %287 = arith.subf %240, %198 : vector<2x32xf32>
    %288 = arith.mulf %270, %287 : vector<2x32xf32>
    %289 = arith.addf %198, %288 : vector<2x32xf32>
    %290 = arith.subf %267, %201 : vector<2x32xf32>
    %291 = arith.mulf %273, %290 : vector<2x32xf32>
    %292 = arith.addf %201, %291 : vector<2x32xf32>
    %293 = arith.subf %265, %204 : vector<2x32xf32>
    %294 = arith.mulf %273, %293 : vector<2x32xf32>
    %295 = arith.addf %204, %294 : vector<2x32xf32>
    %c3_i32 = arith.constant 3 : i32
    %c7_i32_83 = arith.constant 7 : i32
    %296 = arith.subi %c7_i32_83, %c3_i32 : i32
    %297 = arith.index_cast %c3_i32 : i32 to index
    %c0_84 = arith.constant 0 : index
    %c0_85 = arith.constant 0 : index
    %298 = vector.load %arg9[%297, %c0_84, %c0_85] : memref<8x2x128xf32, #tpu.memory_space<vmem>>, vector<1x2x128xf32>
    %299 = vector.shape_cast %298 : vector<1x2x128xf32> to vector<2x128xf32>
    %300 = arith.truncf %286 : vector<2x32xf32> to vector<2x32xbf16>
    %cst_86 = arith.constant dense<0.000000e+00> : vector<2x128xf32>
    %301 = tpu.matmul %300, %20, %cst_86 {dimension_numbers = #tpu.dot_dimension_numbers<[1], [0], [0], [1], [0, 0, 1, 1], [], []>} : vector<2x32xbf16>, vector<32x128xbf16>, vector<2x128xf32> -> vector<2x128xf32>
    %302 = arith.addf %299, %301 : vector<2x128xf32>
    %303 = arith.index_cast %296 : i32 to index
    %c0_87 = arith.constant 0 : index
    %c0_88 = arith.constant 0 : index
    %304 = vector.load %arg10[%303, %c0_87, %c0_88] : memref<8x2x128xf32, #tpu.memory_space<vmem>>, vector<1x2x128xf32>
    %305 = vector.shape_cast %304 : vector<1x2x128xf32> to vector<2x128xf32>
    %306 = arith.truncf %292 : vector<2x32xf32> to vector<2x32xbf16>
    %cst_89 = arith.constant dense<0.000000e+00> : vector<2x128xf32>
    %307 = tpu.matmul %306, %21, %cst_89 {dimension_numbers = #tpu.dot_dimension_numbers<[1], [0], [0], [1], [0, 0, 1, 1], [], []>} : vector<2x32xbf16>, vector<32x128xbf16>, vector<2x128xf32> -> vector<2x128xf32>
    %308 = arith.addf %305, %307 : vector<2x128xf32>
    %309 = vector.extract_strided_slice %302 {offsets = [0, 0], sizes = [2, 32], strides = [1, 1]} : vector<2x128xf32> to vector<2x32xf32>
    %310 = arith.negf %309 : vector<2x32xf32>
    %311 = math.exp %310 : vector<2x32xf32>
    %cst_90 = arith.constant 1.000000e+00 : f32
    %312 = vector.broadcast %cst_90 : f32 to vector<2x32xf32>
    %313 = arith.addf %312, %311 : vector<2x32xf32>
    %314 = arith.divf %312, %313 : vector<2x32xf32>
    %315 = vector.extract_strided_slice %302 {offsets = [0, 32], sizes = [2, 32], strides = [1, 1]} : vector<2x128xf32> to vector<2x32xf32>
    %316 = arith.negf %315 : vector<2x32xf32>
    %317 = math.exp %316 : vector<2x32xf32>
    %cst_91 = arith.constant 1.000000e+00 : f32
    %318 = vector.broadcast %cst_91 : f32 to vector<2x32xf32>
    %319 = arith.addf %318, %317 : vector<2x32xf32>
    %320 = arith.divf %318, %319 : vector<2x32xf32>
    %321 = vector.extract_strided_slice %302 {offsets = [0, 64], sizes = [2, 32], strides = [1, 1]} : vector<2x128xf32> to vector<2x32xf32>
    %322 = math.tanh %321 : vector<2x32xf32>
    %323 = vector.extract_strided_slice %302 {offsets = [0, 96], sizes = [2, 32], strides = [1, 1]} : vector<2x128xf32> to vector<2x32xf32>
    %324 = arith.negf %323 : vector<2x32xf32>
    %325 = math.exp %324 : vector<2x32xf32>
    %cst_92 = arith.constant 1.000000e+00 : f32
    %326 = vector.broadcast %cst_92 : f32 to vector<2x32xf32>
    %327 = arith.addf %326, %325 : vector<2x32xf32>
    %328 = arith.divf %326, %327 : vector<2x32xf32>
    %329 = arith.mulf %320, %289 : vector<2x32xf32>
    %330 = arith.mulf %314, %322 : vector<2x32xf32>
    %331 = arith.addf %329, %330 : vector<2x32xf32>
    %332 = math.tanh %331 : vector<2x32xf32>
    %333 = arith.mulf %328, %332 : vector<2x32xf32>
    %334 = vector.extract_strided_slice %308 {offsets = [0, 0], sizes = [2, 32], strides = [1, 1]} : vector<2x128xf32> to vector<2x32xf32>
    %335 = arith.negf %334 : vector<2x32xf32>
    %336 = math.exp %335 : vector<2x32xf32>
    %cst_93 = arith.constant 1.000000e+00 : f32
    %337 = vector.broadcast %cst_93 : f32 to vector<2x32xf32>
    %338 = arith.addf %337, %336 : vector<2x32xf32>
    %339 = arith.divf %337, %338 : vector<2x32xf32>
    %340 = vector.extract_strided_slice %308 {offsets = [0, 32], sizes = [2, 32], strides = [1, 1]} : vector<2x128xf32> to vector<2x32xf32>
    %341 = arith.negf %340 : vector<2x32xf32>
    %342 = math.exp %341 : vector<2x32xf32>
    %cst_94 = arith.constant 1.000000e+00 : f32
    %343 = vector.broadcast %cst_94 : f32 to vector<2x32xf32>
    %344 = arith.addf %343, %342 : vector<2x32xf32>
    %345 = arith.divf %343, %344 : vector<2x32xf32>
    %346 = vector.extract_strided_slice %308 {offsets = [0, 64], sizes = [2, 32], strides = [1, 1]} : vector<2x128xf32> to vector<2x32xf32>
    %347 = math.tanh %346 : vector<2x32xf32>
    %348 = vector.extract_strided_slice %308 {offsets = [0, 96], sizes = [2, 32], strides = [1, 1]} : vector<2x128xf32> to vector<2x32xf32>
    %349 = arith.negf %348 : vector<2x32xf32>
    %350 = math.exp %349 : vector<2x32xf32>
    %cst_95 = arith.constant 1.000000e+00 : f32
    %351 = vector.broadcast %cst_95 : f32 to vector<2x32xf32>
    %352 = arith.addf %351, %350 : vector<2x32xf32>
    %353 = arith.divf %351, %352 : vector<2x32xf32>
    %354 = arith.mulf %345, %295 : vector<2x32xf32>
    %355 = arith.mulf %339, %347 : vector<2x32xf32>
    %356 = arith.addf %354, %355 : vector<2x32xf32>
    %357 = math.tanh %356 : vector<2x32xf32>
    %358 = arith.mulf %353, %357 : vector<2x32xf32>
    %359 = arith.index_cast %c3_i32 : i32 to index
    %c0_96 = arith.constant 0 : index
    %c0_97 = arith.constant 0 : index
    %360 = vector.load %arg11[%359, %c0_96, %c0_97] : memref<8x2x32xf32, #tpu.memory_space<vmem>>, vector<1x2x32xf32>
    %361 = vector.shape_cast %360 : vector<1x2x32xf32> to vector<2x32xf32>
    %362 = arith.index_cast %296 : i32 to index
    %c0_98 = arith.constant 0 : index
    %c0_99 = arith.constant 0 : index
    %363 = vector.load %arg11[%362, %c0_98, %c0_99] : memref<8x2x32xf32, #tpu.memory_space<vmem>>, vector<1x2x32xf32>
    %364 = vector.shape_cast %363 : vector<1x2x32xf32> to vector<2x32xf32>
    %365 = arith.mulf %361, %333 : vector<2x32xf32>
    %366 = arith.index_cast %c3_i32 : i32 to index
    %c0_100 = arith.constant 0 : index
    %c0_101 = arith.constant 0 : index
    %367 = vector.load %arg12[%366, %c0_100, %c0_101] : memref<8x2x32xf32, #tpu.memory_space<vmem>>, vector<1x2x32xf32>
    %368 = vector.shape_cast %367 : vector<1x2x32xf32> to vector<2x32xf32>
    %369 = vector.shape_cast %365 : vector<2x32xf32> to vector<1x2x32xf32>
    tpu.vector_store %arg12[%366, %c0_100, %c0_101], %369 {strides = array<i32>} : memref<8x2x32xf32, #tpu.memory_space<vmem>>, vector<1x2x32xf32>,
    %370 = arith.mulf %364, %358 : vector<2x32xf32>
    %371 = arith.index_cast %296 : i32 to index
    %c0_102 = arith.constant 0 : index
    %c0_103 = arith.constant 0 : index
    %372 = vector.load %arg13[%371, %c0_102, %c0_103] : memref<8x2x32xf32, #tpu.memory_space<vmem>>, vector<1x2x32xf32>
    %373 = vector.shape_cast %372 : vector<1x2x32xf32> to vector<2x32xf32>
    %374 = vector.shape_cast %370 : vector<2x32xf32> to vector<1x2x32xf32>
    tpu.vector_store %arg13[%371, %c0_102, %c0_103], %374 {strides = array<i32>} : memref<8x2x32xf32, #tpu.memory_space<vmem>>, vector<1x2x32xf32>,
    %375 = arith.subf %333, %286 : vector<2x32xf32>
    %376 = arith.mulf %361, %375 : vector<2x32xf32>
    %377 = arith.addf %286, %376 : vector<2x32xf32>
    %378 = arith.subf %331, %289 : vector<2x32xf32>
    %379 = arith.mulf %361, %378 : vector<2x32xf32>
    %380 = arith.addf %289, %379 : vector<2x32xf32>
    %381 = arith.subf %358, %292 : vector<2x32xf32>
    %382 = arith.mulf %364, %381 : vector<2x32xf32>
    %383 = arith.addf %292, %382 : vector<2x32xf32>
    %384 = arith.subf %356, %295 : vector<2x32xf32>
    %385 = arith.mulf %364, %384 : vector<2x32xf32>
    %386 = arith.addf %295, %385 : vector<2x32xf32>
    %c4_i32 = arith.constant 4 : i32
    %c7_i32_104 = arith.constant 7 : i32
    %387 = arith.subi %c7_i32_104, %c4_i32 : i32
    %388 = arith.index_cast %c4_i32 : i32 to index
    %c0_105 = arith.constant 0 : index
    %c0_106 = arith.constant 0 : index
    %389 = vector.load %arg9[%388, %c0_105, %c0_106] : memref<8x2x128xf32, #tpu.memory_space<vmem>>, vector<1x2x128xf32>
    %390 = vector.shape_cast %389 : vector<1x2x128xf32> to vector<2x128xf32>
    %391 = arith.truncf %377 : vector<2x32xf32> to vector<2x32xbf16>
    %cst_107 = arith.constant dense<0.000000e+00> : vector<2x128xf32>
    %392 = tpu.matmul %391, %20, %cst_107 {dimension_numbers = #tpu.dot_dimension_numbers<[1], [0], [0], [1], [0, 0, 1, 1], [], []>} : vector<2x32xbf16>, vector<32x128xbf16>, vector<2x128xf32> -> vector<2x128xf32>
    %393 = arith.addf %390, %392 : vector<2x128xf32>
    %394 = arith.index_cast %387 : i32 to index
    %c0_108 = arith.constant 0 : index
    %c0_109 = arith.constant 0 : index
    %395 = vector.load %arg10[%394, %c0_108, %c0_109] : memref<8x2x128xf32, #tpu.memory_space<vmem>>, vector<1x2x128xf32>
    %396 = vector.shape_cast %395 : vector<1x2x128xf32> to vector<2x128xf32>
    %397 = arith.truncf %383 : vector<2x32xf32> to vector<2x32xbf16>
    %cst_110 = arith.constant dense<0.000000e+00> : vector<2x128xf32>
    %398 = tpu.matmul %397, %21, %cst_110 {dimension_numbers = #tpu.dot_dimension_numbers<[1], [0], [0], [1], [0, 0, 1, 1], [], []>} : vector<2x32xbf16>, vector<32x128xbf16>, vector<2x128xf32> -> vector<2x128xf32>
    %399 = arith.addf %396, %398 : vector<2x128xf32>
    %400 = vector.extract_strided_slice %393 {offsets = [0, 0], sizes = [2, 32], strides = [1, 1]} : vector<2x128xf32> to vector<2x32xf32>
    %401 = arith.negf %400 : vector<2x32xf32>
    %402 = math.exp %401 : vector<2x32xf32>
    %cst_111 = arith.constant 1.000000e+00 : f32
    %403 = vector.broadcast %cst_111 : f32 to vector<2x32xf32>
    %404 = arith.addf %403, %402 : vector<2x32xf32>
    %405 = arith.divf %403, %404 : vector<2x32xf32>
    %406 = vector.extract_strided_slice %393 {offsets = [0, 32], sizes = [2, 32], strides = [1, 1]} : vector<2x128xf32> to vector<2x32xf32>
    %407 = arith.negf %406 : vector<2x32xf32>
    %408 = math.exp %407 : vector<2x32xf32>
    %cst_112 = arith.constant 1.000000e+00 : f32
    %409 = vector.broadcast %cst_112 : f32 to vector<2x32xf32>
    %410 = arith.addf %409, %408 : vector<2x32xf32>
    %411 = arith.divf %409, %410 : vector<2x32xf32>
    %412 = vector.extract_strided_slice %393 {offsets = [0, 64], sizes = [2, 32], strides = [1, 1]} : vector<2x128xf32> to vector<2x32xf32>
    %413 = math.tanh %412 : vector<2x32xf32>
    %414 = vector.extract_strided_slice %393 {offsets = [0, 96], sizes = [2, 32], strides = [1, 1]} : vector<2x128xf32> to vector<2x32xf32>
    %415 = arith.negf %414 : vector<2x32xf32>
    %416 = math.exp %415 : vector<2x32xf32>
    %cst_113 = arith.constant 1.000000e+00 : f32
    %417 = vector.broadcast %cst_113 : f32 to vector<2x32xf32>
    %418 = arith.addf %417, %416 : vector<2x32xf32>
    %419 = arith.divf %417, %418 : vector<2x32xf32>
    %420 = arith.mulf %411, %380 : vector<2x32xf32>
    %421 = arith.mulf %405, %413 : vector<2x32xf32>
    %422 = arith.addf %420, %421 : vector<2x32xf32>
    %423 = math.tanh %422 : vector<2x32xf32>
    %424 = arith.mulf %419, %423 : vector<2x32xf32>
    %425 = vector.extract_strided_slice %399 {offsets = [0, 0], sizes = [2, 32], strides = [1, 1]} : vector<2x128xf32> to vector<2x32xf32>
    %426 = arith.negf %425 : vector<2x32xf32>
    %427 = math.exp %426 : vector<2x32xf32>
    %cst_114 = arith.constant 1.000000e+00 : f32
    %428 = vector.broadcast %cst_114 : f32 to vector<2x32xf32>
    %429 = arith.addf %428, %427 : vector<2x32xf32>
    %430 = arith.divf %428, %429 : vector<2x32xf32>
    %431 = vector.extract_strided_slice %399 {offsets = [0, 32], sizes = [2, 32], strides = [1, 1]} : vector<2x128xf32> to vector<2x32xf32>
    %432 = arith.negf %431 : vector<2x32xf32>
    %433 = math.exp %432 : vector<2x32xf32>
    %cst_115 = arith.constant 1.000000e+00 : f32
    %434 = vector.broadcast %cst_115 : f32 to vector<2x32xf32>
    %435 = arith.addf %434, %433 : vector<2x32xf32>
    %436 = arith.divf %434, %435 : vector<2x32xf32>
    %437 = vector.extract_strided_slice %399 {offsets = [0, 64], sizes = [2, 32], strides = [1, 1]} : vector<2x128xf32> to vector<2x32xf32>
    %438 = math.tanh %437 : vector<2x32xf32>
    %439 = vector.extract_strided_slice %399 {offsets = [0, 96], sizes = [2, 32], strides = [1, 1]} : vector<2x128xf32> to vector<2x32xf32>
    %440 = arith.negf %439 : vector<2x32xf32>
    %441 = math.exp %440 : vector<2x32xf32>
    %cst_116 = arith.constant 1.000000e+00 : f32
    %442 = vector.broadcast %cst_116 : f32 to vector<2x32xf32>
    %443 = arith.addf %442, %441 : vector<2x32xf32>
    %444 = arith.divf %442, %443 : vector<2x32xf32>
    %445 = arith.mulf %436, %386 : vector<2x32xf32>
    %446 = arith.mulf %430, %438 : vector<2x32xf32>
    %447 = arith.addf %445, %446 : vector<2x32xf32>
    %448 = math.tanh %447 : vector<2x32xf32>
    %449 = arith.mulf %444, %448 : vector<2x32xf32>
    %450 = arith.index_cast %c4_i32 : i32 to index
    %c0_117 = arith.constant 0 : index
    %c0_118 = arith.constant 0 : index
    %451 = vector.load %arg11[%450, %c0_117, %c0_118] : memref<8x2x32xf32, #tpu.memory_space<vmem>>, vector<1x2x32xf32>
    %452 = vector.shape_cast %451 : vector<1x2x32xf32> to vector<2x32xf32>
    %453 = arith.index_cast %387 : i32 to index
    %c0_119 = arith.constant 0 : index
    %c0_120 = arith.constant 0 : index
    %454 = vector.load %arg11[%453, %c0_119, %c0_120] : memref<8x2x32xf32, #tpu.memory_space<vmem>>, vector<1x2x32xf32>
    %455 = vector.shape_cast %454 : vector<1x2x32xf32> to vector<2x32xf32>
    %456 = arith.mulf %452, %424 : vector<2x32xf32>
    %457 = arith.index_cast %c4_i32 : i32 to index
    %c0_121 = arith.constant 0 : index
    %c0_122 = arith.constant 0 : index
    %458 = vector.load %arg12[%457, %c0_121, %c0_122] : memref<8x2x32xf32, #tpu.memory_space<vmem>>, vector<1x2x32xf32>
    %459 = vector.shape_cast %458 : vector<1x2x32xf32> to vector<2x32xf32>
    %460 = vector.shape_cast %456 : vector<2x32xf32> to vector<1x2x32xf32>
    tpu.vector_store %arg12[%457, %c0_121, %c0_122], %460 {strides = array<i32>} : memref<8x2x32xf32, #tpu.memory_space<vmem>>, vector<1x2x32xf32>,
    %461 = arith.mulf %455, %449 : vector<2x32xf32>
    %462 = arith.index_cast %387 : i32 to index
    %c0_123 = arith.constant 0 : index
    %c0_124 = arith.constant 0 : index
    %463 = vector.load %arg13[%462, %c0_123, %c0_124] : memref<8x2x32xf32, #tpu.memory_space<vmem>>, vector<1x2x32xf32>
    %464 = vector.shape_cast %463 : vector<1x2x32xf32> to vector<2x32xf32>
    %465 = vector.shape_cast %461 : vector<2x32xf32> to vector<1x2x32xf32>
    tpu.vector_store %arg13[%462, %c0_123, %c0_124], %465 {strides = array<i32>} : memref<8x2x32xf32, #tpu.memory_space<vmem>>, vector<1x2x32xf32>,
    %466 = arith.subf %424, %377 : vector<2x32xf32>
    %467 = arith.mulf %452, %466 : vector<2x32xf32>
    %468 = arith.addf %377, %467 : vector<2x32xf32>
    %469 = arith.subf %422, %380 : vector<2x32xf32>
    %470 = arith.mulf %452, %469 : vector<2x32xf32>
    %471 = arith.addf %380, %470 : vector<2x32xf32>
    %472 = arith.subf %449, %383 : vector<2x32xf32>
    %473 = arith.mulf %455, %472 : vector<2x32xf32>
    %474 = arith.addf %383, %473 : vector<2x32xf32>
    %475 = arith.subf %447, %386 : vector<2x32xf32>
    %476 = arith.mulf %455, %475 : vector<2x32xf32>
    %477 = arith.addf %386, %476 : vector<2x32xf32>
    %c5_i32 = arith.constant 5 : i32
    %c7_i32_125 = arith.constant 7 : i32
    %478 = arith.subi %c7_i32_125, %c5_i32 : i32
    %479 = arith.index_cast %c5_i32 : i32 to index
    %c0_126 = arith.constant 0 : index
    %c0_127 = arith.constant 0 : index
    %480 = vector.load %arg9[%479, %c0_126, %c0_127] : memref<8x2x128xf32, #tpu.memory_space<vmem>>, vector<1x2x128xf32>
    %481 = vector.shape_cast %480 : vector<1x2x128xf32> to vector<2x128xf32>
    %482 = arith.truncf %468 : vector<2x32xf32> to vector<2x32xbf16>
    %cst_128 = arith.constant dense<0.000000e+00> : vector<2x128xf32>
    %483 = tpu.matmul %482, %20, %cst_128 {dimension_numbers = #tpu.dot_dimension_numbers<[1], [0], [0], [1], [0, 0, 1, 1], [], []>} : vector<2x32xbf16>, vector<32x128xbf16>, vector<2x128xf32> -> vector<2x128xf32>
    %484 = arith.addf %481, %483 : vector<2x128xf32>
    %485 = arith.index_cast %478 : i32 to index
    %c0_129 = arith.constant 0 : index
    %c0_130 = arith.constant 0 : index
    %486 = vector.load %arg10[%485, %c0_129, %c0_130] : memref<8x2x128xf32, #tpu.memory_space<vmem>>, vector<1x2x128xf32>
    %487 = vector.shape_cast %486 : vector<1x2x128xf32> to vector<2x128xf32>
    %488 = arith.truncf %474 : vector<2x32xf32> to vector<2x32xbf16>
    %cst_131 = arith.constant dense<0.000000e+00> : vector<2x128xf32>
    %489 = tpu.matmul %488, %21, %cst_131 {dimension_numbers = #tpu.dot_dimension_numbers<[1], [0], [0], [1], [0, 0, 1, 1], [], []>} : vector<2x32xbf16>, vector<32x128xbf16>, vector<2x128xf32> -> vector<2x128xf32>
    %490 = arith.addf %487, %489 : vector<2x128xf32>
    %491 = vector.extract_strided_slice %484 {offsets = [0, 0], sizes = [2, 32], strides = [1, 1]} : vector<2x128xf32> to vector<2x32xf32>
    %492 = arith.negf %491 : vector<2x32xf32>
    %493 = math.exp %492 : vector<2x32xf32>
    %cst_132 = arith.constant 1.000000e+00 : f32
    %494 = vector.broadcast %cst_132 : f32 to vector<2x32xf32>
    %495 = arith.addf %494, %493 : vector<2x32xf32>
    %496 = arith.divf %494, %495 : vector<2x32xf32>
    %497 = vector.extract_strided_slice %484 {offsets = [0, 32], sizes = [2, 32], strides = [1, 1]} : vector<2x128xf32> to vector<2x32xf32>
    %498 = arith.negf %497 : vector<2x32xf32>
    %499 = math.exp %498 : vector<2x32xf32>
    %cst_133 = arith.constant 1.000000e+00 : f32
    %500 = vector.broadcast %cst_133 : f32 to vector<2x32xf32>
    %501 = arith.addf %500, %499 : vector<2x32xf32>
    %502 = arith.divf %500, %501 : vector<2x32xf32>
    %503 = vector.extract_strided_slice %484 {offsets = [0, 64], sizes = [2, 32], strides = [1, 1]} : vector<2x128xf32> to vector<2x32xf32>
    %504 = math.tanh %503 : vector<2x32xf32>
    %505 = vector.extract_strided_slice %484 {offsets = [0, 96], sizes = [2, 32], strides = [1, 1]} : vector<2x128xf32> to vector<2x32xf32>
    %506 = arith.negf %505 : vector<2x32xf32>
    %507 = math.exp %506 : vector<2x32xf32>
    %cst_134 = arith.constant 1.000000e+00 : f32
    %508 = vector.broadcast %cst_134 : f32 to vector<2x32xf32>
    %509 = arith.addf %508, %507 : vector<2x32xf32>
    %510 = arith.divf %508, %509 : vector<2x32xf32>
    %511 = arith.mulf %502, %471 : vector<2x32xf32>
    %512 = arith.mulf %496, %504 : vector<2x32xf32>
    %513 = arith.addf %511, %512 : vector<2x32xf32>
    %514 = math.tanh %513 : vector<2x32xf32>
    %515 = arith.mulf %510, %514 : vector<2x32xf32>
    %516 = vector.extract_strided_slice %490 {offsets = [0, 0], sizes = [2, 32], strides = [1, 1]} : vector<2x128xf32> to vector<2x32xf32>
    %517 = arith.negf %516 : vector<2x32xf32>
    %518 = math.exp %517 : vector<2x32xf32>
    %cst_135 = arith.constant 1.000000e+00 : f32
    %519 = vector.broadcast %cst_135 : f32 to vector<2x32xf32>
    %520 = arith.addf %519, %518 : vector<2x32xf32>
    %521 = arith.divf %519, %520 : vector<2x32xf32>
    %522 = vector.extract_strided_slice %490 {offsets = [0, 32], sizes = [2, 32], strides = [1, 1]} : vector<2x128xf32> to vector<2x32xf32>
    %523 = arith.negf %522 : vector<2x32xf32>
    %524 = math.exp %523 : vector<2x32xf32>
    %cst_136 = arith.constant 1.000000e+00 : f32
    %525 = vector.broadcast %cst_136 : f32 to vector<2x32xf32>
    %526 = arith.addf %525, %524 : vector<2x32xf32>
    %527 = arith.divf %525, %526 : vector<2x32xf32>
    %528 = vector.extract_strided_slice %490 {offsets = [0, 64], sizes = [2, 32], strides = [1, 1]} : vector<2x128xf32> to vector<2x32xf32>
    %529 = math.tanh %528 : vector<2x32xf32>
    %530 = vector.extract_strided_slice %490 {offsets = [0, 96], sizes = [2, 32], strides = [1, 1]} : vector<2x128xf32> to vector<2x32xf32>
    %531 = arith.negf %530 : vector<2x32xf32>
    %532 = math.exp %531 : vector<2x32xf32>
    %cst_137 = arith.constant 1.000000e+00 : f32
    %533 = vector.broadcast %cst_137 : f32 to vector<2x32xf32>
    %534 = arith.addf %533, %532 : vector<2x32xf32>
    %535 = arith.divf %533, %534 : vector<2x32xf32>
    %536 = arith.mulf %527, %477 : vector<2x32xf32>
    %537 = arith.mulf %521, %529 : vector<2x32xf32>
    %538 = arith.addf %536, %537 : vector<2x32xf32>
    %539 = math.tanh %538 : vector<2x32xf32>
    %540 = arith.mulf %535, %539 : vector<2x32xf32>
    %541 = arith.index_cast %c5_i32 : i32 to index
    %c0_138 = arith.constant 0 : index
    %c0_139 = arith.constant 0 : index
    %542 = vector.load %arg11[%541, %c0_138, %c0_139] : memref<8x2x32xf32, #tpu.memory_space<vmem>>, vector<1x2x32xf32>
    %543 = vector.shape_cast %542 : vector<1x2x32xf32> to vector<2x32xf32>
    %544 = arith.index_cast %478 : i32 to index
    %c0_140 = arith.constant 0 : index
    %c0_141 = arith.constant 0 : index
    %545 = vector.load %arg11[%544, %c0_140, %c0_141] : memref<8x2x32xf32, #tpu.memory_space<vmem>>, vector<1x2x32xf32>
    %546 = vector.shape_cast %545 : vector<1x2x32xf32> to vector<2x32xf32>
    %547 = arith.mulf %543, %515 : vector<2x32xf32>
    %548 = arith.index_cast %c5_i32 : i32 to index
    %c0_142 = arith.constant 0 : index
    %c0_143 = arith.constant 0 : index
    %549 = vector.load %arg12[%548, %c0_142, %c0_143] : memref<8x2x32xf32, #tpu.memory_space<vmem>>, vector<1x2x32xf32>
    %550 = vector.shape_cast %549 : vector<1x2x32xf32> to vector<2x32xf32>
    %551 = vector.shape_cast %547 : vector<2x32xf32> to vector<1x2x32xf32>
    tpu.vector_store %arg12[%548, %c0_142, %c0_143], %551 {strides = array<i32>} : memref<8x2x32xf32, #tpu.memory_space<vmem>>, vector<1x2x32xf32>,
    %552 = arith.mulf %546, %540 : vector<2x32xf32>
    %553 = arith.index_cast %478 : i32 to index
    %c0_144 = arith.constant 0 : index
    %c0_145 = arith.constant 0 : index
    %554 = vector.load %arg13[%553, %c0_144, %c0_145] : memref<8x2x32xf32, #tpu.memory_space<vmem>>, vector<1x2x32xf32>
    %555 = vector.shape_cast %554 : vector<1x2x32xf32> to vector<2x32xf32>
    %556 = vector.shape_cast %552 : vector<2x32xf32> to vector<1x2x32xf32>
    tpu.vector_store %arg13[%553, %c0_144, %c0_145], %556 {strides = array<i32>} : memref<8x2x32xf32, #tpu.memory_space<vmem>>, vector<1x2x32xf32>,
    %557 = arith.subf %515, %468 : vector<2x32xf32>
    %558 = arith.mulf %543, %557 : vector<2x32xf32>
    %559 = arith.addf %468, %558 : vector<2x32xf32>
    %560 = arith.subf %513, %471 : vector<2x32xf32>
    %561 = arith.mulf %543, %560 : vector<2x32xf32>
    %562 = arith.addf %471, %561 : vector<2x32xf32>
    %563 = arith.subf %540, %474 : vector<2x32xf32>
    %564 = arith.mulf %546, %563 : vector<2x32xf32>
    %565 = arith.addf %474, %564 : vector<2x32xf32>
    %566 = arith.subf %538, %477 : vector<2x32xf32>
    %567 = arith.mulf %546, %566 : vector<2x32xf32>
    %568 = arith.addf %477, %567 : vector<2x32xf32>
    %c6_i32 = arith.constant 6 : i32
    %c7_i32_146 = arith.constant 7 : i32
    %569 = arith.subi %c7_i32_146, %c6_i32 : i32
    %570 = arith.index_cast %c6_i32 : i32 to index
    %c0_147 = arith.constant 0 : index
    %c0_148 = arith.constant 0 : index
    %571 = vector.load %arg9[%570, %c0_147, %c0_148] : memref<8x2x128xf32, #tpu.memory_space<vmem>>, vector<1x2x128xf32>
    %572 = vector.shape_cast %571 : vector<1x2x128xf32> to vector<2x128xf32>
    %573 = arith.truncf %559 : vector<2x32xf32> to vector<2x32xbf16>
    %cst_149 = arith.constant dense<0.000000e+00> : vector<2x128xf32>
    %574 = tpu.matmul %573, %20, %cst_149 {dimension_numbers = #tpu.dot_dimension_numbers<[1], [0], [0], [1], [0, 0, 1, 1], [], []>} : vector<2x32xbf16>, vector<32x128xbf16>, vector<2x128xf32> -> vector<2x128xf32>
    %575 = arith.addf %572, %574 : vector<2x128xf32>
    %576 = arith.index_cast %569 : i32 to index
    %c0_150 = arith.constant 0 : index
    %c0_151 = arith.constant 0 : index
    %577 = vector.load %arg10[%576, %c0_150, %c0_151] : memref<8x2x128xf32, #tpu.memory_space<vmem>>, vector<1x2x128xf32>
    %578 = vector.shape_cast %577 : vector<1x2x128xf32> to vector<2x128xf32>
    %579 = arith.truncf %565 : vector<2x32xf32> to vector<2x32xbf16>
    %cst_152 = arith.constant dense<0.000000e+00> : vector<2x128xf32>
    %580 = tpu.matmul %579, %21, %cst_152 {dimension_numbers = #tpu.dot_dimension_numbers<[1], [0], [0], [1], [0, 0, 1, 1], [], []>} : vector<2x32xbf16>, vector<32x128xbf16>, vector<2x128xf32> -> vector<2x128xf32>
    %581 = arith.addf %578, %580 : vector<2x128xf32>
    %582 = vector.extract_strided_slice %575 {offsets = [0, 0], sizes = [2, 32], strides = [1, 1]} : vector<2x128xf32> to vector<2x32xf32>
    %583 = arith.negf %582 : vector<2x32xf32>
    %584 = math.exp %583 : vector<2x32xf32>
    %cst_153 = arith.constant 1.000000e+00 : f32
    %585 = vector.broadcast %cst_153 : f32 to vector<2x32xf32>
    %586 = arith.addf %585, %584 : vector<2x32xf32>
    %587 = arith.divf %585, %586 : vector<2x32xf32>
    %588 = vector.extract_strided_slice %575 {offsets = [0, 32], sizes = [2, 32], strides = [1, 1]} : vector<2x128xf32> to vector<2x32xf32>
    %589 = arith.negf %588 : vector<2x32xf32>
    %590 = math.exp %589 : vector<2x32xf32>
    %cst_154 = arith.constant 1.000000e+00 : f32
    %591 = vector.broadcast %cst_154 : f32 to vector<2x32xf32>
    %592 = arith.addf %591, %590 : vector<2x32xf32>
    %593 = arith.divf %591, %592 : vector<2x32xf32>
    %594 = vector.extract_strided_slice %575 {offsets = [0, 64], sizes = [2, 32], strides = [1, 1]} : vector<2x128xf32> to vector<2x32xf32>
    %595 = math.tanh %594 : vector<2x32xf32>
    %596 = vector.extract_strided_slice %575 {offsets = [0, 96], sizes = [2, 32], strides = [1, 1]} : vector<2x128xf32> to vector<2x32xf32>
    %597 = arith.negf %596 : vector<2x32xf32>
    %598 = math.exp %597 : vector<2x32xf32>
    %cst_155 = arith.constant 1.000000e+00 : f32
    %599 = vector.broadcast %cst_155 : f32 to vector<2x32xf32>
    %600 = arith.addf %599, %598 : vector<2x32xf32>
    %601 = arith.divf %599, %600 : vector<2x32xf32>
    %602 = arith.mulf %593, %562 : vector<2x32xf32>
    %603 = arith.mulf %587, %595 : vector<2x32xf32>
    %604 = arith.addf %602, %603 : vector<2x32xf32>
    %605 = math.tanh %604 : vector<2x32xf32>
    %606 = arith.mulf %601, %605 : vector<2x32xf32>
    %607 = vector.extract_strided_slice %581 {offsets = [0, 0], sizes = [2, 32], strides = [1, 1]} : vector<2x128xf32> to vector<2x32xf32>
    %608 = arith.negf %607 : vector<2x32xf32>
    %609 = math.exp %608 : vector<2x32xf32>
    %cst_156 = arith.constant 1.000000e+00 : f32
    %610 = vector.broadcast %cst_156 : f32 to vector<2x32xf32>
    %611 = arith.addf %610, %609 : vector<2x32xf32>
    %612 = arith.divf %610, %611 : vector<2x32xf32>
    %613 = vector.extract_strided_slice %581 {offsets = [0, 32], sizes = [2, 32], strides = [1, 1]} : vector<2x128xf32> to vector<2x32xf32>
    %614 = arith.negf %613 : vector<2x32xf32>
    %615 = math.exp %614 : vector<2x32xf32>
    %cst_157 = arith.constant 1.000000e+00 : f32
    %616 = vector.broadcast %cst_157 : f32 to vector<2x32xf32>
    %617 = arith.addf %616, %615 : vector<2x32xf32>
    %618 = arith.divf %616, %617 : vector<2x32xf32>
    %619 = vector.extract_strided_slice %581 {offsets = [0, 64], sizes = [2, 32], strides = [1, 1]} : vector<2x128xf32> to vector<2x32xf32>
    %620 = math.tanh %619 : vector<2x32xf32>
    %621 = vector.extract_strided_slice %581 {offsets = [0, 96], sizes = [2, 32], strides = [1, 1]} : vector<2x128xf32> to vector<2x32xf32>
    %622 = arith.negf %621 : vector<2x32xf32>
    %623 = math.exp %622 : vector<2x32xf32>
    %cst_158 = arith.constant 1.000000e+00 : f32
    %624 = vector.broadcast %cst_158 : f32 to vector<2x32xf32>
    %625 = arith.addf %624, %623 : vector<2x32xf32>
    %626 = arith.divf %624, %625 : vector<2x32xf32>
    %627 = arith.mulf %618, %568 : vector<2x32xf32>
    %628 = arith.mulf %612, %620 : vector<2x32xf32>
    %629 = arith.addf %627, %628 : vector<2x32xf32>
    %630 = math.tanh %629 : vector<2x32xf32>
    %631 = arith.mulf %626, %630 : vector<2x32xf32>
    %632 = arith.index_cast %c6_i32 : i32 to index
    %c0_159 = arith.constant 0 : index
    %c0_160 = arith.constant 0 : index
    %633 = vector.load %arg11[%632, %c0_159, %c0_160] : memref<8x2x32xf32, #tpu.memory_space<vmem>>, vector<1x2x32xf32>
    %634 = vector.shape_cast %633 : vector<1x2x32xf32> to vector<2x32xf32>
    %635 = arith.index_cast %569 : i32 to index
    %c0_161 = arith.constant 0 : index
    %c0_162 = arith.constant 0 : index
    %636 = vector.load %arg11[%635, %c0_161, %c0_162] : memref<8x2x32xf32, #tpu.memory_space<vmem>>, vector<1x2x32xf32>
    %637 = vector.shape_cast %636 : vector<1x2x32xf32> to vector<2x32xf32>
    %638 = arith.mulf %634, %606 : vector<2x32xf32>
    %639 = arith.index_cast %c6_i32 : i32 to index
    %c0_163 = arith.constant 0 : index
    %c0_164 = arith.constant 0 : index
    %640 = vector.load %arg12[%639, %c0_163, %c0_164] : memref<8x2x32xf32, #tpu.memory_space<vmem>>, vector<1x2x32xf32>
    %641 = vector.shape_cast %640 : vector<1x2x32xf32> to vector<2x32xf32>
    %642 = vector.shape_cast %638 : vector<2x32xf32> to vector<1x2x32xf32>
    tpu.vector_store %arg12[%639, %c0_163, %c0_164], %642 {strides = array<i32>} : memref<8x2x32xf32, #tpu.memory_space<vmem>>, vector<1x2x32xf32>,
    %643 = arith.mulf %637, %631 : vector<2x32xf32>
    %644 = arith.index_cast %569 : i32 to index
    %c0_165 = arith.constant 0 : index
    %c0_166 = arith.constant 0 : index
    %645 = vector.load %arg13[%644, %c0_165, %c0_166] : memref<8x2x32xf32, #tpu.memory_space<vmem>>, vector<1x2x32xf32>
    %646 = vector.shape_cast %645 : vector<1x2x32xf32> to vector<2x32xf32>
    %647 = vector.shape_cast %643 : vector<2x32xf32> to vector<1x2x32xf32>
    tpu.vector_store %arg13[%644, %c0_165, %c0_166], %647 {strides = array<i32>} : memref<8x2x32xf32, #tpu.memory_space<vmem>>, vector<1x2x32xf32>,
    %648 = arith.subf %606, %559 : vector<2x32xf32>
    %649 = arith.mulf %634, %648 : vector<2x32xf32>
    %650 = arith.addf %559, %649 : vector<2x32xf32>
    %651 = arith.subf %604, %562 : vector<2x32xf32>
    %652 = arith.mulf %634, %651 : vector<2x32xf32>
    %653 = arith.addf %562, %652 : vector<2x32xf32>
    %654 = arith.subf %631, %565 : vector<2x32xf32>
    %655 = arith.mulf %637, %654 : vector<2x32xf32>
    %656 = arith.addf %565, %655 : vector<2x32xf32>
    %657 = arith.subf %629, %568 : vector<2x32xf32>
    %658 = arith.mulf %637, %657 : vector<2x32xf32>
    %659 = arith.addf %568, %658 : vector<2x32xf32>
    %c7_i32_167 = arith.constant 7 : i32
    %c7_i32_168 = arith.constant 7 : i32
    %660 = arith.subi %c7_i32_168, %c7_i32_167 : i32
    %661 = arith.index_cast %c7_i32_167 : i32 to index
    %c0_169 = arith.constant 0 : index
    %c0_170 = arith.constant 0 : index
    %662 = vector.load %arg9[%661, %c0_169, %c0_170] : memref<8x2x128xf32, #tpu.memory_space<vmem>>, vector<1x2x128xf32>
    %663 = vector.shape_cast %662 : vector<1x2x128xf32> to vector<2x128xf32>
    %664 = arith.truncf %650 : vector<2x32xf32> to vector<2x32xbf16>
    %cst_171 = arith.constant dense<0.000000e+00> : vector<2x128xf32>
    %665 = tpu.matmul %664, %20, %cst_171 {dimension_numbers = #tpu.dot_dimension_numbers<[1], [0], [0], [1], [0, 0, 1, 1], [], []>} : vector<2x32xbf16>, vector<32x128xbf16>, vector<2x128xf32> -> vector<2x128xf32>
    %666 = arith.addf %663, %665 : vector<2x128xf32>
    %667 = arith.index_cast %660 : i32 to index
    %c0_172 = arith.constant 0 : index
    %c0_173 = arith.constant 0 : index
    %668 = vector.load %arg10[%667, %c0_172, %c0_173] : memref<8x2x128xf32, #tpu.memory_space<vmem>>, vector<1x2x128xf32>
    %669 = vector.shape_cast %668 : vector<1x2x128xf32> to vector<2x128xf32>
    %670 = arith.truncf %656 : vector<2x32xf32> to vector<2x32xbf16>
    %cst_174 = arith.constant dense<0.000000e+00> : vector<2x128xf32>
    %671 = tpu.matmul %670, %21, %cst_174 {dimension_numbers = #tpu.dot_dimension_numbers<[1], [0], [0], [1], [0, 0, 1, 1], [], []>} : vector<2x32xbf16>, vector<32x128xbf16>, vector<2x128xf32> -> vector<2x128xf32>
    %672 = arith.addf %669, %671 : vector<2x128xf32>
    %673 = vector.extract_strided_slice %666 {offsets = [0, 0], sizes = [2, 32], strides = [1, 1]} : vector<2x128xf32> to vector<2x32xf32>
    %674 = arith.negf %673 : vector<2x32xf32>
    %675 = math.exp %674 : vector<2x32xf32>
    %cst_175 = arith.constant 1.000000e+00 : f32
    %676 = vector.broadcast %cst_175 : f32 to vector<2x32xf32>
    %677 = arith.addf %676, %675 : vector<2x32xf32>
    %678 = arith.divf %676, %677 : vector<2x32xf32>
    %679 = vector.extract_strided_slice %666 {offsets = [0, 32], sizes = [2, 32], strides = [1, 1]} : vector<2x128xf32> to vector<2x32xf32>
    %680 = arith.negf %679 : vector<2x32xf32>
    %681 = math.exp %680 : vector<2x32xf32>
    %cst_176 = arith.constant 1.000000e+00 : f32
    %682 = vector.broadcast %cst_176 : f32 to vector<2x32xf32>
    %683 = arith.addf %682, %681 : vector<2x32xf32>
    %684 = arith.divf %682, %683 : vector<2x32xf32>
    %685 = vector.extract_strided_slice %666 {offsets = [0, 64], sizes = [2, 32], strides = [1, 1]} : vector<2x128xf32> to vector<2x32xf32>
    %686 = math.tanh %685 : vector<2x32xf32>
    %687 = vector.extract_strided_slice %666 {offsets = [0, 96], sizes = [2, 32], strides = [1, 1]} : vector<2x128xf32> to vector<2x32xf32>
    %688 = arith.negf %687 : vector<2x32xf32>
    %689 = math.exp %688 : vector<2x32xf32>
    %cst_177 = arith.constant 1.000000e+00 : f32
    %690 = vector.broadcast %cst_177 : f32 to vector<2x32xf32>
    %691 = arith.addf %690, %689 : vector<2x32xf32>
    %692 = arith.divf %690, %691 : vector<2x32xf32>
    %693 = arith.mulf %684, %653 : vector<2x32xf32>
    %694 = arith.mulf %678, %686 : vector<2x32xf32>
    %695 = arith.addf %693, %694 : vector<2x32xf32>
    %696 = math.tanh %695 : vector<2x32xf32>
    %697 = arith.mulf %692, %696 : vector<2x32xf32>
    %698 = vector.extract_strided_slice %672 {offsets = [0, 0], sizes = [2, 32], strides = [1, 1]} : vector<2x128xf32> to vector<2x32xf32>
    %699 = arith.negf %698 : vector<2x32xf32>
    %700 = math.exp %699 : vector<2x32xf32>
    %cst_178 = arith.constant 1.000000e+00 : f32
    %701 = vector.broadcast %cst_178 : f32 to vector<2x32xf32>
    %702 = arith.addf %701, %700 : vector<2x32xf32>
    %703 = arith.divf %701, %702 : vector<2x32xf32>
    %704 = vector.extract_strided_slice %672 {offsets = [0, 32], sizes = [2, 32], strides = [1, 1]} : vector<2x128xf32> to vector<2x32xf32>
    %705 = arith.negf %704 : vector<2x32xf32>
    %706 = math.exp %705 : vector<2x32xf32>
    %cst_179 = arith.constant 1.000000e+00 : f32
    %707 = vector.broadcast %cst_179 : f32 to vector<2x32xf32>
    %708 = arith.addf %707, %706 : vector<2x32xf32>
    %709 = arith.divf %707, %708 : vector<2x32xf32>
    %710 = vector.extract_strided_slice %672 {offsets = [0, 64], sizes = [2, 32], strides = [1, 1]} : vector<2x128xf32> to vector<2x32xf32>
    %711 = math.tanh %710 : vector<2x32xf32>
    %712 = vector.extract_strided_slice %672 {offsets = [0, 96], sizes = [2, 32], strides = [1, 1]} : vector<2x128xf32> to vector<2x32xf32>
    %713 = arith.negf %712 : vector<2x32xf32>
    %714 = math.exp %713 : vector<2x32xf32>
    %cst_180 = arith.constant 1.000000e+00 : f32
    %715 = vector.broadcast %cst_180 : f32 to vector<2x32xf32>
    %716 = arith.addf %715, %714 : vector<2x32xf32>
    %717 = arith.divf %715, %716 : vector<2x32xf32>
    %718 = arith.mulf %709, %659 : vector<2x32xf32>
    %719 = arith.mulf %703, %711 : vector<2x32xf32>
    %720 = arith.addf %718, %719 : vector<2x32xf32>
    %721 = math.tanh %720 : vector<2x32xf32>
    %722 = arith.mulf %717, %721 : vector<2x32xf32>
    %723 = arith.index_cast %c7_i32_167 : i32 to index
    %c0_181 = arith.constant 0 : index
    %c0_182 = arith.constant 0 : index
    %724 = vector.load %arg11[%723, %c0_181, %c0_182] : memref<8x2x32xf32, #tpu.memory_space<vmem>>, vector<1x2x32xf32>
    %725 = vector.shape_cast %724 : vector<1x2x32xf32> to vector<2x32xf32>
    %726 = arith.index_cast %660 : i32 to index
    %c0_183 = arith.constant 0 : index
    %c0_184 = arith.constant 0 : index
    %727 = vector.load %arg11[%726, %c0_183, %c0_184] : memref<8x2x32xf32, #tpu.memory_space<vmem>>, vector<1x2x32xf32>
    %728 = vector.shape_cast %727 : vector<1x2x32xf32> to vector<2x32xf32>
    %729 = arith.mulf %725, %697 : vector<2x32xf32>
    %730 = arith.index_cast %c7_i32_167 : i32 to index
    %c0_185 = arith.constant 0 : index
    %c0_186 = arith.constant 0 : index
    %731 = vector.load %arg12[%730, %c0_185, %c0_186] : memref<8x2x32xf32, #tpu.memory_space<vmem>>, vector<1x2x32xf32>
    %732 = vector.shape_cast %731 : vector<1x2x32xf32> to vector<2x32xf32>
    %733 = vector.shape_cast %729 : vector<2x32xf32> to vector<1x2x32xf32>
    tpu.vector_store %arg12[%730, %c0_185, %c0_186], %733 {strides = array<i32>} : memref<8x2x32xf32, #tpu.memory_space<vmem>>, vector<1x2x32xf32>,
    %734 = arith.mulf %728, %722 : vector<2x32xf32>
    %735 = arith.index_cast %660 : i32 to index
    %c0_187 = arith.constant 0 : index
    %c0_188 = arith.constant 0 : index
    %736 = vector.load %arg13[%735, %c0_187, %c0_188] : memref<8x2x32xf32, #tpu.memory_space<vmem>>, vector<1x2x32xf32>
    %737 = vector.shape_cast %736 : vector<1x2x32xf32> to vector<2x32xf32>
    %738 = vector.shape_cast %734 : vector<2x32xf32> to vector<1x2x32xf32>
    tpu.vector_store %arg13[%735, %c0_187, %c0_188], %738 {strides = array<i32>} : memref<8x2x32xf32, #tpu.memory_space<vmem>>, vector<1x2x32xf32>,
    %739 = arith.subf %697, %650 : vector<2x32xf32>
    %740 = arith.mulf %725, %739 : vector<2x32xf32>
    %741 = arith.addf %650, %740 : vector<2x32xf32>
    %742 = arith.subf %695, %653 : vector<2x32xf32>
    %743 = arith.mulf %725, %742 : vector<2x32xf32>
    %744 = arith.addf %653, %743 : vector<2x32xf32>
    %745 = arith.subf %722, %656 : vector<2x32xf32>
    %746 = arith.mulf %728, %745 : vector<2x32xf32>
    %747 = arith.addf %656, %746 : vector<2x32xf32>
    %748 = arith.subf %720, %659 : vector<2x32xf32>
    %749 = arith.mulf %728, %748 : vector<2x32xf32>
    %750 = arith.addf %659, %749 : vector<2x32xf32>
    %c8_i32 = arith.constant 8 : i32
    %c0_189 = arith.constant 0 : index
    %c0_190 = arith.constant 0 : index
    %c0_191 = arith.constant 0 : index
    %751 = vector.load %arg12[%c0_189, %c0_190, %c0_191] : memref<8x2x32xf32, #tpu.memory_space<vmem>>, vector<8x2x32xf32>
    %c0_192 = arith.constant 0 : index
    %c0_193 = arith.constant 0 : index
    %c0_194 = arith.constant 0 : index
    %752 = vector.load %arg13[%c0_192, %c0_193, %c0_194] : memref<8x2x32xf32, #tpu.memory_space<vmem>>, vector<8x2x32xf32>
    %753 = tpu.concatenate %751, %752 in 2 : vector<8x2x32xf32>, vector<8x2x32xf32> -> vector<8x2x64xf32>
    %c0_195 = arith.constant 0 : index
    %c0_196 = arith.constant 0 : index
    %c0_197 = arith.constant 0 : index
    %754 = vector.load %arg6[%c0_195, %c0_196, %c0_197] : memref<8x2x64xf32, #tpu.memory_space<vmem>>, vector<8x2x64xf32>
    tpu.vector_store %arg6[%c0_195, %c0_196, %c0_197], %753 {strides = array<i32>} : memref<8x2x64xf32, #tpu.memory_space<vmem>>, vector<8x2x64xf32>,
    %755 = tpu.concatenate %741, %747 in 1 : vector<2x32xf32>, vector<2x32xf32> -> vector<2x64xf32>
    %c0_198 = arith.constant 0 : index
    %c0_199 = arith.constant 0 : index
    %756 = vector.load %arg7[%c0_198, %c0_199] : memref<2x64xf32, #tpu.memory_space<vmem>>, vector<2x64xf32>
    tpu.vector_store %arg7[%c0_198, %c0_199], %755 {strides = array<i32>} : memref<2x64xf32, #tpu.memory_space<vmem>>, vector<2x64xf32>,
    %757 = tpu.concatenate %744, %750 in 1 : vector<2x32xf32>, vector<2x32xf32> -> vector<2x64xf32>
    %c0_200 = arith.constant 0 : index
    %c0_201 = arith.constant 0 : index
    %758 = vector.load %arg8[%c0_200, %c0_201] : memref<2x64xf32, #tpu.memory_space<vmem>>, vector<2x64xf32>
    tpu.vector_store %arg8[%c0_200, %c0_201], %757 {strides = array<i32>} : memref<2x64xf32, #tpu.memory_space<vmem>>, vector<2x64xf32>,
    return
  }
}

</mosaic_0001>

<bundles_post_ra>
// kernel: tpu_custom_call.1
= control target key start
LH: loop header
LB: loop body
LE: loop exit
PB: predicated region body
PF: predicated region fallthrough
CT: control target
= control target key end

     0   :  { %14 = vsyncpa [#allocation8], 0  ;;  %s3291_s0 = inlined_call_operand.vmem [shape: s32[2,1], index: 0, kind: input, shape index: {}]   ;;  %s3292_s1 = inlined_call_operand.hbm [shape: bf16[16,32], index: 1, kind: input, shape index: {}]   ;;  %s3293_s2 = inlined_call_operand.hbm [shape: bf16[32,256], index: 2, kind: input, shape index: {}]   ;;  %s3294_s3 = inlined_call_operand.hbm [shape: bf16[32,128], index: 3, kind: input, shape index: {}]   ;;  %s3295_s4 = inlined_call_operand.vmem [shape: bf16[32,128], index: 4, kind: input, shape index: {}]   ;;  %s3296_s5 = inlined_call_operand.vmem [shape: f32[1,256], index: 5, kind: input, shape index: {}]   ;;  %s3297_s6 = inlined_call_operand.hbm [shape: f32[8,2,64], index: 6, kind: output, shape index: {0}]   ;;  %s3298_s7 = inlined_call_operand.hbm [shape: f32[2,64], index: 7, kind: output, shape index: {1}]   ;;  %s3299_s8 = inlined_call_operand.hbm [shape: f32[2,64], index: 8, kind: output, shape index: {2}]  }
   0x1   :  { %15 = vsyncpa [#allocation11], 0 }
   0x2   :  { %16 = vsyncpa [#allocation9], 0 }
   0x3   :  { %17 = vsyncpa [#allocation15], 0  ;;  %s2575_s27 = smov [#allocation10]   ;;  %s2435_s9 = scalar_lea.hbm %s3293_s2, 512 }
   0x4   :  { %s37_s28 = sshll.u32 %s2575_s27, 4  ;;  %p2436_p0 = scmp.ne.s32.totalorder %s3293_s2, %s2435_s9  ;;  %s38_s28 = int_to_ptr.vmem [resolvable:$true] %s37_s28 }
   0x5   :  { %p2439_p1 = scmp.lt.u32.totalorder %s2435_s9, %s3293_s2 }
   0x7   :  { %p2441_p2 = pnand %p2439_p1, %p2436_p0 }
   0x9   :  { %2444 = shalt.err (!%p2441_p2)
}
   0xa   :  { %s2445_s14 = scalar_lea.vmem %s38_s28, 512  ;;  %p2450_p4 = scmp.lt.s32.totalorder %s38_s28, %s38_s28 }
   0xb   :  { %p2446_p3 = scmp.ne.s32.totalorder %s38_s28, %s2445_s14  ;;  %p2451_p5 = scmp.lt.s32.totalorder %s2445_s14, %s2445_s14 }
   0xd   :  { %p2452_p6 = por %p2451_p5, %p2450_p4 }
   0xf   :  { %p2453_p7 = pnand %p2452_p6, %p2446_p3 }
  0x11   :  { %2456 = shalt.err (!%p2453_p7)
}
  0x12   :  { %s2576_s15 = smov 128   ;;  %s2577_s16 = smov 8  }
  0x13   :  { %43 = dma.hbm_to_vmem [thread:$0]  %s3293_s2, 512, %s38_s28, [#allocation11], %s2576_s15, %s2576_s15, %s2577_s16  }
  0x14   :  { %s2578_s19 = smov [#allocation7]   ;;  %s2457_s23 = scalar_lea.hbm %s3292_s1, 128 }
  0x15   :  { %s25_s20 = sshll.u32 %s2578_s19, 4  ;;  %p2458_p8 = scmp.ne.s32.totalorder %s3292_s1, %s2457_s23  ;;  %s26_s20 = int_to_ptr.vmem [resolvable:$true] %s25_s20 }
  0x16   :  { %p2461_p9 = scmp.lt.u32.totalorder %s2457_s23, %s3292_s1 }
  0x18   :  { %p2463_p10 = pnand %p2461_p9, %p2458_p8 }
  0x1a   :  { %2466 = shalt.err (!%p2463_p10)
}
  0x1b   :  { %s2467_s29 = scalar_lea.vmem %s26_s20, 128  ;;  %p2472_p12 = scmp.lt.s32.totalorder %s26_s20, %s26_s20 }
  0x1c   :  { %p2468_p11 = scmp.ne.s32.totalorder %s26_s20, %s2467_s29  ;;  %p2473_p13 = scmp.lt.s32.totalorder %s2467_s29, %s2467_s29 }
  0x1e   :  { %p2474_p0 = por %p2473_p13, %p2472_p12 }
  0x20   :  { %p2475_p1 = pnand %p2474_p0, %p2468_p11 }
  0x22   :  { %2478 = shalt.err (!%p2475_p1)
}
  0x23   :  { %s2579_s2 = smov 64   ;;  %s2580_s28 = smov 4  }
  0x24   :  { %31 = dma.hbm_to_vmem [thread:$0]  %s3292_s1, 128, %s26_s20, [#allocation8], %s2579_s2, %s2579_s2, %s2580_s28  }
  0x25   :  { %s2581_s10 = smov [#allocation12]   ;;  %s2479_s14 = scalar_lea.hbm %s3294_s3, 256 }
  0x26   :  { %s49_s11 = sshll.u32 %s2581_s10, 4  ;;  %p2480_p2 = scmp.ne.s32.totalorder %s3294_s3, %s2479_s14  ;;  %s50_s11 = int_to_ptr.vmem [resolvable:$true] %s49_s11 }
  0x27   :  { %p2483_p3 = scmp.lt.u32.totalorder %s2479_s14, %s3294_s3 }
  0x29   :  { %p2485_p4 = pnand %p2483_p3, %p2480_p2 }
  0x2b   :  { %2488 = shalt.err (!%p2485_p4)
}
  0x2c   :  { %s2489_s19 = scalar_lea.vmem %s50_s11, 256  ;;  %p2494_p6 = scmp.lt.s32.totalorder %s50_s11, %s50_s11 }
  0x2d   :  { %p2490_p5 = scmp.ne.s32.totalorder %s50_s11, %s2489_s19  ;;  %p2495_p7 = scmp.lt.s32.totalorder %s2489_s19, %s2489_s19 }
  0x2f   :  { %p2496_p8 = por %p2495_p7, %p2494_p6 }
  0x31   :  { %p2497_p9 = pnand %p2496_p8, %p2490_p5 }
  0x33   :  { %2500 = shalt.err (!%p2497_p9)
}
  0x34   :  { %55 = dma.hbm_to_vmem [thread:$0]  %s3294_s3, 256, %s50_s11, [#allocation11], %s2579_s2, %s2579_s2, %s2580_s28  }
  0x35   :  { %2567 = dma.done.wait [#allocation8], 128  }
  0x36   :  { %2568 = vsyncadd [#allocation8], 4294967168 }
  0x37   :  { %2569 = dma.done.wait [#allocation11], 768  }
  0x38   :  { %2570 = vsyncadd [#allocation11], 4294966528  ;;  %v2582_v0 = vmov 0   ;;  %v2583_v1 = vmov 0.0   ;;  %vm2584_vm0 = vmmov 0   ;;  %v2680_v6 = vld [vmem:[#allocation12] sm:$0xff]   ;;  %v78_v11 = vlaneseq }
  0x39   :  { %149 = vmatprep.mubr.bf16.mxu0 %v2582_v0  ;;  %2143 = vmatprep.subr.bf16.mxu1 %v2583_v1  ;;  %v2290_v2 = vld [vmem:[#allocation10 + $0x4] ss:$8 sps:$4 sm:$0xff]   ;;  %v2292_v3 = vld [vmem:[#allocation10] ss:$8 sps:$4 sm:$0xff]   ;;  %v2293_v4 = vld [vmem:[#allocation10 + $0x14] ss:$8 sps:$4 sm:$0xff]  }
  0x3a   :  { %2147 = vmatprep.mubr.msk.bf16.mxu1 %vm2584_vm0, %v2583_v1  ;;  %2288 = vset.pattern.permute.xlu1 %v2582_v0  ;;  %v2295_v5 = vld [vmem:[#allocation10 + $0x10] ss:$8 sps:$4 sm:$0xff]   ;;  %v2683_v8 = vld [vmem:[#allocation12 + $0x8] sm:$0xff]   ;;  %vm113_vm1 = vcmask 261120   ;;  %v2698_v10 = vld [vmem:[%s3295_s4 + $0x8] sm:$0xff]   ;;  %v79_v12 = vshrl.u32 %v78_v11, 7 }
  0x3b   :  { %2289 = vset.pattern.permute.xlu0 %v2582_v0  ;;  %117 = vmatprep.subr.bf16.mxu0 %v2290_v2  ;;  %v2296_v7 = vld [vmem:[#allocation7] sm:$0xff]   ;;  %v2585_v13 = vmov 1983009808   ;;  %vm292_vm2 = vcmask 254976   ;;  %vm1973_vm11 = vcmask 517120   ;;  %s2589_s10 = smov [#allocation13]  }
  0x3c   :  { %118 = vmatpush1.bf16.msra.mxu0 %v2292_v3  ;;  %2144 = vmatpush3.bf16.msra.mxu1 %v2680_v6  ;;  %v2689_v9 = vld [vmem:[%s3295_s4] sm:$0xff]   ;;  %v164_v14 = vunpack.c.l.s4 %v2585_v13  ;;  %v80_v15 = vsub.s32 0, %v79_v12  ;;  %v84_v17 = vsub.s32 1, %v79_v12  ;;  %s1999_s11 = sshll.u32 %s2589_s10, 4  ;;  %s2590_s12 = smov [#allocation16]   ;;  %s2000_s11 = int_to_ptr.vmem [resolvable:$true] %s1999_s11 }
  0x3d   :  { %119 = vmatprep.subr.bf16.mxu0 %v2293_v4  ;;  %2145 = vmatprep.subr.bf16.mxu1 %v2583_v1  ;;  %v76_v16 = vld [vmem:[%s3296_s5] sm:$0x3]  ;;  %s2586_s5 = smov 32   ;;  %s2022_s13 = sshll.u32 %s2590_s12, 4  ;;  %s3256_s13 = int_to_ptr.vmem [resolvable:$true] %s2022_s13 }
  0x3e   :  { %v165_v18 = vunpack.c.0.s8 %v164_v14  ;;  %v81_v19 = vrot.slane %v76_v16, %v80_v15  ;;  %v85_v20 = vrot.slane %v76_v16, %v84_v17  ;;  %v264_v17 = vld [vmem:[%s3291_s0] sm:$0x3]  ;;  %s2587_s0 = smov 96  }
  0x40   :  { %120 = vmatpush1.bf16.msra.mxu0 %v2295_v5  ;;  %2146 = vmatpush3.bf16.msra.mxu1 %v2683_v8  ;;  %v168_v21 = vsub.s32 %v165_v18, %v79_v12 }
  0x41   :  { %2151 = vmatprep.subr.bf16.mxu0 %v2583_v1  ;;  %2159 = vmatprep.subr.bf16.mxu1 %v2583_v1 }
  0x43   :  { %2044 = vmatmul.mubr.msk.bf16.vlgmr.msra.gmra.mrb[0].mxu0 %vm113_vm1, %v2296_v7  ;;  %2148 = vmatmul.mubr.bf16.vlgmr.msra.gmra.mrb[0].mxu1 %v2582_v0 }
  0x44   :  { %2152 = vmatpush3.bf16.msra.mxu0 %v2689_v9  ;;  %2155 = vmatprep.mubr.msk.bf16.mxu0 %vm2584_vm0, %v2583_v1 }
  0x45   :  { %2153 = vmatprep.subr.bf16.mxu0 %v2583_v1  ;;  %2160 = vmatpush3.bf16.msra.mxu1 %v2680_v6 }
  0x46   :  { %2163 = vmatprep.mubr.msk.bf16.mxu1 %vm2584_vm0, %v2583_v1  ;;  %2161 = vmatprep.subr.bf16.mxu1 %v2583_v1 }
  0x48   :  { %2154 = vmatpush3.bf16.msra.mxu0 %v2698_v10 }
  0x49   :  { %2167 = vmatprep.subr.bf16.mxu0 %v2583_v1  ;;  %2162 = vmatpush3.bf16.msra.mxu1 %v2683_v8 }
  0x4a   :  { %2175 = vmatprep.subr.bf16.mxu1 %v2583_v1 }
  0x4b   :  { %2156 = vmatmul.mubr.bf16.vlgmr.msra.gmra.mrb[4].mxu0 %v2582_v0 }
  0x4c   :  { %2168 = vmatpush3.bf16.msra.mxu0 %v2689_v9  ;;  %2171 = vmatprep.mubr.msk.bf16.mxu0 %vm2584_vm0, %v2583_v1 }
  0x4d   :  { %2169 = vmatprep.subr.bf16.mxu0 %v2583_v1 }
  0x50   :  { %2170 = vmatpush3.bf16.msra.mxu0 %v2698_v10 }
  0x51   :  { %2183 = vmatprep.subr.bf16.mxu0 %v2583_v1 }
 0x116   :  { %v151_v22 = vpop.f32.mrb[0].mxu0  ;;  %v359_v31 = vpop.f32.mrb[0].mxu1 }
 0x117   :  { %v152_v23 = vadd.f32 %v151_v22, %v81_v19  ;;  %v153_v24 = vpop.f32.mrb[1].mxu0  ;;  %v2149_v35 = vpop.f32.mrb[1].mxu1 }
 0x118   :  { %v154_v25 = vadd.f32 %v153_v24, %v85_v20  ;;  %v155_v26 = vpop.f32.mrb[2].mxu0  ;;  %v362_v40 = vpop.f32.mrb[2].mxu1 }
 0x119   :  { %v162_v27 = vcombine.high %v152_v23, %v152_v23  ;;  %v169_v28 = vrot.slane %v152_v23, %v168_v21  ;;  %2045 = vst.sshfl [vmem:[#allocation2] sm:$0x3 pattern:$0x76325410] %v152_v23  ;;  %v156_v29 = vadd.f32 %v155_v26, %v81_v19  ;;  %v157_v30 = vpop.f32.mrb[3].mxu0  ;;  %v2150_v45 = vpop.f32.mrb[3].mxu1 }
 0x11a   :  { %v214_v32 = vcombine.high %v154_v25, %v154_v25  ;;  %v221_v33 = vrot.slane %v154_v25, %v168_v21  ;;  %2049 = vst.sshfl [vmem:[#allocation3] sm:$0x3 pattern:$0x76325410] %v154_v25  ;;  %v158_v34 = vadd.f32 %v157_v30, %v85_v20 }
 0x11b   :  { %v176_v36 = vrot.slane %v162_v27, %v168_v21  ;;  %v177_v37 = vcombine.high %v169_v28, %v169_v28  ;;  %2046 = vst.sshfl [vmem:[#allocation2 + $0x4] sm:$0x3 pattern:$0x76325410] %v162_v27  ;;  %v179_v38 = vcombine.high %v156_v29, %v156_v29  ;;  %v186_v39 = vrot.slane %v156_v29, %v168_v21 }
 0x11c   :  { %2047 = vst.sshfl [vmem:[#allocation2 + $0x8] sm:$0x3 pattern:$0x76325410] %v156_v29  ;;  %v228_v41 = vrot.slane %v214_v32, %v168_v21  ;;  %v229_v42 = vcombine.high %v221_v33, %v221_v33  ;;  %v231_v43 = vcombine.high %v158_v34, %v158_v34  ;;  %v238_v44 = vrot.slane %v158_v34, %v168_v21 }
 0x11d   :  { %2050 = vst.sshfl [vmem:[#allocation3 + $0x4] sm:$0x3 pattern:$0x76325410] %v214_v32  ;;  %v178_v46 = vcombine.high %v176_v36, %v176_v36  ;;  %205 = vst [vmem:[#allocation2 + $0x2] sm:$0x3] %v177_v37  ;;  %v193_v47 = vrot.slane %v179_v38, %v168_v21  ;;  %v194_v48 = vcombine.high %v186_v39, %v186_v39 }
 0x11e   :  { %2051 = vst.sshfl [vmem:[#allocation3 + $0x8] sm:$0x3 pattern:$0x76325410] %v158_v34  ;;  %v230_v49 = vcombine.high %v228_v41, %v228_v41  ;;  %257 = vst [vmem:[#allocation3 + $0x2] sm:$0x3] %v229_v42  ;;  %v245_v50 = vrot.slane %v231_v43, %v168_v21  ;;  %v246_v51 = vcombine.high %v238_v44, %v238_v44 }
 0x11f   :  { %2048 = vst.sshfl [vmem:[#allocation2 + $0xc] sm:$0x3 pattern:$0x76325410] %v179_v38  ;;  %v414_v52 = vpop.f32.mrb[4].mxu0  ;;  %v195_v53 = vcombine.high %v193_v47, %v193_v47 }
 0x120   :  { %2052 = vst.sshfl [vmem:[#allocation3 + $0xc] sm:$0x3 pattern:$0x76325410] %v231_v43  ;;  %207 = vst [vmem:[#allocation2 + $0x6] sm:$0x3] %v178_v46  ;;  %v247_v55 = vcombine.high %v245_v50, %v245_v50 }
 0x121   :  { %209 = vst [vmem:[#allocation2 + $0xa] sm:$0x3] %v194_v48  ;;  %v2157_v54 = vpop.f32.mrb[5].mxu0  ;;  %259 = vst [vmem:[#allocation3 + $0x6] sm:$0x3] %v230_v49 }
 0x122   :  { %261 = vst [vmem:[#allocation3 + $0xa] sm:$0x3] %v246_v51  ;;  %v417_v56 = vpop.f32.mrb[6].mxu0  ;;  %211 = vst [vmem:[#allocation2 + $0xe] sm:$0x3] %v195_v53 }
 0x123   :  { %v2158_v57 = vpop.f32.mrb[7].mxu0  ;;  %263 = vst [vmem:[#allocation3 + $0xe] sm:$0x3] %v247_v55  ;;  %v309_v58 = vld [vmem:[#allocation2] sm:$0x3] }
 0x124   :  { %v365_v61 = vadd.f32 %v359_v31, %v309_v58  ;;  %v500_v57 = vld [vmem:[#allocation2 + $0x2] sm:$0x3] }
 0x126   :  { %v2065_v2 = vmul.f32 -1.442695, %v365_v61 }
 0x127   :  { %v547_v51 = vld [vmem:[#allocation3 + $0xc] sm:$0x3] }
 0x12a   :  { %v367_v59 = vld [vmem:[#allocation3 + $0xe] sm:$0x3] }
 0x12b   :  { %v420_v60 = vadd.f32 %v414_v52, %v367_v59 }
 0x12d   :  { %2301 = vtanh.f32 %v420_v60  ;;  %v2066_v0 = vmul.f32 -1.442695, %v420_v60 }
 0x12e   :  { %2303 = vtanh.f32 %v365_v61 }
 0x12f   :  { %2305 = vpow2.f32 %v2066_v0 }
 0x130   :  { %2307 = vpow2.f32 %v2065_v2 }
 0x137   :  { %v2302_v62 = vpop.eup %2301 }
 0x138   :  { %454 = vrot.lane.b32.xlu0 %v2302_v62, %s2579_s2  ;;  %v2304_v63 = vpop.eup %2303 }
 0x139   :  { %v2306_v3 = vpop.eup %2305 }
 0x13a   :  { %v448_v4 = vadd.f32 1.0, %v2306_v3  ;;  %v2308_v5 = vpop.eup %2307 }
 0x13b   :  { %v424_v7 = vadd.f32 1.0, %v2308_v5 }
 0x13c   :  { %430 = vrot.lane.b32.xlu0 %v2304_v63, %s2579_s2  ;;  %2309 = vrcp.f32 %v448_v4 }
 0x13d   :  { %2311 = vrcp.f32 %v424_v7 }
 0x146   :  { %v2310_v11 = vpop.eup %2309 }
 0x147   :  { %v2312_v14 = vpop.eup %2311  ;;  %v452_v18 = vmul.f32 0.0, %v2310_v11 }
 0x148   :  { %v428_v21 = vmul.f32 0.0, %v2312_v14 }
 0x1aa   :  { %v455_v12 = vpop.permute.xlu0 %454 }
 0x1ab   :  { %v457_v13 = vmul.f32 %v2310_v11, %v455_v12 }
 0x1ad   :  { %459 = vrot.lane.b32.xlu1 %v457_v13, %s2586_s5 }
 0x1ae   :  { %v431_v15 = vpop.permute.xlu0 %430 }
 0x1af   :  { %v433_v16 = vmul.f32 %v2312_v14, %v431_v15 }
 0x1b1   :  { %435 = vrot.lane.b32.xlu1 %v433_v16, %s2586_s5 }
 0x1b5   :  { %266 = vperm.xlu1 %2288, %v264_v17  }
 0x21f   :  { %v460_v19 = vpop.permute.xlu1 %459 }
 0x220   :  { %v462_v20 = vadd.f32 %v460_v19, %v452_v18 }
 0x222   :  { %2313 = vtanh.f32 %v462_v20 }
 0x223   :  { %v436_v22 = vpop.permute.xlu1 %435 }
 0x224   :  { %v438_v23 = vadd.f32 %v436_v22, %v428_v21 }
 0x226   :  { %2315 = vtanh.f32 %v438_v23 }
 0x22c   :  { %v2314_v24 = vpop.eup %2313 }
 0x22d   :  { %465 = vrot.lane.b32.xlu0 %v2314_v24, %s2579_s2 }
 0x230   :  { %v2316_v25 = vpop.eup %2315 }
 0x231   :  { %441 = vrot.lane.b32.xlu0 %v2316_v25, %s2579_s2 }
 0x234   :  { %v267_v26 = vpop.permute.xlu1 %266 }
 0x235   :  { %vm268_vm3 = vcmp.gt.s32.totalorder %v267_v26, 0  ;;  %vm269_vm4 = vcmp.gt.s32.totalorder %v267_v26, 1  ;;  %vm270_vm5 = vcmp.gt.s32.totalorder %v267_v26, 2  ;;  %vm271_vm6 = vcmp.gt.s32.totalorder %v267_v26, 3 }
 0x236   :  { %vm272_vm7 = vcmp.gt.s32.totalorder %v267_v26, 4  ;;  %vm273_vm8 = vcmp.gt.s32.totalorder %v267_v26, 5  ;;  %vm274_vm9 = vcmp.gt.s32.totalorder %v267_v26, 6  ;;  %vm275_vm10 = vcmp.gt.s32.totalorder %v267_v26, 7 }
 0x237   :  { %v2053_v27 = vsel %vm268_vm3, 1.0, %v2583_v1  ;;  %v2054_v28 = vsel %vm269_vm4, 1.0, %v2583_v1  ;;  %v2055_v29 = vsel %vm270_vm5, 1.0, %v2583_v1  ;;  %v2056_v30 = vsel %vm271_vm6, 1.0, %v2583_v1 }
 0x238   :  { %v2057_v31 = vsel %vm272_vm7, 1.0, %v2583_v1  ;;  %v2058_v32 = vsel %vm273_vm8, 1.0, %v2583_v1  ;;  %v2059_v33 = vsel %vm274_vm9, 1.0, %v2583_v1  ;;  %v2060_v34 = vsel %vm275_vm10, 1.0, %v2583_v1  ;;  %293 = vst.msk [vmem:[#allocation4] sm:$0x3] %vm292_vm2, %v2053_v27 }
 0x239   :  { %294 = vst.msk [vmem:[#allocation4 + $0x2] sm:$0x3] %vm292_vm2, %v2054_v28  ;;  %295 = vst.msk [vmem:[#allocation4 + $0x4] sm:$0x3] %vm292_vm2, %v2055_v29 }
 0x23a   :  { %296 = vst.msk [vmem:[#allocation4 + $0x6] sm:$0x3] %vm292_vm2, %v2056_v30  ;;  %297 = vst.msk [vmem:[#allocation4 + $0x8] sm:$0x3] %vm292_vm2, %v2057_v31 }
 0x23b   :  { %298 = vst.msk [vmem:[#allocation4 + $0xa] sm:$0x3] %vm292_vm2, %v2058_v32  ;;  %299 = vst.msk [vmem:[#allocation4 + $0xc] sm:$0x3] %vm292_vm2, %v2059_v33 }
 0x23c   :  { %300 = vst.msk [vmem:[#allocation4 + $0xe] sm:$0x3] %vm292_vm2, %v2060_v34 }
 0x23f   :  { %v469_v44 = vld [vmem:[#allocation4] sm:$0x3] }
 0x243   :  { %v471_v39 = vld [vmem:[#allocation4 + $0xe] sm:$0x3] }
 0x29f   :  { %v466_v35 = vpop.permute.xlu0 %465 }
 0x2a0   :  { %v468_v36 = vmul.f32 %v2310_v11, %v466_v35 }
 0x2a2   :  { %479 = vrot.lane.b32.xlu1 %v468_v36, %s2586_s5 }
 0x2a3   :  { %v442_v37 = vpop.permute.xlu0 %441 }
 0x2a4   :  { %v444_v38 = vmul.f32 %v2312_v14, %v442_v37 }
 0x2a6   :  { %494 = vrot.lane.b32.xlu1 %v462_v20, %s2587_s0  ;;  %473 = vrot.lane.b32.xlu0 %v444_v38, %s2586_s5  ;;  %v652_v38 = vld [vmem:[#allocation4 + $0xc] sm:$0x3] }
 0x2aa   :  { %487 = vrot.lane.b32.xlu1 %v438_v23, %s2587_s0 }
 0x314   :  { %v480_v40 = vpop.permute.xlu1 %479 }
 0x315   :  { %v2750_v41 = vmul.f32 %v480_v40, %v471_v39 }
 0x317   :  { %484 = vst.msk [vmem:[#allocation6 + $0xe] sm:$0x3] %vm292_vm2, %v2750_v41  ;;  %v548_v42 = vpack.c.bf16 %v2750_v41, %v2750_v41 }
 0x318   :  { %v495_v43 = vpop.permute.xlu1 %494  ;;  %v474_v45 = vpop.permute.xlu0 %473 }
 0x319   :  { %v2756_v46 = vmul.f32 %v495_v43, %v471_v39  ;;  %v2758_v47 = vmul.f32 %v474_v45, %v469_v44  ;;  %2172 = vmatmul.mubr.msk.bf16.vlgmr.msra.gmra.mrb[8].mxu0 %vm113_vm1, %v548_v42  ;;  %v650_v43 = vld [vmem:[#allocation4 + $0x2] sm:$0x3] }
 0x31a   :  { %2184 = vmatpush3.bf16.msra.mxu0 %v2689_v9  ;;  %2187 = vmatprep.mubr.msk.bf16.mxu0 %vm2584_vm0, %v2583_v1 }
 0x31b   :  { %477 = vst.msk [vmem:[#allocation5] sm:$0x3] %vm292_vm2, %v2758_v47  ;;  %v501_v48 = vpack.c.bf16 %v2758_v47, %v2758_v47  ;;  %629 = vrot.lane.b32.xlu1 %v2756_v46, %s2586_s5  ;;  %2185 = vmatprep.subr.bf16.mxu0 %v2583_v1 }
 0x31c   :  { %v488_v49 = vpop.permute.xlu1 %487 }
 0x31d   :  { %v2771_v50 = vmul.f32 %v488_v49, %v469_v44  ;;  %2164 = vmatmul.mubr.msk.bf16.vlgmr.msra.gmra.mrb[4].mxu1 %vm113_vm1, %v501_v48 }
 0x31e   :  { %2186 = vmatpush3.bf16.msra.mxu0 %v2698_v10  ;;  %2176 = vmatpush3.bf16.msra.mxu1 %v2680_v6 }
 0x31f   :  { %601 = vrot.lane.b32.xlu1 %v2771_v50, %s2586_s5  ;;  %2177 = vmatprep.subr.bf16.mxu1 %v2583_v1 }
 0x320   :  { %2179 = vmatprep.mubr.msk.bf16.mxu1 %vm2584_vm0, %v2583_v1  ;;  %2199 = vmatprep.subr.bf16.mxu0 %v2583_v1 }
 0x322   :  { %2178 = vmatpush3.bf16.msra.mxu1 %v2683_v8 }
 0x323   :  { %2191 = vmatprep.subr.bf16.mxu1 %v2583_v1 }
 0x38d   :  { %v630_v18 = vpop.permute.xlu1 %629 }
 0x391   :  { %v602_v22 = vpop.permute.xlu1 %601 }
 0x3ec   :  { %v586_v52 = vpop.f32.mrb[8].mxu0 }
 0x3ed   :  { %v592_v53 = vadd.f32 %v586_v52, %v547_v51  ;;  %v2173_v54 = vpop.f32.mrb[9].mxu0 }
 0x3ee   :  { %v589_v55 = vpop.f32.mrb[10].mxu0 }
 0x3ef   :  { %2317 = vtanh.f32 %v592_v53  ;;  %v2174_v56 = vpop.f32.mrb[11].mxu0  ;;  %v2070_v2 = vmul.f32 -1.442695, %v592_v53 }
 0x3f0   :  { %v539_v58 = vpop.f32.mrb[4].mxu1 }
 0x3f1   :  { %v545_v59 = vadd.f32 %v539_v58, %v500_v57  ;;  %v2165_v60 = vpop.f32.mrb[5].mxu1 }
 0x3f2   :  { %v542_v61 = vpop.f32.mrb[6].mxu1  ;;  %v704_v60 = vld [vmem:[#allocation2 + $0x4] sm:$0x3] }
 0x3f3   :  { %2319 = vtanh.f32 %v545_v59  ;;  %v2166_v62 = vpop.f32.mrb[7].mxu1  ;;  %v2069_v3 = vmul.f32 -1.442695, %v545_v59 }
 0x3f4   :  { %2321 = vpow2.f32 %v2070_v2 }
 0x3f5   :  { %2323 = vpow2.f32 %v2069_v3 }
 0x3f9   :  { %v2318_v63 = vpop.eup %2317 }
 0x3fa   :  { %634 = vrot.lane.b32.xlu0 %v2318_v63, %s2579_s2 }
 0x3fd   :  { %v2320_v0 = vpop.eup %2319 }
 0x3fe   :  { %606 = vrot.lane.b32.xlu0 %v2320_v0, %s2579_s2  ;;  %v2322_v4 = vpop.eup %2321 }
 0x3ff   :  { %v624_v5 = vadd.f32 1.0, %v2322_v4  ;;  %v2324_v7 = vpop.eup %2323 }
 0x400   :  { %v596_v11 = vadd.f32 1.0, %v2324_v7 }
 0x401   :  { %2325 = vrcp.f32 %v624_v5 }
 0x402   :  { %2327 = vrcp.f32 %v596_v11 }
 0x40b   :  { %v2326_v12 = vpop.eup %2325 }
 0x40c   :  { %v2328_v15 = vpop.eup %2327  ;;  %v632_v19 = vmul.f32 %v2326_v12, %v630_v18 }
 0x40d   :  { %v604_v23 = vmul.f32 %v2328_v15, %v602_v22 }
 0x46c   :  { %v635_v13 = vpop.permute.xlu0 %634 }
 0x46d   :  { %v637_v14 = vmul.f32 %v2326_v12, %v635_v13 }
 0x46f   :  { %639 = vrot.lane.b32.xlu0 %v637_v14, %s2586_s5 }
 0x470   :  { %v607_v16 = vpop.permute.xlu0 %606 }
 0x471   :  { %v609_v17 = vmul.f32 %v2328_v15, %v607_v16 }
 0x473   :  { %611 = vrot.lane.b32.xlu0 %v609_v17, %s2586_s5 }
 0x477   :  { %686 = vrot.lane.b32.xlu0 %v2750_v41, %s2587_s0 }
 0x47b   :  { %668 = vrot.lane.b32.xlu0 %v2758_v47, %s2587_s0 }
 0x4e1   :  { %v640_v20 = vpop.permute.xlu0 %639 }
 0x4e2   :  { %v642_v21 = vadd.f32 %v640_v20, %v632_v19 }
 0x4e4   :  { %2329 = vtanh.f32 %v642_v21  ;;  %v696_v35 = vsub.f32 %v642_v21, %v630_v18 }
 0x4e5   :  { %v612_v24 = vpop.permute.xlu0 %611 }
 0x4e6   :  { %v614_v25 = vadd.f32 %v612_v24, %v604_v23 }
 0x4e8   :  { %2331 = vtanh.f32 %v614_v25  ;;  %v678_v37 = vsub.f32 %v614_v25, %v602_v22 }
 0x4e9   :  { %v687_v28 = vpop.permute.xlu0 %686 }
 0x4ed   :  { %v669_v34 = vpop.permute.xlu0 %668 }
 0x4ee   :  { %v2330_v26 = vpop.eup %2329 }
 0x4ef   :  { %645 = vrot.lane.b32.xlu1 %v2330_v26, %s2579_s2 }
 0x4f2   :  { %v2332_v27 = vpop.eup %2331 }
 0x4f3   :  { %617 = vrot.lane.b32.xlu1 %v2332_v27, %s2579_s2 }
 0x561   :  { %v646_v29 = vpop.permute.xlu1 %645 }
 0x562   :  { %v2794_v30 = vmul.f32 %v2326_v12, %v646_v29 }
 0x564   :  { %v689_v31 = vsub.f32 %v2794_v30, %v687_v28 }
 0x565   :  { %v618_v32 = vpop.permute.xlu1 %617 }
 0x566   :  { %v2797_v33 = vmul.f32 %v2328_v15, %v618_v32  ;;  %691 = vrot.lane.b32.xlu1 %v689_v31, %s2586_s5 }
 0x568   :  { %v671_v36 = vsub.f32 %v2797_v33, %v669_v34 }
 0x56a   :  { %698 = vrot.lane.b32.xlu1 %v696_v35, %s2587_s0  ;;  %673 = vrot.lane.b32.xlu0 %v671_v36, %s2586_s5 }
 0x56e   :  { %680 = vrot.lane.b32.xlu1 %v678_v37, %s2587_s0 }
 0x5d8   :  { %v692_v39 = vpop.permute.xlu1 %691 }
 0x5d9   :  { %v694_v40 = vmul.f32 %v692_v39, %v652_v38 }
 0x5db   :  { %v2805_v42 = vadd.f32 %v694_v40, %v2750_v41 }
 0x5dc   :  { %v674_v44 = vpop.permute.xlu0 %673  ;;  %v699_v45 = vpop.permute.xlu1 %698 }
 0x5dd   :  { %v752_v48 = vpack.c.bf16 %v2805_v42, %v2805_v42  ;;  %v676_v49 = vmul.f32 %v674_v44, %v650_v43  ;;  %v701_v51 = vmul.f32 %v699_v45, %v652_v38  ;;  %v2858_v45 = vld [vmem:[#allocation4 + $0xa] sm:$0x3] }
 0x5df   :  { %v2810_v52 = vadd.f32 %v676_v49, %v2758_v47  ;;  %v2813_v53 = vadd.f32 %v701_v51, %v2756_v46  ;;  %2188 = vmatmul.mubr.msk.bf16.vlgmr.msra.gmra.mrb[12].mxu0 %vm113_vm1, %v752_v48  ;;  %v751_v47 = vld [vmem:[#allocation3 + $0xa] sm:$0x3] }
 0x5e0   :  { %v681_v54 = vpop.permute.xlu1 %680  ;;  %2200 = vmatpush3.bf16.msra.mxu0 %v2689_v9  ;;  %2203 = vmatprep.mubr.msk.bf16.mxu0 %vm2584_vm0, %v2583_v1 }
 0x5e1   :  { %v705_v41 = vpack.c.bf16 %v2810_v52, %v2810_v52  ;;  %v683_v55 = vmul.f32 %v681_v54, %v650_v43  ;;  %833 = vrot.lane.b32.xlu1 %v2813_v53, %s2586_s5  ;;  %2201 = vmatprep.subr.bf16.mxu0 %v2583_v1  ;;  %v2864_v54 = vld [vmem:[#allocation4 + $0x4] sm:$0x3] }
 0x5e3   :  { %v2825_v46 = vadd.f32 %v683_v55, %v2771_v50  ;;  %2180 = vmatmul.mubr.msk.bf16.vlgmr.msra.gmra.mrb[8].mxu1 %vm113_vm1, %v705_v41 }
 0x5e4   :  { %2202 = vmatpush3.bf16.msra.mxu0 %v2698_v10  ;;  %2192 = vmatpush3.bf16.msra.mxu1 %v2680_v6 }
 0x5e5   :  { %805 = vrot.lane.b32.xlu1 %v2825_v46, %s2586_s5  ;;  %2193 = vmatprep.subr.bf16.mxu1 %v2583_v1 }
 0x5e6   :  { %2195 = vmatprep.mubr.msk.bf16.mxu1 %vm2584_vm0, %v2583_v1  ;;  %2215 = vmatprep.subr.bf16.mxu0 %v2583_v1 }
 0x5e8   :  { %2194 = vmatpush3.bf16.msra.mxu1 %v2683_v8 }
 0x5e9   :  { %2207 = vmatprep.subr.bf16.mxu1 %v2583_v1 }
 0x653   :  { %v834_v21 = vpop.permute.xlu1 %833 }
 0x657   :  { %v806_v25 = vpop.permute.xlu1 %805 }
 0x6b2   :  { %v790_v50 = vpop.f32.mrb[12].mxu0 }
 0x6b3   :  { %v796_v56 = vadd.f32 %v790_v50, %v751_v47  ;;  %v2189_v57 = vpop.f32.mrb[13].mxu0 }
 0x6b4   :  { %v793_v58 = vpop.f32.mrb[14].mxu0 }
 0x6b5   :  { %2333 = vtanh.f32 %v796_v56  ;;  %v2190_v59 = vpop.f32.mrb[15].mxu0  ;;  %v2074_v5 = vmul.f32 -1.442695, %v796_v56 }
 0x6b6   :  { %v743_v61 = vpop.f32.mrb[8].mxu1 }
 0x6b7   :  { %v749_v62 = vadd.f32 %v743_v61, %v704_v60  ;;  %v2181_v63 = vpop.f32.mrb[9].mxu1 }
 0x6b8   :  { %v746_v0 = vpop.f32.mrb[10].mxu1 }
 0x6b9   :  { %2335 = vtanh.f32 %v749_v62  ;;  %v2182_v2 = vpop.f32.mrb[11].mxu1  ;;  %v2073_v7 = vmul.f32 -1.442695, %v749_v62 }
 0x6ba   :  { %2337 = vpow2.f32 %v2074_v5  ;;  %v908_v2 = vld [vmem:[#allocation2 + $0x6] sm:$0x3] }
 0x6bb   :  { %2339 = vpow2.f32 %v2073_v7 }
 0x6bf   :  { %v2334_v3 = vpop.eup %2333 }
 0x6c0   :  { %838 = vrot.lane.b32.xlu0 %v2334_v3, %s2579_s2 }
 0x6c3   :  { %v2336_v4 = vpop.eup %2335 }
 0x6c4   :  { %810 = vrot.lane.b32.xlu0 %v2336_v4, %s2579_s2  ;;  %v2338_v11 = vpop.eup %2337 }
 0x6c5   :  { %v828_v12 = vadd.f32 1.0, %v2338_v11  ;;  %v2340_v13 = vpop.eup %2339 }
 0x6c6   :  { %v800_v14 = vadd.f32 1.0, %v2340_v13 }
 0x6c7   :  { %2341 = vrcp.f32 %v828_v12 }
 0x6c8   :  { %2343 = vrcp.f32 %v800_v14 }
 0x6d1   :  { %v2342_v15 = vpop.eup %2341 }
 0x6d2   :  { %v2344_v18 = vpop.eup %2343  ;;  %v836_v22 = vmul.f32 %v2342_v15, %v834_v21 }
 0x6d3   :  { %v808_v26 = vmul.f32 %v2344_v18, %v806_v25 }
 0x732   :  { %v839_v16 = vpop.permute.xlu0 %838 }
 0x733   :  { %v841_v17 = vmul.f32 %v2342_v15, %v839_v16 }
 0x735   :  { %843 = vrot.lane.b32.xlu0 %v841_v17, %s2586_s5 }
 0x736   :  { %v811_v19 = vpop.permute.xlu0 %810 }
 0x737   :  { %v813_v20 = vmul.f32 %v2344_v18, %v811_v19 }
 0x739   :  { %815 = vrot.lane.b32.xlu0 %v813_v20, %s2586_s5 }
 0x73d   :  { %890 = vrot.lane.b32.xlu0 %v2805_v42, %s2587_s0 }
 0x741   :  { %872 = vrot.lane.b32.xlu0 %v2810_v52, %s2587_s0 }
 0x7a7   :  { %v844_v23 = vpop.permute.xlu0 %843 }
 0x7a8   :  { %v846_v24 = vadd.f32 %v844_v23, %v836_v22 }
 0x7aa   :  { %2345 = vtanh.f32 %v846_v24  ;;  %v900_v40 = vsub.f32 %v846_v24, %v834_v21 }
 0x7ab   :  { %v816_v27 = vpop.permute.xlu0 %815 }
 0x7ac   :  { %v818_v28 = vadd.f32 %v816_v27, %v808_v26 }
 0x7ae   :  { %2347 = vtanh.f32 %v818_v28  ;;  %v882_v44 = vsub.f32 %v818_v28, %v806_v25 }
 0x7af   :  { %v891_v32 = vpop.permute.xlu0 %890 }
 0x7b3   :  { %v873_v39 = vpop.permute.xlu0 %872 }
 0x7b4   :  { %v2346_v29 = vpop.eup %2345 }
 0x7b5   :  { %849 = vrot.lane.b32.xlu1 %v2346_v29, %s2579_s2 }
 0x7b8   :  { %v2348_v31 = vpop.eup %2347 }
 0x7b9   :  { %821 = vrot.lane.b32.xlu1 %v2348_v31, %s2579_s2 }
 0x827   :  { %v850_v34 = vpop.permute.xlu1 %849 }
 0x828   :  { %v2848_v35 = vmul.f32 %v2342_v15, %v850_v34 }
 0x82a   :  { %v893_v36 = vsub.f32 %v2848_v35, %v891_v32 }
 0x82b   :  { %v822_v37 = vpop.permute.xlu1 %821 }
 0x82c   :  { %v2851_v38 = vmul.f32 %v2344_v18, %v822_v37  ;;  %895 = vrot.lane.b32.xlu1 %v893_v36, %s2586_s5 }
 0x82e   :  { %v875_v43 = vsub.f32 %v2851_v38, %v873_v39 }
 0x830   :  { %902 = vrot.lane.b32.xlu1 %v900_v40, %s2587_s0  ;;  %877 = vrot.lane.b32.xlu0 %v875_v43, %s2586_s5 }
 0x834   :  { %884 = vrot.lane.b32.xlu1 %v882_v44, %s2587_s0 }
 0x89e   :  { %v896_v48 = vpop.permute.xlu1 %895 }
 0x89f   :  { %v898_v49 = vmul.f32 %v896_v48, %v2858_v45 }
 0x8a1   :  { %v2862_v51 = vadd.f32 %v898_v49, %v2805_v42 }
 0x8a2   :  { %v878_v41 = vpop.permute.xlu0 %877  ;;  %v903_v55 = vpop.permute.xlu1 %902 }
 0x8a3   :  { %v956_v47 = vpack.c.bf16 %v2862_v51, %v2862_v51  ;;  %v880_v50 = vmul.f32 %v878_v41, %v2864_v54  ;;  %v905_v56 = vmul.f32 %v903_v55, %v2858_v45 }
 0x8a5   :  { %v2871_v57 = vadd.f32 %v880_v50, %v2810_v52  ;;  %v2874_v58 = vadd.f32 %v905_v56, %v2813_v53  ;;  %2204 = vmatmul.mubr.msk.bf16.vlgmr.msra.gmra.mrb[16].mxu0 %vm113_vm1, %v956_v47  ;;  %v955_v53 = vld [vmem:[#allocation3 + $0x8] sm:$0x3] }
 0x8a6   :  { %v885_v42 = vpop.permute.xlu1 %884  ;;  %2216 = vmatpush3.bf16.msra.mxu0 %v2689_v9  ;;  %2219 = vmatprep.mubr.msk.bf16.mxu0 %vm2584_vm0, %v2583_v1 }
 0x8a7   :  { %v909_v59 = vpack.c.bf16 %v2871_v57, %v2871_v57  ;;  %v887_v60 = vmul.f32 %v885_v42, %v2864_v54  ;;  %1037 = vrot.lane.b32.xlu1 %v2874_v58, %s2586_s5  ;;  %2217 = vmatprep.subr.bf16.mxu0 %v2583_v1  ;;  %v2920_v42 = vld [vmem:[#allocation4 + $0x8] sm:$0x3] }
 0x8a9   :  { %v2887_v52 = vadd.f32 %v887_v60, %v2825_v46  ;;  %2196 = vmatmul.mubr.msk.bf16.vlgmr.msra.gmra.mrb[12].mxu1 %vm113_vm1, %v909_v59 }
 0x8aa   :  { %2218 = vmatpush3.bf16.msra.mxu0 %v2698_v10  ;;  %2208 = vmatpush3.bf16.msra.mxu1 %v2680_v6 }
 0x8ab   :  { %1009 = vrot.lane.b32.xlu1 %v2887_v52, %s2586_s5  ;;  %2209 = vmatprep.subr.bf16.mxu1 %v2583_v1 }
 0x8ac   :  { %2211 = vmatprep.mubr.msk.bf16.mxu1 %vm2584_vm0, %v2583_v1  ;;  %2231 = vmatprep.subr.bf16.mxu0 %v2583_v1 }
 0x8ae   :  { %2210 = vmatpush3.bf16.msra.mxu1 %v2683_v8 }
 0x8af   :  { %2223 = vmatprep.subr.bf16.mxu1 %v2583_v1 }
 0x919   :  { %v1038_v26 = vpop.permute.xlu1 %1037 }
 0x91d   :  { %v1010_v31 = vpop.permute.xlu1 %1009 }
 0x978   :  { %v994_v46 = vpop.f32.mrb[16].mxu0 }
 0x979   :  { %v1000_v61 = vadd.f32 %v994_v46, %v955_v53  ;;  %v2205_v62 = vpop.f32.mrb[17].mxu0  ;;  %v2926_v46 = vld [vmem:[#allocation4 + $0x6] sm:$0x3] }
 0x97a   :  { %v997_v63 = vpop.f32.mrb[18].mxu0 }
 0x97b   :  { %2349 = vtanh.f32 %v1000_v61  ;;  %v2206_v0 = vpop.f32.mrb[19].mxu0  ;;  %v2078_v14 = vmul.f32 -1.442695, %v1000_v61 }
 0x97c   :  { %v947_v3 = vpop.f32.mrb[12].mxu1 }
 0x97d   :  { %v953_v4 = vadd.f32 %v947_v3, %v908_v2  ;;  %v2197_v5 = vpop.f32.mrb[13].mxu1 }
 0x97e   :  { %v950_v7 = vpop.f32.mrb[14].mxu1 }
 0x97f   :  { %2351 = vtanh.f32 %v953_v4  ;;  %v2198_v11 = vpop.f32.mrb[15].mxu1  ;;  %v2077_v15 = vmul.f32 -1.442695, %v953_v4 }
 0x980   :  { %2353 = vpow2.f32 %v2078_v14 }
 0x981   :  { %2355 = vpow2.f32 %v2077_v15 }
 0x985   :  { %v2350_v12 = vpop.eup %2349 }
 0x986   :  { %1042 = vrot.lane.b32.xlu0 %v2350_v12, %s2579_s2  ;;  %v1112_v12 = vld [vmem:[#allocation2 + $0x8] sm:$0x3] }
 0x989   :  { %v2352_v13 = vpop.eup %2351 }
 0x98a   :  { %1014 = vrot.lane.b32.xlu0 %v2352_v13, %s2579_s2  ;;  %v2354_v16 = vpop.eup %2353 }
 0x98b   :  { %v1032_v17 = vadd.f32 1.0, %v2354_v16  ;;  %v2356_v18 = vpop.eup %2355 }
 0x98c   :  { %v1004_v19 = vadd.f32 1.0, %v2356_v18 }
 0x98d   :  { %2357 = vrcp.f32 %v1032_v17 }
 0x98e   :  { %2359 = vrcp.f32 %v1004_v19 }
 0x997   :  { %v2358_v20 = vpop.eup %2357 }
 0x998   :  { %v2360_v23 = vpop.eup %2359  ;;  %v1040_v27 = vmul.f32 %v2358_v20, %v1038_v26 }
 0x999   :  { %v1012_v32 = vmul.f32 %v2360_v23, %v1010_v31 }
 0x9f8   :  { %v1043_v21 = vpop.permute.xlu0 %1042 }
 0x9f9   :  { %v1045_v22 = vmul.f32 %v2358_v20, %v1043_v21 }
 0x9fb   :  { %1047 = vrot.lane.b32.xlu0 %v1045_v22, %s2586_s5 }
 0x9fc   :  { %v1015_v24 = vpop.permute.xlu0 %1014 }
 0x9fd   :  { %v1017_v25 = vmul.f32 %v2360_v23, %v1015_v24 }
 0x9ff   :  { %1019 = vrot.lane.b32.xlu0 %v1017_v25, %s2586_s5 }
 0xa03   :  { %1094 = vrot.lane.b32.xlu0 %v2862_v51, %s2587_s0 }
 0xa07   :  { %1076 = vrot.lane.b32.xlu0 %v2871_v57, %s2587_s0 }
 0xa6d   :  { %v1048_v28 = vpop.permute.xlu0 %1047 }
 0xa6e   :  { %v1050_v29 = vadd.f32 %v1048_v28, %v1040_v27 }
 0xa70   :  { %2361 = vtanh.f32 %v1050_v29  ;;  %v1104_v47 = vsub.f32 %v1050_v29, %v1038_v26 }
 0xa71   :  { %v1020_v34 = vpop.permute.xlu0 %1019 }
 0xa72   :  { %v1022_v36 = vadd.f32 %v1020_v34, %v1012_v32 }
 0xa74   :  { %2363 = vtanh.f32 %v1022_v36  ;;  %v1086_v56 = vsub.f32 %v1022_v36, %v1010_v31 }
 0xa75   :  { %v1095_v40 = vpop.permute.xlu0 %1094 }
 0xa79   :  { %v1077_v55 = vpop.permute.xlu0 %1076 }
 0xa7a   :  { %v2362_v37 = vpop.eup %2361 }
 0xa7b   :  { %1053 = vrot.lane.b32.xlu1 %v2362_v37, %s2579_s2 }
 0xa7e   :  { %v2364_v39 = vpop.eup %2363 }
 0xa7f   :  { %1025 = vrot.lane.b32.xlu1 %v2364_v39, %s2579_s2 }
 0xaed   :  { %v1054_v43 = vpop.permute.xlu1 %1053 }
 0xaee   :  { %v2910_v44 = vmul.f32 %v2358_v20, %v1054_v43 }
 0xaf0   :  { %v1097_v48 = vsub.f32 %v2910_v44, %v1095_v40 }
 0xaf1   :  { %v1026_v49 = vpop.permute.xlu1 %1025 }
 0xaf2   :  { %v2913_v41 = vmul.f32 %v2360_v23, %v1026_v49  ;;  %1099 = vrot.lane.b32.xlu1 %v1097_v48, %s2586_s5 }
 0xaf4   :  { %v1079_v50 = vsub.f32 %v2913_v41, %v1077_v55 }
 0xaf6   :  { %1106 = vrot.lane.b32.xlu1 %v1104_v47, %s2587_s0  ;;  %1081 = vrot.lane.b32.xlu0 %v1079_v50, %s2586_s5 }
 0xafa   :  { %1088 = vrot.lane.b32.xlu1 %v1086_v56, %s2587_s0 }
 0xb64   :  { %v1100_v59 = vpop.permute.xlu1 %1099 }
 0xb65   :  { %v1102_v60 = vmul.f32 %v1100_v59, %v2920_v42 }
 0xb67   :  { %v2924_v53 = vadd.f32 %v1102_v60, %v2862_v51 }
 0xb68   :  { %v1082_v61 = vpop.permute.xlu0 %1081  ;;  %v1107_v62 = vpop.permute.xlu1 %1106 }
 0xb69   :  { %v1160_v63 = vpack.c.bf16 %v2924_v53, %v2924_v53  ;;  %v1084_v0 = vmul.f32 %v1082_v61, %v2926_v46  ;;  %v1109_v2 = vmul.f32 %v1107_v62, %v2920_v42 }
 0xb6b   :  { %v2933_v3 = vadd.f32 %v1084_v0, %v2871_v57  ;;  %v2936_v4 = vadd.f32 %v1109_v2, %v2874_v58  ;;  %2220 = vmatmul.mubr.msk.bf16.vlgmr.msra.gmra.mrb[20].mxu0 %vm113_vm1, %v1160_v63 }
 0xb6c   :  { %v1089_v51 = vpop.permute.xlu1 %1088  ;;  %2232 = vmatpush3.bf16.msra.mxu0 %v2689_v9  ;;  %2235 = vmatprep.mubr.msk.bf16.mxu0 %vm2584_vm0, %v2583_v1  ;;  %v1159_v9 = vld [vmem:[#allocation3 + $0x6] sm:$0x3] }
 0xb6d   :  { %v1113_v5 = vpack.c.bf16 %v2933_v3, %v2933_v3  ;;  %v1091_v7 = vmul.f32 %v1089_v51, %v2926_v46  ;;  %1241 = vrot.lane.b32.xlu1 %v2936_v4, %s2586_s5  ;;  %2233 = vmatprep.subr.bf16.mxu0 %v2583_v1  ;;  %v2982_v51 = vld [vmem:[#allocation4 + $0x6] sm:$0x3] }
 0xb6f   :  { %v2949_v57 = vadd.f32 %v1091_v7, %v2887_v52  ;;  %2212 = vmatmul.mubr.msk.bf16.vlgmr.msra.gmra.mrb[16].mxu1 %vm113_vm1, %v1113_v5 }
 0xb70   :  { %2234 = vmatpush3.bf16.msra.mxu0 %v2698_v10  ;;  %2224 = vmatpush3.bf16.msra.mxu1 %v2680_v6 }
 0xb71   :  { %1213 = vrot.lane.b32.xlu1 %v2949_v57, %s2586_s5  ;;  %2225 = vmatprep.subr.bf16.mxu1 %v2583_v1 }
 0xb72   :  { %2227 = vmatprep.mubr.msk.bf16.mxu1 %vm2584_vm0, %v2583_v1  ;;  %2247 = vmatprep.subr.bf16.mxu0 %v2583_v1 }
 0xb74   :  { %2226 = vmatpush3.bf16.msra.mxu1 %v2683_v8 }
 0xb75   :  { %2239 = vmatprep.subr.bf16.mxu1 %v2583_v1 }
 0xbdf   :  { %v1242_v32 = vpop.permute.xlu1 %1241 }
 0xbe3   :  { %v1214_v39 = vpop.permute.xlu1 %1213 }
 0xc3e   :  { %v1198_v58 = vpop.f32.mrb[20].mxu0 }
 0xc3f   :  { %v1204_v52 = vadd.f32 %v1198_v58, %v1159_v9  ;;  %v2221_v10 = vpop.f32.mrb[21].mxu0  ;;  %v2988_v58 = vld [vmem:[#allocation4 + $0x8] sm:$0x3] }
 0xc40   :  { %v1201_v11 = vpop.f32.mrb[22].mxu0 }
 0xc41   :  { %2365 = vtanh.f32 %v1204_v52  ;;  %v2222_v6 = vpop.f32.mrb[23].mxu0  ;;  %v2082_v19 = vmul.f32 -1.442695, %v1204_v52 }
 0xc42   :  { %v1151_v13 = vpop.f32.mrb[16].mxu1 }
 0xc43   :  { %v1157_v14 = vadd.f32 %v1151_v13, %v1112_v12  ;;  %v2213_v15 = vpop.f32.mrb[17].mxu1 }
 0xc44   :  { %v1154_v16 = vpop.f32.mrb[18].mxu1  ;;  %v3004_v15 = vld [vmem:[%s3295_s4] sm:$0xff]  }
 0xc45   :  { %2367 = vtanh.f32 %v1157_v14  ;;  %v2214_v17 = vpop.f32.mrb[19].mxu1  ;;  %v2081_v20 = vmul.f32 -1.442695, %v1157_v14 }
 0xc46   :  { %2369 = vpow2.f32 %v2082_v19  ;;  %v3022_v17 = vld [vmem:[%s3295_s4 + $0x8] sm:$0xff]   ;;  %s2588_s4 = smov [#allocation14]  }
 0xc47   :  { %2371 = vpow2.f32 %v2081_v20 }
 0xc4b   :  { %v2366_v18 = vpop.eup %2365 }
 0xc4c   :  { %1246 = vrot.lane.b32.xlu0 %v2366_v18, %s2579_s2  ;;  %v3025_v18 = vld [vmem:[#allocation12] sm:$0xff]  }
 0xc4f   :  { %v2368_v8 = vpop.eup %2367 }
 0xc50   :  { %1218 = vrot.lane.b32.xlu0 %v2368_v8, %s2579_s2  ;;  %v2370_v21 = vpop.eup %2369  ;;  %v1361_v8 = vld [vmem:[#allocation3 + $0x4] sm:$0x3] }
 0xc51   :  { %v1236_v22 = vadd.f32 1.0, %v2370_v21  ;;  %v2372_v23 = vpop.eup %2371 }
 0xc52   :  { %v1208_v24 = vadd.f32 1.0, %v2372_v23 }
 0xc53   :  { %2373 = vrcp.f32 %v1236_v22 }
 0xc54   :  { %2375 = vrcp.f32 %v1208_v24  ;;  %v1314_v24 = vld [vmem:[#allocation2 + $0xa] sm:$0x3] }
 0xc5d   :  { %v2374_v25 = vpop.eup %2373 }
 0xc5e   :  { %v2376_v28 = vpop.eup %2375  ;;  %v1244_v34 = vmul.f32 %v2374_v25, %v1242_v32 }
 0xc5f   :  { %v1216_v40 = vmul.f32 %v2376_v28, %v1214_v39 }
 0xcbe   :  { %v1247_v26 = vpop.permute.xlu0 %1246 }
 0xcbf   :  { %v1249_v27 = vmul.f32 %v2374_v25, %v1247_v26 }
 0xcc1   :  { %1251 = vrot.lane.b32.xlu0 %v1249_v27, %s2586_s5 }
 0xcc2   :  { %v1219_v29 = vpop.permute.xlu0 %1218 }
 0xcc3   :  { %v1221_v31 = vmul.f32 %v2376_v28, %v1219_v29 }
 0xcc5   :  { %1223 = vrot.lane.b32.xlu0 %v1221_v31, %s2586_s5 }
 0xcc9   :  { %1296 = vrot.lane.b32.xlu0 %v2924_v53, %s2587_s0 }
 0xccd   :  { %1278 = vrot.lane.b32.xlu0 %v2933_v3, %s2587_s0 }
 0xd33   :  { %v1252_v36 = vpop.permute.xlu0 %1251 }
 0xd34   :  { %v1254_v37 = vadd.f32 %v1252_v36, %v1244_v34 }
 0xd36   :  { %2377 = vtanh.f32 %v1254_v37  ;;  %v1306_v63 = vsub.f32 %v1254_v37, %v1242_v32 }
 0xd37   :  { %v1224_v43 = vpop.permute.xlu0 %1223 }
 0xd38   :  { %v1226_v48 = vadd.f32 %v1224_v43, %v1216_v40 }
 0xd3a   :  { %2379 = vtanh.f32 %v1226_v48  ;;  %v1288_v2 = vsub.f32 %v1226_v48, %v1214_v39 }
 0xd3b   :  { %v1297_v47 = vpop.permute.xlu0 %1296 }
 0xd3f   :  { %v1279_v62 = vpop.permute.xlu0 %1278 }
 0xd40   :  { %v2378_v49 = vpop.eup %2377 }
 0xd41   :  { %1257 = vrot.lane.b32.xlu1 %v2378_v49, %s2579_s2 }
 0xd44   :  { %v2380_v55 = vpop.eup %2379 }
 0xd45   :  { %1229 = vrot.lane.b32.xlu1 %v2380_v55, %s2579_s2 }
 0xdb3   :  { %v1258_v50 = vpop.permute.xlu1 %1257 }
 0xdb4   :  { %v2972_v56 = vmul.f32 %v2374_v25, %v1258_v50 }
 0xdb6   :  { %v1299_v59 = vsub.f32 %v2972_v56, %v1297_v47 }
 0xdb7   :  { %v1230_v60 = vpop.permute.xlu1 %1229 }
 0xdb8   :  { %v2975_v61 = vmul.f32 %v2376_v28, %v1230_v60  ;;  %1301 = vrot.lane.b32.xlu1 %v1299_v59, %s2586_s5 }
 0xdba   :  { %v1281_v0 = vsub.f32 %v2975_v61, %v1279_v62 }
 0xdbc   :  { %1308 = vrot.lane.b32.xlu1 %v1306_v63, %s2587_s0  ;;  %1283 = vrot.lane.b32.xlu0 %v1281_v0, %s2586_s5 }
 0xdc0   :  { %1290 = vrot.lane.b32.xlu1 %v1288_v2, %s2587_s0 }
 0xe2a   :  { %v1302_v5 = vpop.permute.xlu1 %1301 }
 0xe2b   :  { %v1304_v7 = vmul.f32 %v1302_v5, %v2982_v51 }
 0xe2d   :  { %v2986_v9 = vadd.f32 %v1304_v7, %v2924_v53 }
 0xe2e   :  { %v1284_v52 = vpop.permute.xlu0 %1283  ;;  %v1309_v10 = vpop.permute.xlu1 %1308 }
 0xe2f   :  { %v1362_v11 = vpack.c.bf16 %v2986_v9, %v2986_v9  ;;  %v1286_v6 = vmul.f32 %v1284_v52, %v2988_v58  ;;  %v1311_v12 = vmul.f32 %v1309_v10, %v2982_v51 }
 0xe31   :  { %v2995_v13 = vadd.f32 %v1286_v6, %v2933_v3  ;;  %v2998_v14 = vadd.f32 %v1311_v12, %v2936_v4  ;;  %2236 = vmatmul.mubr.msk.bf16.vlgmr.msra.gmra.mrb[24].mxu0 %vm113_vm1, %v1362_v11 }
 0xe32   :  { %v1291_v53 = vpop.permute.xlu1 %1290  ;;  %2248 = vmatpush3.bf16.msra.mxu0 %v3004_v15  ;;  %2251 = vmatprep.mubr.msk.bf16.mxu0 %vm2584_vm0, %v2583_v1 }
 0xe33   :  { %v1315_v3 = vpack.c.bf16 %v2995_v13, %v2995_v13  ;;  %v1293_v16 = vmul.f32 %v1291_v53, %v2988_v58  ;;  %1443 = vrot.lane.b32.xlu1 %v2998_v14, %s2586_s5  ;;  %2249 = vmatprep.subr.bf16.mxu0 %v2583_v1 }
 0xe35   :  { %v3016_v4 = vadd.f32 %v1293_v16, %v2949_v57  ;;  %2228 = vmatmul.mubr.msk.bf16.vlgmr.msra.gmra.mrb[20].mxu1 %vm113_vm1, %v1315_v3  ;;  %v3034_v57 = vld [vmem:[#allocation12 + $0x8] sm:$0xff]  }
 0xe36   :  { %2250 = vmatpush3.bf16.msra.mxu0 %v3022_v17  ;;  %2240 = vmatpush3.bf16.msra.mxu1 %v3025_v18 }
 0xe37   :  { %1415 = vrot.lane.b32.xlu1 %v3016_v4, %s2586_s5  ;;  %2241 = vmatprep.subr.bf16.mxu1 %v2583_v1 }
 0xe38   :  { %2243 = vmatprep.mubr.msk.bf16.mxu1 %vm2584_vm0, %v2583_v1  ;;  %2263 = vmatprep.subr.bf16.mxu0 %v2583_v1 }
 0xe3a   :  { %2242 = vmatpush3.bf16.msra.mxu1 %v3034_v57 }
 0xe3b   :  { %2255 = vmatprep.subr.bf16.mxu1 %v2583_v1 }
 0xea5   :  { %v1444_v60 = vpop.permute.xlu1 %1443 }
 0xea9   :  { %v1416_v2 = vpop.permute.xlu1 %1415 }
 0xf04   :  { %v1400_v19 = vpop.f32.mrb[24].mxu0 }
 0xf05   :  { %v1406_v20 = vadd.f32 %v1400_v19, %v1361_v8  ;;  %v2237_v21 = vpop.f32.mrb[25].mxu0 }
 0xf06   :  { %v1403_v22 = vpop.f32.mrb[26].mxu0 }
 0xf07   :  { %2381 = vtanh.f32 %v1406_v20  ;;  %v2238_v23 = vpop.f32.mrb[27].mxu0  ;;  %v2086_v34 = vmul.f32 -1.442695, %v1406_v20 }
 0xf08   :  { %v1353_v25 = vpop.f32.mrb[20].mxu1  ;;  %v3058_v23 = vld [vmem:[#allocation4 + $0x4] sm:$0x3] }
 0xf09   :  { %v1359_v26 = vadd.f32 %v1353_v25, %v1314_v24  ;;  %v2229_v27 = vpop.f32.mrb[21].mxu1 }
 0xf0a   :  { %v1356_v28 = vpop.f32.mrb[22].mxu1  ;;  %v3064_v27 = vld [vmem:[#allocation4 + $0xa] sm:$0x3] }
 0xf0b   :  { %2383 = vtanh.f32 %v1359_v26  ;;  %v2230_v29 = vpop.f32.mrb[23].mxu1  ;;  %v2085_v36 = vmul.f32 -1.442695, %v1359_v26 }
 0xf0c   :  { %2385 = vpow2.f32 %v2086_v34 }
 0xf0d   :  { %2387 = vpow2.f32 %v2085_v36 }
 0xf11   :  { %v2382_v31 = vpop.eup %2381 }
 0xf12   :  { %1448 = vrot.lane.b32.xlu0 %v2382_v31, %s2579_s2 }
 0xf15   :  { %v2384_v32 = vpop.eup %2383 }
 0xf16   :  { %1420 = vrot.lane.b32.xlu0 %v2384_v32, %s2579_s2  ;;  %v2386_v37 = vpop.eup %2385 }
 0xf17   :  { %v1438_v39 = vadd.f32 1.0, %v2386_v37  ;;  %v2388_v40 = vpop.eup %2387 }
 0xf18   :  { %v1410_v43 = vadd.f32 1.0, %v2388_v40 }
 0xf19   :  { %2389 = vrcp.f32 %v1438_v39 }
 0xf1a   :  { %2391 = vrcp.f32 %v1410_v43 }
 0xf23   :  { %v2390_v48 = vpop.eup %2389 }
 0xf24   :  { %v2392_v47 = vpop.eup %2391  ;;  %v1446_v62 = vmul.f32 %v2390_v48, %v1444_v60 }
 0xf25   :  { %v1418_v5 = vmul.f32 %v2392_v47, %v1416_v2 }
 0xf84   :  { %v1449_v49 = vpop.permute.xlu0 %1448 }
 0xf85   :  { %v1451_v55 = vmul.f32 %v2390_v48, %v1449_v49 }
 0xf87   :  { %1453 = vrot.lane.b32.xlu0 %v1451_v55, %s2586_s5 }
 0xf88   :  { %v1421_v50 = vpop.permute.xlu0 %1420 }
 0xf89   :  { %v1423_v59 = vmul.f32 %v2392_v47, %v1421_v50 }
 0xf8b   :  { %1425 = vrot.lane.b32.xlu0 %v1423_v59, %s2586_s5 }
 0xf8f   :  { %1498 = vrot.lane.b32.xlu0 %v2986_v9, %s2587_s0 }
 0xf93   :  { %1480 = vrot.lane.b32.xlu0 %v2995_v13, %s2587_s0 }
 0xff9   :  { %v1454_v63 = vpop.permute.xlu0 %1453 }
 0xffa   :  { %v1456_v0 = vadd.f32 %v1454_v63, %v1446_v62 }
 0xffc   :  { %2393 = vtanh.f32 %v1456_v0  ;;  %v1508_v20 = vsub.f32 %v1456_v0, %v1444_v60 }
 0xffd   :  { %v1426_v7 = vpop.permute.xlu0 %1425 }
 0xffe   :  { %v1428_v52 = vadd.f32 %v1426_v7, %v1418_v5 }
0x1000   :  { %2395 = vtanh.f32 %v1428_v52  ;;  %v1490_v22 = vsub.f32 %v1428_v52, %v1416_v2 }
0x1001   :  { %v1499_v6 = vpop.permute.xlu0 %1498 }
0x1005   :  { %v1481_v19 = vpop.permute.xlu0 %1480 }
0x1006   :  { %v2394_v10 = vpop.eup %2393 }
0x1007   :  { %1459 = vrot.lane.b32.xlu1 %v2394_v10, %s2579_s2 }
0x100a   :  { %v2396_v11 = vpop.eup %2395 }
0x100b   :  { %1431 = vrot.lane.b32.xlu1 %v2396_v11, %s2579_s2 }
0x1079   :  { %v1460_v12 = vpop.permute.xlu1 %1459 }
0x107a   :  { %v3048_v53 = vmul.f32 %v2390_v48, %v1460_v12 }
0x107c   :  { %v1501_v3 = vsub.f32 %v3048_v53, %v1499_v6 }
0x107d   :  { %v1432_v16 = vpop.permute.xlu1 %1431 }
0x107e   :  { %v3051_v8 = vmul.f32 %v2392_v47, %v1432_v16  ;;  %1503 = vrot.lane.b32.xlu1 %v1501_v3, %s2586_s5 }
0x1080   :  { %v1483_v21 = vsub.f32 %v3051_v8, %v1481_v19 }
0x1082   :  { %1510 = vrot.lane.b32.xlu1 %v1508_v20, %s2587_s0  ;;  %1485 = vrot.lane.b32.xlu0 %v1483_v21, %s2586_s5 }
0x1086   :  { %1492 = vrot.lane.b32.xlu1 %v1490_v22, %s2587_s0 }
0x10f0   :  { %v1504_v24 = vpop.permute.xlu1 %1503 }
0x10f1   :  { %v1506_v25 = vmul.f32 %v1504_v24, %v3058_v23 }
0x10f3   :  { %v3062_v26 = vadd.f32 %v1506_v25, %v2986_v9 }
0x10f4   :  { %v1486_v28 = vpop.permute.xlu0 %1485  ;;  %v1511_v29 = vpop.permute.xlu1 %1510 }
0x10f5   :  { %v1564_v31 = vpack.c.bf16 %v3062_v26, %v3062_v26  ;;  %v1488_v32 = vmul.f32 %v1486_v28, %v3064_v27  ;;  %v1513_v34 = vmul.f32 %v1511_v29, %v3058_v23 }
0x10f7   :  { %v3071_v36 = vadd.f32 %v1488_v32, %v2995_v13  ;;  %v3074_v37 = vadd.f32 %v1513_v34, %v2998_v14  ;;  %2252 = vmatmul.mubr.msk.bf16.vlgmr.msra.gmra.mrb[28].mxu0 %vm113_vm1, %v1564_v31  ;;  %v1563_v14 = vld [vmem:[#allocation3 + $0x2] sm:$0x3] }
0x10f8   :  { %v1493_v9 = vpop.permute.xlu1 %1492  ;;  %2264 = vmatpush3.bf16.msra.mxu0 %v3004_v15  ;;  %2267 = vmatprep.mubr.msk.bf16.mxu0 %vm2584_vm0, %v2583_v1 }
0x10f9   :  { %v1517_v39 = vpack.c.bf16 %v3071_v36, %v3071_v36  ;;  %v1495_v40 = vmul.f32 %v1493_v9, %v3064_v27  ;;  %1645 = vrot.lane.b32.xlu1 %v3074_v37, %s2586_s5  ;;  %2265 = vmatprep.subr.bf16.mxu0 %v2583_v1 }
0x10fb   :  { %v3087_v13 = vadd.f32 %v1495_v40, %v3016_v4  ;;  %2244 = vmatmul.mubr.msk.bf16.vlgmr.msra.gmra.mrb[24].mxu1 %vm113_vm1, %v1517_v39 }
0x10fc   :  { %2266 = vmatpush3.bf16.msra.mxu0 %v3022_v17  ;;  %2256 = vmatpush3.bf16.msra.mxu1 %v3025_v18  ;;  %v1516_v17 = vld [vmem:[#allocation2 + $0xc] sm:$0x3] }
0x10fd   :  { %1617 = vrot.lane.b32.xlu1 %v3087_v13, %s2586_s5  ;;  %2257 = vmatprep.subr.bf16.mxu1 %v2583_v1 }
0x10fe   :  { %2259 = vmatprep.mubr.msk.bf16.mxu1 %vm2584_vm0, %v2583_v1 }
0x1100   :  { %2258 = vmatpush3.bf16.msra.mxu1 %v3034_v57 }
0x116b   :  { %v1646_v3 = vpop.permute.xlu1 %1645 }
0x116f   :  { %v1618_v21 = vpop.permute.xlu1 %1617 }
0x11ca   :  { %v1602_v15 = vpop.f32.mrb[28].mxu0 }
0x11cb   :  { %v1608_v4 = vadd.f32 %v1602_v15, %v1563_v14  ;;  %v2253_v43 = vpop.f32.mrb[29].mxu0 }
0x11cc   :  { %v1605_v48 = vpop.f32.mrb[30].mxu0 }
0x11cd   :  { %2397 = vtanh.f32 %v1608_v4  ;;  %v2254_v49 = vpop.f32.mrb[31].mxu0  ;;  %v2090_v57 = vmul.f32 -1.442695, %v1608_v4  ;;  %v3118_v48 = vld [vmem:[#allocation4 + $0x2] sm:$0x3] }
0x11ce   :  { %v1555_v55 = vpop.f32.mrb[24].mxu1 }
0x11cf   :  { %v1561_v18 = vadd.f32 %v1555_v55, %v1516_v17  ;;  %v2245_v47 = vpop.f32.mrb[25].mxu1 }
0x11d0   :  { %v1558_v50 = vpop.f32.mrb[26].mxu1 }
0x11d1   :  { %2399 = vtanh.f32 %v1561_v18  ;;  %v2246_v59 = vpop.f32.mrb[27].mxu1  ;;  %v2089_v62 = vmul.f32 -1.442695, %v1561_v18  ;;  %v3124_v18 = vld [vmem:[#allocation4 + $0xc] sm:$0x3] }
0x11d2   :  { %2401 = vpow2.f32 %v2090_v57 }
0x11d3   :  { %2403 = vpow2.f32 %v2089_v62 }
0x11d7   :  { %v2398_v60 = vpop.eup %2397 }
0x11d8   :  { %1650 = vrot.lane.b32.xlu0 %v2398_v60, %s2579_s2 }
0x11db   :  { %v2400_v1 = vpop.eup %2399 }
0x11dc   :  { %1622 = vrot.lane.b32.xlu0 %v2400_v1, %s2579_s2  ;;  %v2402_v63 = vpop.eup %2401 }
0x11dd   :  { %v1640_v0 = vadd.f32 1.0, %v2402_v63  ;;  %v2404_v2 = vpop.eup %2403 }
0x11de   :  { %v1612_v5 = vadd.f32 1.0, %v2404_v2 }
0x11df   :  { %2405 = vrcp.f32 %v1640_v0 }
0x11e0   :  { %2407 = vrcp.f32 %v1612_v5 }
0x11e9   :  { %v2406_v7 = vpop.eup %2405 }
0x11ea   :  { %v2408_v11 = vpop.eup %2407  ;;  %v1648_v16 = vmul.f32 %v2406_v7, %v1646_v3 }
0x11eb   :  { %v1620_v22 = vmul.f32 %v2408_v11, %v1618_v21 }
0x124a   :  { %v1651_v52 = vpop.permute.xlu0 %1650 }
0x124b   :  { %v1653_v10 = vmul.f32 %v2406_v7, %v1651_v52 }
0x124d   :  { %1655 = vrot.lane.b32.xlu0 %v1653_v10, %s2586_s5 }
0x124e   :  { %v1623_v6 = vpop.permute.xlu0 %1622 }
0x124f   :  { %v1625_v12 = vmul.f32 %v2408_v11, %v1623_v6 }
0x1251   :  { %1627 = vrot.lane.b32.xlu0 %v1625_v12, %s2586_s5 }
0x1255   :  { %1700 = vrot.lane.b32.xlu0 %v3062_v26, %s2587_s0 }
0x1259   :  { %1682 = vrot.lane.b32.xlu0 %v3071_v36, %s2587_s0 }
0x12bf   :  { %v1656_v19 = vpop.permute.xlu0 %1655 }
0x12c0   :  { %v1658_v20 = vadd.f32 %v1656_v19, %v1648_v16 }
0x12c2   :  { %2409 = vtanh.f32 %v1658_v20  ;;  %v1710_v15 = vsub.f32 %v1658_v20, %v1646_v3 }
0x12c3   :  { %v1628_v24 = vpop.permute.xlu0 %1627 }
0x12c4   :  { %v1630_v25 = vadd.f32 %v1628_v24, %v1620_v22 }
0x12c6   :  { %2411 = vtanh.f32 %v1630_v25  ;;  %v1692_v43 = vsub.f32 %v1630_v25, %v1618_v21 }
0x12c7   :  { %v1701_v31 = vpop.permute.xlu0 %1700 }
0x12cb   :  { %v1683_v14 = vpop.permute.xlu0 %1682 }
0x12cc   :  { %v2410_v28 = vpop.eup %2409 }
0x12cd   :  { %1661 = vrot.lane.b32.xlu1 %v2410_v28, %s2579_s2 }
0x12d0   :  { %v2412_v29 = vpop.eup %2411 }
0x12d1   :  { %1633 = vrot.lane.b32.xlu1 %v2412_v29, %s2579_s2 }
0x133f   :  { %v1662_v32 = vpop.permute.xlu1 %1661 }
0x1340   :  { %v3108_v34 = vmul.f32 %v2406_v7, %v1662_v32 }
0x1342   :  { %v1703_v9 = vsub.f32 %v3108_v34, %v1701_v31 }
0x1343   :  { %v1634_v39 = vpop.permute.xlu1 %1633 }
0x1344   :  { %v3111_v40 = vmul.f32 %v2408_v11, %v1634_v39  ;;  %1705 = vrot.lane.b32.xlu1 %v1703_v9, %s2586_s5  ;;  %v1718_v11 = vld [vmem:[#allocation2 + $0xe] sm:$0x3] }
0x1346   :  { %v1685_v4 = vsub.f32 %v3111_v40, %v1683_v14 }
0x1348   :  { %1712 = vrot.lane.b32.xlu1 %v1710_v15, %s2587_s0  ;;  %1687 = vrot.lane.b32.xlu0 %v1685_v4, %s2586_s5 }
0x134c   :  { %1694 = vrot.lane.b32.xlu1 %v1692_v43, %s2587_s0 }
0x13b6   :  { %v1706_v49 = vpop.permute.xlu1 %1705 }
0x13b7   :  { %v1708_v17 = vmul.f32 %v1706_v49, %v3118_v48 }
0x13b9   :  { %v3122_v55 = vadd.f32 %v1708_v17, %v3062_v26 }
0x13ba   :  { %v1688_v47 = vpop.permute.xlu0 %1687  ;;  %v1713_v50 = vpop.permute.xlu1 %1712 }
0x13bb   :  { %v1765_v59 = vpack.c.bf16 %v3122_v55, %v3122_v55  ;;  %v1690_v60 = vmul.f32 %v1688_v47, %v3124_v18  ;;  %v1715_v1 = vmul.f32 %v1713_v50, %v3118_v48 }
0x13bd   :  { %v3131_v57 = vadd.f32 %v1690_v60, %v3071_v36  ;;  %v3134_v62 = vadd.f32 %v1715_v1, %v3074_v37  ;;  %2268 = vmatmul.mubr.msk.bf16.vlgmr.msra.gmra.mrb[32].mxu0 %vm113_vm1, %v1765_v59  ;;  %v1764_v36 = vld [vmem:[#allocation3] sm:$0x3] }
0x13be   :  { %v1695_v26 = vpop.permute.xlu1 %1694 }
0x13bf   :  { %v1719_v63 = vpack.c.bf16 %v3131_v57, %v3131_v57  ;;  %v1697_v0 = vmul.f32 %v1695_v26, %v3124_v18  ;;  %1846 = vrot.lane.b32.xlu1 %v3134_v62, %s2586_s5 }
0x13c1   :  { %v3143_v2 = vadd.f32 %v1697_v0, %v3087_v13  ;;  %2260 = vmatmul.mubr.msk.bf16.vlgmr.msra.gmra.mrb[28].mxu1 %vm113_vm1, %v1719_v63 }
0x13c3   :  { %1818 = vrot.lane.b32.xlu1 %v3143_v2, %s2586_s5 }
0x1431   :  { %v1847_v4 = vpop.permute.xlu1 %1846 }
0x1435   :  { %v1819_v47 = vpop.permute.xlu1 %1818 }
0x1490   :  { %v1803_v37 = vpop.f32.mrb[32].mxu0 }
0x1491   :  { %v1809_v5 = vadd.f32 %v1803_v37, %v1764_v36  ;;  %v2269_v7 = vpop.f32.mrb[33].mxu0 }
0x1492   :  { %v1806_v52 = vpop.f32.mrb[34].mxu0 }
0x1493   :  { %2413 = vtanh.f32 %v1809_v5  ;;  %v2270_v10 = vpop.f32.mrb[35].mxu0  ;;  %v2094_v21 = vmul.f32 -1.442695, %v1809_v5 }
0x1494   :  { %v1757_v6 = vpop.f32.mrb[28].mxu1 }
0x1495   :  { %v1763_v12 = vadd.f32 %v1757_v6, %v1718_v11  ;;  %v2261_v3 = vpop.f32.mrb[29].mxu1 }
0x1496   :  { %v1760_v16 = vpop.f32.mrb[30].mxu1 }
0x1497   :  { %2415 = vtanh.f32 %v1763_v12  ;;  %v2262_v13 = vpop.f32.mrb[31].mxu1  ;;  %v2093_v22 = vmul.f32 -1.442695, %v1763_v12 }
0x1498   :  { %2417 = vpow2.f32 %v2094_v21 }
0x1499   :  { %2419 = vpow2.f32 %v2093_v22 }
0x149d   :  { %v2414_v19 = vpop.eup %2413 }
0x149e   :  { %1851 = vrot.lane.b32.xlu0 %v2414_v19, %s2579_s2 }
0x14a1   :  { %v2416_v20 = vpop.eup %2415 }
0x14a2   :  { %1823 = vrot.lane.b32.xlu0 %v2416_v20, %s2579_s2  ;;  %v2418_v24 = vpop.eup %2417 }
0x14a3   :  { %v1841_v25 = vadd.f32 1.0, %v2418_v24  ;;  %v2420_v28 = vpop.eup %2419  ;;  %v1867_v24 = vld [vmem:[#allocation4] sm:$0x3] }
0x14a4   :  { %v1813_v29 = vadd.f32 1.0, %v2420_v28 }
0x14a5   :  { %2421 = vrcp.f32 %v1841_v25 }
0x14a6   :  { %2423 = vrcp.f32 %v1813_v29 }
0x14af   :  { %v2422_v31 = vpop.eup %2421 }
0x14b0   :  { %v2424_v39 = vpop.eup %2423  ;;  %v1849_v43 = vmul.f32 %v2422_v31, %v1847_v4 }
0x14b1   :  { %v1821_v50 = vmul.f32 %v2424_v39, %v1819_v47 }
0x1510   :  { %v1852_v32 = vpop.permute.xlu0 %1851 }
0x1511   :  { %v1854_v9 = vmul.f32 %v2422_v31, %v1852_v32 }
0x1513   :  { %1856 = vrot.lane.b32.xlu0 %v1854_v9, %s2586_s5 }
0x1514   :  { %v1824_v14 = vpop.permute.xlu0 %1823 }
0x1515   :  { %v1826_v15 = vmul.f32 %v2424_v39, %v1824_v14 }
0x1517   :  { %1828 = vrot.lane.b32.xlu0 %v1826_v15, %s2586_s5 }
0x151b   :  { %1900 = vrot.lane.b32.xlu0 %v3122_v55, %s2587_s0 }
0x151f   :  { %661 = vrot.lane.b32.xlu0 %v2794_v30, %s2586_s5  ;;  %v2433_v30 = vld [vmem:[#allocation4 + $0xc] sm:$0x3] }
0x1523   :  { %1069 = vrot.lane.b32.xlu0 %v2910_v44, %s2586_s5 }
0x1527   :  { %1473 = vrot.lane.b32.xlu0 %v3048_v53, %s2586_s5 }
0x1585   :  { %v1857_v49 = vpop.permute.xlu0 %1856 }
0x1586   :  { %v1859_v17 = vadd.f32 %v1857_v49, %v1849_v43 }
0x1588   :  { %2425 = vtanh.f32 %v1859_v17 }
0x1589   :  { %v1829_v59 = vpop.permute.xlu0 %1828 }
0x158a   :  { %v1831_v60 = vadd.f32 %v1829_v59, %v1821_v50 }
0x158c   :  { %2427 = vtanh.f32 %v1831_v60 }
0x158d   :  { %v1901_v1 = vpop.permute.xlu0 %1900 }
0x1591   :  { %v662_v26 = vpop.permute.xlu0 %661 }
0x1592   :  { %v2426_v63 = vpop.eup %2425  ;;  %v664_v0 = vmul.f32 %v2433_v30, %v662_v26 }
0x1593   :  { %1862 = vrot.lane.b32.xlu1 %v2426_v63, %s2579_s2 }
0x1594   :  { %666 = vst.msk [vmem:[#allocation6 + $0xc] sm:$0x3] %vm292_vm2, %v664_v0 }
0x1595   :  { %v1070_v44 = vpop.permute.xlu0 %1069 }
0x1596   :  { %v2428_v53 = vpop.eup %2427  ;;  %v1072_v36 = vmul.f32 %v1070_v44, %v2920_v42  ;;  %v1910_v42 = vsub.f32 %v1859_v17, %v1847_v4  ;;  %v1932_v4 = vld [vmem:[#allocation6 + $0xe] sm:$0x3] }
0x1597   :  { %1834 = vrot.lane.b32.xlu1 %v2428_v53, %s2579_s2  ;;  %s2012_s2 = sshll.u32 %s2588_s4, 4  ;;  %s2013_s2 = int_to_ptr.vmem [resolvable:$true] %s2012_s2 }
0x1598   :  { %1074 = vst.msk [vmem:[#allocation6 + $0x8] sm:$0x3] %vm292_vm2, %v1072_v36  ;;  %s2501_s14 = scalar_lea.vmem %s2013_s2, 32  ;;  %p2506_p11 = scmp.lt.s32.totalorder %s2013_s2, %s2013_s2 }
0x1599   :  { %v1474_v37 = vpop.permute.xlu0 %1473  ;;  %p2502_p10 = scmp.ne.s32.totalorder %s2013_s2, %s2501_s14  ;;  %p2507_p12 = scmp.lt.s32.totalorder %s2501_s14, %s2501_s14 }
0x159a   :  { %v1476_v5 = vmul.f32 %v1474_v37, %v3058_v23 }
0x159b   :  { %865 = vrot.lane.b32.xlu1 %v2848_v35, %s2586_s5  ;;  %v1931_v22 = vld [vmem:[#allocation6 + $0xc] sm:$0x3]  ;;  %p2508_p13 = por %p2507_p12, %p2506_p11 }
0x159c   :  { %1478 = vst.msk [vmem:[#allocation6 + $0x4] sm:$0x3] %vm292_vm2, %v1476_v5 }
0x159d   :  { %p2509_p0 = pnand %p2508_p13, %p2502_p10 }
0x159f   :  { %1271 = vrot.lane.b32.xlu1 %v2972_v56, %s2586_s5  ;;  %v1929_v19 = vld [vmem:[#allocation6 + $0x8] sm:$0x3] }
0x15a3   :  { %1675 = vrot.lane.b32.xlu1 %v3108_v34, %s2586_s5  ;;  %v1927_v3 = vld [vmem:[#allocation6 + $0x4] sm:$0x3] }
0x15a7   :  { %1882 = vrot.lane.b32.xlu1 %v3131_v57, %s2587_s0 }
0x15ab   :  { %1912 = vrot.lane.b32.xlu1 %v1910_v42, %s2587_s0 }
0x15af   :  { %858 = vrot.lane.b32.xlu1 %v2851_v38, %s2586_s5 }
0x15b3   :  { %1264 = vrot.lane.b32.xlu1 %v2975_v61, %s2586_s5 }
0x15b7   :  { %1668 = vrot.lane.b32.xlu1 %v3111_v40, %s2586_s5 }
0x1605   :  { %v1863_v35 = vpop.permute.xlu1 %1862 }
0x1606   :  { %v1865_v56 = vmul.f32 %v2422_v31, %v1863_v35 }
0x1608   :  { %1876 = vrot.lane.b32.xlu0 %v1865_v56, %s2586_s5  ;;  %v1903_v34 = vsub.f32 %v1865_v56, %v1901_v1 }
0x1609   :  { %v1835_v23 = vpop.permute.xlu1 %1834 }
0x160a   :  { %v1837_v11 = vmul.f32 %v2424_v39, %v1835_v23  ;;  %v2434_v39 = vld [vmem:[#allocation4 + $0x2] sm:$0x3] }
0x160c   :  { %1905 = vrot.lane.b32.xlu0 %v1903_v34, %s2586_s5 }
0x160d   :  { %v866_v7 = vpop.permute.xlu1 %865 }
0x160e   :  { %v868_v52 = vmul.f32 %v866_v7, %v2858_v45 }
0x1610   :  { %870 = vst.msk [vmem:[#allocation6 + $0xa] sm:$0x3] %vm292_vm2, %v868_v52  ;;  %654 = vrot.lane.b32.xlu0 %v2797_v33, %s2586_s5 }
0x1611   :  { %v1272_v38 = vpop.permute.xlu1 %1271 }
0x1612   :  { %v1274_v61 = vmul.f32 %v1272_v38, %v2982_v51  ;;  %v1892_v51 = vsub.f32 %v1831_v60, %v1819_v47  ;;  %v1866_v47 = vld [vmem:[#allocation4 + $0xe] sm:$0x3] }
0x1614   :  { %1276 = vst.msk [vmem:[#allocation6 + $0x6] sm:$0x3] %vm292_vm2, %v1274_v61  ;;  %1062 = vrot.lane.b32.xlu0 %v2913_v41, %s2586_s5 }
0x1615   :  { %v1676_v40 = vpop.permute.xlu1 %1675 }
0x1616   :  { %v1678_v10 = vmul.f32 %v1676_v40, %v3118_v48 }
0x1617   :  { %v1930_v20 = vld [vmem:[#allocation6 + $0xa] sm:$0x3] }
0x1618   :  { %1680 = vst.msk [vmem:[#allocation6 + $0x2] sm:$0x3] %vm292_vm2, %v1678_v10  ;;  %1466 = vrot.lane.b32.xlu0 %v3051_v8, %s2586_s5 }
0x1619   :  { %v1883_v45 = vpop.permute.xlu1 %1882 }
0x161a   :  { %v1885_v6 = vsub.f32 %v1837_v11, %v1883_v45 }
0x161b   :  { %v1928_v16 = vld [vmem:[#allocation6 + $0x6] sm:$0x3] }
0x161c   :  { %1869 = vrot.lane.b32.xlu0 %v1837_v11, %s2586_s5  ;;  %1887 = vrot.lane.b32.xlu1 %v1885_v6, %s2586_s5  ;;  %v1917_v11 = vld [vmem:[#allocation5] sm:$0x3] }
0x161d   :  { %v1913_v33 = vpop.permute.xlu1 %1912 }
0x161e   :  { %v1915_v9 = vmul.f32 %v1913_v33, %v1867_v24 }
0x161f   :  { %v1926_v12 = vld [vmem:[#allocation6 + $0x2] sm:$0x3] }
0x1620   :  { %1894 = vrot.lane.b32.xlu0 %v1892_v51, %s2587_s0  ;;  %1943 = vrot.lane.b32.xlu1 %v1926_v12, %s2586_s5  ;;  %v1916_v43 = vadd.f32 %v1915_v9, %v3134_v62 }
0x1621   :  { %v859_v41 = vpop.permute.xlu1 %858 }
0x1622   :  { %v861_v48 = vmul.f32 %v859_v41, %v2864_v54 }
0x1624   :  { %863 = vst.msk [vmem:[#allocation5 + $0x4] sm:$0x3] %vm292_vm2, %v861_v48  ;;  %1945 = vrot.lane.b32.xlu0 %v1927_v3, %s2586_s5  ;;  %1947 = vrot.lane.b32.xlu1 %v1928_v16, %s2586_s5 }
0x1625   :  { %v1265_v8 = vpop.permute.xlu1 %1264 }
0x1626   :  { %v1267_v13 = vmul.f32 %v1265_v8, %v2988_v58 }
0x1628   :  { %1269 = vst.msk [vmem:[#allocation5 + $0x8] sm:$0x3] %vm292_vm2, %v1267_v13  ;;  %1949 = vrot.lane.b32.xlu0 %v1929_v19, %s2586_s5  ;;  %1951 = vrot.lane.b32.xlu1 %v1930_v20, %s2586_s5 }
0x1629   :  { %v1669_v54 = vpop.permute.xlu1 %1668 }
0x162a   :  { %v1671_v21 = vmul.f32 %v1669_v54, %v3124_v18 }
0x162c   :  { %1673 = vst.msk [vmem:[#allocation5 + $0xc] sm:$0x3] %vm292_vm2, %v1671_v21  ;;  %1953 = vrot.lane.b32.xlu0 %v1931_v22, %s2586_s5 }
0x162f   :  { %v1921_v42 = vld [vmem:[#allocation5 + $0x8] sm:$0x3] }
0x1633   :  { %v1923_v52 = vld [vmem:[#allocation5 + $0xc] sm:$0x3] }
0x167a   :  { %v1877_v25 = vpop.permute.xlu0 %1876 }
0x167b   :  { %v1879_v28 = vmul.f32 %v1877_v25, %v1867_v24 }
0x167d   :  { %1880 = vst.msk [vmem:[#allocation6] sm:$0x3] %vm292_vm2, %v1879_v28 }
0x167e   :  { %v1906_v58 = vpop.permute.xlu0 %1905 }
0x167f   :  { %v1908_v29 = vmul.f32 %v1906_v58, %v1867_v24 }
0x1681   :  { %v1909_v31 = vadd.f32 %v1908_v29, %v3122_v55 }
0x1682   :  { %v655_v32 = vpop.permute.xlu0 %654 }
0x1683   :  { %v657_v14 = vmul.f32 %v2434_v39, %v655_v32  ;;  %1983 = vrot.lane.b32.xlu1 %v1909_v31, %s2586_s5 }
0x1684   :  { %v1925_v18 = vld [vmem:[#allocation6] sm:$0x3] }
0x1685   :  { %659 = vst.msk [vmem:[#allocation5 + $0x2] sm:$0x3] %vm292_vm2, %v657_v14  ;;  %1941 = vrot.lane.b32.xlu0 %v1925_v18, %s2586_s5 }
0x1686   :  { %v1063_v15 = vpop.permute.xlu0 %1062 }
0x1687   :  { %v1065_v49 = vmul.f32 %v1063_v15, %v2926_v46  ;;  %1955 = vrot.lane.b32.xlu1 %v1932_v4, %s2586_s5 }
0x1689   :  { %1067 = vst.msk [vmem:[#allocation5 + $0x6] sm:$0x3] %vm292_vm2, %v1065_v49  ;;  %1989 = vrot.lane.b32.xlu0 %v1916_v43, %s2586_s5 }
0x168a   :  { %v1467_v55 = vpop.permute.xlu0 %1466 }
0x168b   :  { %v1469_v17 = vmul.f32 %v1467_v55, %v3064_v27  ;;  %v1919_v27 = vld [vmem:[#allocation5 + $0x4] sm:$0x3] }
0x168c   :  { %v1918_v62 = vld [vmem:[#allocation5 + $0x2] sm:$0x3] }
0x168d   :  { %1471 = vst.msk [vmem:[#allocation5 + $0xa] sm:$0x3] %vm292_vm2, %v1469_v17 }
0x168e   :  { %v1870_v50 = vpop.permute.xlu0 %1869  ;;  %v1888_v59 = vpop.permute.xlu1 %1887 }
0x168f   :  { %v1872_v60 = vmul.f32 %v1870_v50, %v1866_v47  ;;  %v1890_v1 = vmul.f32 %v1888_v59, %v1866_v47 }
0x1690   :  { %v1920_v44 = vld [vmem:[#allocation5 + $0x6] sm:$0x3] }
0x1691   :  { %1874 = vst.msk [vmem:[#allocation5 + $0xe] sm:$0x3] %vm292_vm2, %v1872_v60  ;;  %v1891_v61 = vadd.f32 %v1890_v1, %v3131_v57 }
0x1692   :  { %v1895_v46 = vpop.permute.xlu0 %1894  ;;  %v1944_v26 = vpop.permute.xlu1 %1943 }
0x1693   :  { %v1897_v63 = vmul.f32 %v1895_v46, %v1866_v47  ;;  %v1966_v30 = vsel %vm113_vm1, %v1918_v62, %v1944_v26 }
0x1694   :  { %1975 = vst.msk [vmem:[#allocation13 + $0x2] sm:$0x3] %vm1973_vm11, %v1966_v30  ;;  %v1922_v35 = vld [vmem:[#allocation5 + $0xa] sm:$0x3] }
0x1696   :  { %v1946_v0 = vpop.permute.xlu0 %1945  ;;  %v1948_v53 = vpop.permute.xlu1 %1947 }
0x1697   :  { %v1967_v36 = vsel %vm113_vm1, %v1919_v27, %v1946_v0  ;;  %v1968_v37 = vsel %vm113_vm1, %v1920_v44, %v1948_v53 }
0x1698   :  { %1976 = vst.msk [vmem:[#allocation13 + $0x4] sm:$0x3] %vm1973_vm11, %v1967_v36  ;;  %1977 = vst.msk [vmem:[#allocation13 + $0x6] sm:$0x3] %vm1973_vm11, %v1968_v37 }
0x169a   :  { %v1950_v5 = vpop.permute.xlu0 %1949  ;;  %v1952_v56 = vpop.permute.xlu1 %1951 }
0x169b   :  { %v1969_v23 = vsel %vm113_vm1, %v1921_v42, %v1950_v5  ;;  %v1970_v34 = vsel %vm113_vm1, %v1922_v35, %v1952_v56 }
0x169c   :  { %1978 = vst.msk [vmem:[#allocation13 + $0x8] sm:$0x3] %vm1973_vm11, %v1969_v23  ;;  %1979 = vst.msk [vmem:[#allocation13 + $0xa] sm:$0x3] %vm1973_vm11, %v1970_v34 }
0x169e   :  { %v1954_v7 = vpop.permute.xlu0 %1953 }
0x169f   :  { %v1971_v38 = vsel %vm113_vm1, %v1923_v52, %v1954_v7 }
0x16a0   :  { %1980 = vst.msk [vmem:[#allocation13 + $0xc] sm:$0x3] %vm1973_vm11, %v1971_v38 }
0x16f5   :  { %v1984_v40 = vpop.permute.xlu1 %1983 }
0x16f6   :  { %v1986_v10 = vsel %vm113_vm1, %v1891_v61, %v1984_v40 }
0x16f7   :  { %1987 = vst.msk [vmem:[#allocation14] sm:$0x3] %vm1973_vm11, %v1986_v10  ;;  %v1942_v45 = vpop.permute.xlu0 %1941 }
0x16f8   :  { %v1965_v6 = vsel %vm113_vm1, %v1917_v11, %v1942_v45 }
0x16f9   :  { %2512 = shalt.err (!%p2509_p0)
}
0x16fa   :  { %s2513_s17 = scalar_lea.hbm %s3298_s7, 32 }
0x16fb   :  { %p2514_p1 = scmp.ne.s32.totalorder %s3298_s7, %s2513_s17  ;;  %p2517_p2 = scmp.lt.u32.totalorder %s2513_s17, %s3298_s7 }
0x16fd   :  { %p2519_p3 = pnand %p2517_p2, %p2514_p1 }
0x16ff   :  { %2522 = shalt.err (!%p2519_p3)
}
0x1700   :  { %2015 = dma.vmem_to_hbm [thread:$0]  %s2013_s2, 32, %s3298_s7, [#allocation15]   ;;  %1974 = vst.msk [vmem:[#allocation13] sm:$0x3] %vm1973_vm11, %v1965_v6  ;;  %v1924_v57 = vld [vmem:[#allocation5 + $0xe] sm:$0x3]  ;;  %v1956_v33 = vpop.permute.xlu1 %1955  ;;  %v1898_v51 = vadd.f32 %v1897_v63, %v3143_v2  ;;  %v1990_v41 = vpop.permute.xlu0 %1989 }
0x1701   :  { %v1972_v12 = vsel %vm113_vm1, %v1924_v57, %v1956_v33  ;;  %s2523_s22 = scalar_lea.vmem %s2000_s11, 256  ;;  %p2528_p5 = scmp.lt.s32.totalorder %s2000_s11, %s2000_s11 }
0x1702   :  { %1981 = vst.msk [vmem:[#allocation13 + $0xe] sm:$0x3] %vm1973_vm11, %v1972_v12  ;;  %v1992_v48 = vsel %vm113_vm1, %v1898_v51, %v1990_v41  ;;  %p2524_p4 = scmp.ne.s32.totalorder %s2000_s11, %s2523_s22  ;;  %p2529_p6 = scmp.lt.s32.totalorder %s2523_s22, %s2523_s22 }
0x1704   :  { %p2530_p7 = por %p2529_p6, %p2528_p5 }
0x1706   :  { %p2531_p8 = pnand %p2530_p7, %p2524_p4 }
0x1708   :  { %2534 = shalt.err (!%p2531_p8)
}
0x1709   :  { %s2535_s24 = scalar_lea.hbm %s3297_s6, 256 }
0x170a   :  { %p2536_p9 = scmp.ne.s32.totalorder %s3297_s6, %s2535_s24  ;;  %p2539_p10 = scmp.lt.u32.totalorder %s2535_s24, %s3297_s6 }
0x170c   :  { %p2541_p11 = pnand %p2539_p10, %p2536_p9 }
0x170e   :  { %2544 = shalt.err (!%p2541_p11)
}
0x170f   :  { %s2591_s29 = smov 2   ;;  %1993 = vst.msk [vmem:[#allocation16] sm:$0x3] %vm1973_vm11, %v1992_v48  ;;  %s2545_s9 = scalar_lea.vmem %s3256_s13, 32 }
0x1710   :  { %2005 = dma.vmem_to_hbm [thread:$0]  %s2000_s11, 256, %s3297_s6, [#allocation9], %s2586_s5, %s2586_s5, %s2591_s29  }
0x1711   :  { %p2546_p12 = scmp.ne.s32.totalorder %s3256_s13, %s2545_s9  ;;  %p2550_p13 = scmp.lt.s32.totalorder %s3256_s13, %s3256_s13 }
0x1712   :  { %p2551_p0 = scmp.lt.s32.totalorder %s2545_s9, %s2545_s9 }
0x1714   :  { %p2552_p1 = por %p2551_p0, %p2550_p13 }
0x1716   :  { %p2553_p2 = pnand %p2552_p1, %p2546_p12 }
0x1718   :  { %2556 = shalt.err (!%p2553_p2)
}
0x1719   :  { %s2557_s10 = scalar_lea.hbm %s3299_s8, 32 }
0x171a   :  { %p2558_p3 = scmp.ne.s32.totalorder %s3299_s8, %s2557_s10  ;;  %p2561_p4 = scmp.lt.u32.totalorder %s2557_s10, %s3299_s8 }
0x171c   :  { %p2563_p5 = pnand %p2561_p4, %p2558_p3 }
0x171e   :  { %2566 = shalt.err (!%p2563_p5)
}
0x171f   :  { %2025 = dma.vmem_to_hbm [thread:$0]  %s3256_s13, 32, %s3299_s8, [#allocation15]  }
0x1720   :  { %2571 = dma.done.wait [#allocation9], 256  }
0x1721   :  { %2572 = vsyncadd [#allocation9], 4294967040 }
0x1722   :  { %2573 = dma.done.wait [#allocation15], 64  }
0x1723   :  { %2574 = vsyncadd [#allocation15], 4294967232 }
0x1724   :  { %2035 = vsyncpa [#allocation8], 1 }
0x1725   :  { %2036 = vsyncpa [#allocation11], 1 }
0x1726   :  { %2037 = vsyncpa [#allocation9], 1 }
0x1727   :  { %2038 = vsyncpa [#allocation15], 1 }

</bundles_post_ra>
